<compile_context>
chip_gen: v7x
topology: tpu7x:2x2x1
jax: 0.10.0
libtpu: 0.0.40
codegen_flags: <defaults>
</compile_context>

<pallas_src>
import jax
import jax.numpy as jnp
from jax.experimental import pallas as pl
from jax.experimental.pallas import tpu as pltpu

IN_DIM = 28 * 28            # 784
K_PAD = 896                 # 7 * 128, lane-aligned K for layer 1
H1, H2, H3, OUT = 1024, 512, 256, 1
OUT_PAD = 128               # lane-dense output slab; real logit is column 0


def _round_up(n, m):
    return ((n + m - 1) // m) * m


def _leaky_relu(x, slope=0.2):
    # max(x, slope*x) == LeakyReLU(slope) for 0 < slope < 1.
    return jnp.maximum(x, slope * x)


def _elementwise_dtype():
    """bf16 activation epilogues on bf16-native VPUs (v6e/v7x); f32 on v5e."""
    try:
        kind = jax.devices()[0].device_kind.lower()
    except Exception:
        return jnp.float32
    if "v5 lite" in kind or "v5e" in kind or "v5lite" in kind:
        return jnp.float32
    return jnp.bfloat16


def _make_kernel(ew_dtype):
    def kernel(x_ref, w1_ref, b1_ref, w2_ref, b2_ref, w3_ref, b3_ref,
               w4_ref, b4_ref, o_ref):
        # x_ref: (tb, 896) bf16 tile of the zero-padded flattened batch.
        # Weights bf16, biases f32.  Matmuls accumulate in f32 on the MXU;
        # LeakyReLU epilogues run in `ew_dtype` (bf16 on v6e/v7x, f32 on v5e).
        x = x_ref[...]

        h = jnp.dot(x, w1_ref[...], preferred_element_type=jnp.float32) + b1_ref[...]
        h = _leaky_relu(h.astype(ew_dtype))

        h = jnp.dot(h.astype(jnp.bfloat16), w2_ref[...],
                    preferred_element_type=jnp.float32) + b2_ref[...]
        h = _leaky_relu(h.astype(ew_dtype))

        h = jnp.dot(h.astype(jnp.bfloat16), w3_ref[...],
                    preferred_element_type=jnp.float32) + b3_ref[...]
        h = _leaky_relu(h.astype(ew_dtype))

        # Final layer: N padded to 128 so the store is lane-dense (column 0 real).
        logits = jnp.dot(h.astype(jnp.bfloat16), w4_ref[...],
                         preferred_element_type=jnp.float32) + b4_ref[...]
        # bf16 output slab halves the (already over-padded) writeback bytes.
        o_ref[...] = jax.nn.sigmoid(logits).astype(o_ref.dtype)

    return kernel


def prepare_params(params):
    """One-time conversion of f32 (in, out)-layout params into the kernel layout:
    zero-padded, weights bf16, biases f32.  Call once at init (and after each
    optimizer step in a training loop); the forward pass never re-casts weights.
    """
    w1, b1, w2, b2, w3, b3, w4, b4 = params
    w1p = jnp.pad(w1, ((0, K_PAD - IN_DIM), (0, 0))).astype(jnp.bfloat16)
    w2p = w2.astype(jnp.bfloat16)
    w3p = w3.astype(jnp.bfloat16)
    w4p = jnp.pad(w4, ((0, 0), (0, OUT_PAD - OUT))).astype(jnp.bfloat16)
    b1p = b1.reshape(1, H1).astype(jnp.float32)
    b2p = b2.reshape(1, H2).astype(jnp.float32)
    b3p = b3.reshape(1, H3).astype(jnp.float32)
    b4p = jnp.pad(b4.reshape(1, OUT), ((0, 0), (0, OUT_PAD - OUT))).astype(jnp.float32)
    return (w1p, b1p, w2p, b2p, w3p, b3p, w4p, b4p)


def _choose_tile(B, tb_max=512):
    """Batch tile: large enough to amortize per-grid-step overhead, but small
    enough that the grid has >= 2 steps whenever B >= ~256 so both v7x
    TensorCores get work.  Always a multiple of 16 (bf16 sublane packing)."""
    if B <= 128:
        return _round_up(B, 16)
    half = _round_up((B + 1) // 2, 128)
    return min(tb_max, half)


def discriminator_forward(x, prepared_params):
    """x: (B, 1, 28, 28) float32 NCHW (or already (B, 784)).
    prepared_params: output of prepare_params().  Returns (B, 1) float32."""
    w1p, b1p, w2p, b2p, w3p, b3p, w4p, b4p = prepared_params

    x2d = x.reshape(-1, IN_DIM)                      # == torch x.view(-1, 784)
    B = x2d.shape[0]
    tb = _choose_tile(B)
    B_pad = _round_up(B, tb)

    # Cast to bf16 and zero-pad rows (batch) + K (784 -> 896).  With
    # allow_input_fusion on operand 0 and the call under jit, this fuses into
    # the pallas_call instead of materializing a separate HBM array.
    x_pad = jnp.pad(x2d.astype(jnp.bfloat16),
                    ((0, B_pad - B), (0, K_PAD - IN_DIM)))

    grid = (B_pad // tb,)

    def x_map(i):
        return (i, 0)

    def param_map(i):
        return (0, 0)

    # NOTE: constant index_map on the weights/biases means Pallas only DMAs them
    # on step 0; keeping the default double-buffering costs ~3 MiB of VMEM and
    # stays well inside the 32 MiB limit even at tb=512, so pl.Buffered(1) is
    # deliberately not used.
    in_specs = [
        pl.BlockSpec((tb, K_PAD), x_map),
        pl.BlockSpec((K_PAD, H1), param_map),   pl.BlockSpec((1, H1), param_map),
        pl.BlockSpec((H1, H2), param_map),      pl.BlockSpec((1, H2), param_map),
        pl.BlockSpec((H2, H3), param_map),      pl.BlockSpec((1, H3), param_map),
        pl.BlockSpec((H3, OUT_PAD), param_map), pl.BlockSpec((1, OUT_PAD), param_map),
    ]
    out_spec = pl.BlockSpec((tb, OUT_PAD), x_map)

    out = pl.pallas_call(
        _make_kernel(_elementwise_dtype()),
        out_shape=jax.ShapeDtypeStruct((B_pad, OUT_PAD), jnp.bfloat16),
        grid_spec=pltpu.PrefetchScalarGridSpec(
            num_scalar_prefetch=0,
            grid=grid,
            in_specs=in_specs,
            out_specs=out_spec,
        ),
        compiler_params=pltpu.CompilerParams(
            dimension_semantics=("parallel",),
            vmem_limit_bytes=32 << 20,
            allow_input_fusion=[True] + [False] * 8,   # fuse x pad/cast producer
        ),
    )(x_pad, w1p, b1p, w2p, b2p, w3p, b3p, w4p, b4p)

    # Drop batch padding + lane padding; return f32 like the torch module.
    return out[:B, :OUT].astype(jnp.float32)


def init_params(key):
    """Deterministic param init; shapes follow nn.Linear (stored as (in, out))."""
    ks = jax.random.split(key, 8)

    def linear(kw, kb, fan_in, fan_out):
        # PyTorch default: U(-1/sqrt(fan_in), 1/sqrt(fan_in))
        bound = 1.0 / jnp.sqrt(fan_in)
        w = jax.random.uniform(kw, (fan_in, fan_out), jnp.float32, -bound, bound)
        b = jax.random.uniform(kb, (1, fan_out), jnp.float32, -bound, bound)
        return w, b

    w1, b1 = linear(ks[0], ks[1], IN_DIM, H1)
    w2, b2 = linear(ks[2], ks[3], H1, H2)
    w3, b3 = linear(ks[4], ks[5], H2, H3)
    w4, b4 = linear(ks[6], ks[7], H3, OUT)
    return (w1, b1, w2, b2, w3, b3, w4, b4)


def reference_forward(x, params, ew_dtype):
    """Pure-JAX reference mirroring the kernel's dtype flow (bf16 matmul inputs,
    f32 accumulation, ew_dtype epilogues, bf16 output store)."""
    w1, b1, w2, b2, w3, b3, w4, b4 = params
    h = x.reshape(-1, IN_DIM).astype(jnp.float32)

    def layer(h, w, b):
        return jnp.dot(h.astype(jnp.bfloat16), w.astype(jnp.bfloat16),
                       preferred_element_type=jnp.float32) + b.astype(jnp.float32)

    h = _leaky_relu(layer(h, w1, b1).astype(ew_dtype))
    h = _leaky_relu(layer(h, w2, b2).astype(ew_dtype))
    h = _leaky_relu(layer(h, w3, b3).astype(ew_dtype))
    out = jax.nn.sigmoid(layer(h, w4, b4))
    return out.astype(jnp.bfloat16).astype(jnp.float32)


if __name__ == "__main__":
    key = jax.random.PRNGKey(0)
    k_param, k_x1, k_x2 = jax.random.split(key, 3)

    params = init_params(k_param)
    dev_params = prepare_params(params)          # pad + bf16 cast ONCE
    ew_dtype = _elementwise_dtype()

    fwd = jax.jit(discriminator_forward)

    # Small MNIST-like batch, NCHW as the PyTorch module would receive.
    # B=10 is deliberately not a multiple of 16 to exercise batch padding.
    x_small = jax.random.normal(k_x1, (10, 1, 28, 28), jnp.float32)
    out_small = jax.block_until_ready(fwd(x_small, dev_params))
    ref_small = reference_forward(x_small, params, ew_dtype)
    assert out_small.shape == (10, 1)
    assert jnp.allclose(out_small, ref_small, atol=3e-3, rtol=2e-3), \
        "mismatch vs reference (small batch)"

    # Larger batch: tile = 256, padded 272 -> 512, 2 grid steps (both v7x TCs).
    x_big = jax.random.normal(k_x2, (272, 1, 28, 28), jnp.float32)
    out_big = jax.block_until_ready(fwd(x_big, dev_params))
    ref_big = reference_forward(x_big, params, ew_dtype)
    assert out_big.shape == (272, 1)
    assert jnp.allclose(out_big, ref_big, atol=3e-3, rtol=2e-3), \
        "mismatch vs reference (large batch)"

    print("KERNEL_OK")
</pallas_src>

<mosaic_0001>
module attributes {stable_mosaic.version = 11 : i64} {
  func.func @kernel(%arg0: i32, %arg1: memref<16x896xbf16, #tpu.memory_space<vmem>>, %arg2: memref<896x1024xbf16, #tpu.memory_space<vmem>>, %arg3: memref<1x1024xf32, #tpu.memory_space<vmem>>, %arg4: memref<1024x512xbf16, #tpu.memory_space<vmem>>, %arg5: memref<1x512xf32, #tpu.memory_space<vmem>>, %arg6: memref<512x256xbf16, #tpu.memory_space<vmem>>, %arg7: memref<1x256xf32, #tpu.memory_space<vmem>>, %arg8: memref<256x128xbf16, #tpu.memory_space<vmem>>, %arg9: memref<1x128xf32, #tpu.memory_space<vmem>>, %arg10: memref<16x128xbf16, #tpu.memory_space<vmem>>) attributes {dimension_semantics = [#tpu.dimension_semantics<parallel>], iteration_bounds = array<i64: 1>, scalar_prefetch = 0 : i64, scratch_operands = 0 : i64, tpu.core_type = #tpu.core_type<tc>, window_params = [{transform_indices = @transform_0, window_bounds = array<i64: 16, 896>}, {pipeline_mode = #tpu.pipeline_mode<synchronous>, transform_indices = @transform_1, window_bounds = array<i64: 896, 1024>}, {pipeline_mode = #tpu.pipeline_mode<synchronous>, transform_indices = @transform_2, window_bounds = array<i64: 1, 1024>}, {pipeline_mode = #tpu.pipeline_mode<synchronous>, transform_indices = @transform_3, window_bounds = array<i64: 1024, 512>}, {pipeline_mode = #tpu.pipeline_mode<synchronous>, transform_indices = @transform_4, window_bounds = array<i64: 1, 512>}, {pipeline_mode = #tpu.pipeline_mode<synchronous>, transform_indices = @transform_5, window_bounds = array<i64: 512, 256>}, {pipeline_mode = #tpu.pipeline_mode<synchronous>, transform_indices = @transform_6, window_bounds = array<i64: 1, 256>}, {pipeline_mode = #tpu.pipeline_mode<synchronous>, transform_indices = @transform_7, window_bounds = array<i64: 256, 128>}, {pipeline_mode = #tpu.pipeline_mode<synchronous>, transform_indices = @transform_8, window_bounds = array<i64: 1, 128>}, {transform_indices = @transform_9, window_bounds = array<i64: 16, 128>}]} {
    %c0 = arith.constant 0 : index
    %c0_0 = arith.constant 0 : index
    %0 = vector.load %arg1[%c0, %c0_0] : memref<16x896xbf16, #tpu.memory_space<vmem>>, vector<16x896xbf16>
    %c0_1 = arith.constant 0 : index
    %c0_2 = arith.constant 0 : index
    %1 = vector.load %arg2[%c0_1, %c0_2] : memref<896x1024xbf16, #tpu.memory_space<vmem>>, vector<896x1024xbf16>
    %cst = arith.constant dense<0.000000e+00> : vector<16x1024xf32>
    %2 = tpu.matmul %0, %1, %cst {dimension_numbers = #tpu.dot_dimension_numbers<[1], [0], [0], [1], [0, 0, 1, 1], [], []>} : vector<16x896xbf16>, vector<896x1024xbf16>, vector<16x1024xf32> -> vector<16x1024xf32>
    %c0_3 = arith.constant 0 : index
    %c0_4 = arith.constant 0 : index
    %3 = vector.load %arg3[%c0_3, %c0_4] : memref<1x1024xf32, #tpu.memory_space<vmem>>, vector<1x1024xf32>
    %4 = vector.broadcast %3 : vector<1x1024xf32> to vector<16x1024xf32>
    %5 = arith.addf %2, %4 : vector<16x1024xf32>
    %6 = arith.truncf %5 : vector<16x1024xf32> to vector<16x1024xbf16>
    %cst_5 = arith.constant 2.001950e-01 : bf16
    %7 = vector.broadcast %cst_5 : bf16 to vector<16x1024xbf16>
    %8 = arith.mulf %7, %6 : vector<16x1024xbf16>
    %9 = arith.maximumf %6, %8 : vector<16x1024xbf16>
    %c0_6 = arith.constant 0 : index
    %c0_7 = arith.constant 0 : index
    %10 = vector.load %arg4[%c0_6, %c0_7] : memref<1024x512xbf16, #tpu.memory_space<vmem>>, vector<1024x512xbf16>
    %cst_8 = arith.constant dense<0.000000e+00> : vector<16x512xf32>
    %11 = tpu.matmul %9, %10, %cst_8 {dimension_numbers = #tpu.dot_dimension_numbers<[1], [0], [0], [1], [0, 0, 1, 1], [], []>} : vector<16x1024xbf16>, vector<1024x512xbf16>, vector<16x512xf32> -> vector<16x512xf32>
    %c0_9 = arith.constant 0 : index
    %c0_10 = arith.constant 0 : index
    %12 = vector.load %arg5[%c0_9, %c0_10] : memref<1x512xf32, #tpu.memory_space<vmem>>, vector<1x512xf32>
    %13 = vector.broadcast %12 : vector<1x512xf32> to vector<16x512xf32>
    %14 = arith.addf %11, %13 : vector<16x512xf32>
    %15 = arith.truncf %14 : vector<16x512xf32> to vector<16x512xbf16>
    %cst_11 = arith.constant 2.001950e-01 : bf16
    %16 = vector.broadcast %cst_11 : bf16 to vector<16x512xbf16>
    %17 = arith.mulf %16, %15 : vector<16x512xbf16>
    %18 = arith.maximumf %15, %17 : vector<16x512xbf16>
    %c0_12 = arith.constant 0 : index
    %c0_13 = arith.constant 0 : index
    %19 = vector.load %arg6[%c0_12, %c0_13] : memref<512x256xbf16, #tpu.memory_space<vmem>>, vector<512x256xbf16>
    %cst_14 = arith.constant dense<0.000000e+00> : vector<16x256xf32>
    %20 = tpu.matmul %18, %19, %cst_14 {dimension_numbers = #tpu.dot_dimension_numbers<[1], [0], [0], [1], [0, 0, 1, 1], [], []>} : vector<16x512xbf16>, vector<512x256xbf16>, vector<16x256xf32> -> vector<16x256xf32>
    %c0_15 = arith.constant 0 : index
    %c0_16 = arith.constant 0 : index
    %21 = vector.load %arg7[%c0_15, %c0_16] : memref<1x256xf32, #tpu.memory_space<vmem>>, vector<1x256xf32>
    %22 = vector.broadcast %21 : vector<1x256xf32> to vector<16x256xf32>
    %23 = arith.addf %20, %22 : vector<16x256xf32>
    %24 = arith.truncf %23 : vector<16x256xf32> to vector<16x256xbf16>
    %cst_17 = arith.constant 2.001950e-01 : bf16
    %25 = vector.broadcast %cst_17 : bf16 to vector<16x256xbf16>
    %26 = arith.mulf %25, %24 : vector<16x256xbf16>
    %27 = arith.maximumf %24, %26 : vector<16x256xbf16>
    %c0_18 = arith.constant 0 : index
    %c0_19 = arith.constant 0 : index
    %28 = vector.load %arg8[%c0_18, %c0_19] : memref<256x128xbf16, #tpu.memory_space<vmem>>, vector<256x128xbf16>
    %cst_20 = arith.constant dense<0.000000e+00> : vector<16x128xf32>
    %29 = tpu.matmul %27, %28, %cst_20 {dimension_numbers = #tpu.dot_dimension_numbers<[1], [0], [0], [1], [0, 0, 1, 1], [], []>} : vector<16x256xbf16>, vector<256x128xbf16>, vector<16x128xf32> -> vector<16x128xf32>
    %c0_21 = arith.constant 0 : index
    %c0_22 = arith.constant 0 : index
    %30 = vector.load %arg9[%c0_21, %c0_22] : memref<1x128xf32, #tpu.memory_space<vmem>>, vector<1x128xf32>
    %31 = vector.broadcast %30 : vector<1x128xf32> to vector<16x128xf32>
    %32 = arith.addf %29, %31 : vector<16x128xf32>
    %33 = arith.negf %32 : vector<16x128xf32>
    %34 = math.exp %33 : vector<16x128xf32>
    %cst_23 = arith.constant 1.000000e+00 : f32
    %35 = vector.broadcast %cst_23 : f32 to vector<16x128xf32>
    %36 = arith.addf %35, %34 : vector<16x128xf32>
    %37 = arith.divf %35, %36 : vector<16x128xf32>
    %38 = arith.truncf %37 : vector<16x128xf32> to vector<16x128xbf16>
    %c0_24 = arith.constant 0 : index
    %c0_25 = arith.constant 0 : index
    %39 = vector.load %arg10[%c0_24, %c0_25] : memref<16x128xbf16, #tpu.memory_space<vmem>>, vector<16x128xbf16>
    tpu.vector_store %arg10[%c0_24, %c0_25], %38 {strides = array<i32>} : memref<16x128xbf16, #tpu.memory_space<vmem>>, vector<16x128xbf16>,
    return
  }
  func.func @transform_0(%arg0: i32) -> (i32, i32) {
    %c0_i32 = arith.constant 0 : i32
    %c0_i32_0 = arith.constant 0 : i32
    return %arg0, %c0_i32 : i32, i32
  }
  func.func @transform_1(%arg0: i32) -> (i32, i32) {
    %c0_i32 = arith.constant 0 : i32
    %c0_i32_0 = arith.constant 0 : i32
    %c0_i32_1 = arith.constant 0 : i32
    return %c0_i32, %c0_i32_0 : i32, i32
  }
  func.func @transform_2(%arg0: i32) -> (i32, i32) {
    %c0_i32 = arith.constant 0 : i32
    %c0_i32_0 = arith.constant 0 : i32
    %c0_i32_1 = arith.constant 0 : i32
    return %c0_i32, %c0_i32_0 : i32, i32
  }
  func.func @transform_3(%arg0: i32) -> (i32, i32) {
    %c0_i32 = arith.constant 0 : i32
    %c0_i32_0 = arith.constant 0 : i32
    %c0_i32_1 = arith.constant 0 : i32
    return %c0_i32, %c0_i32_0 : i32, i32
  }
  func.func @transform_4(%arg0: i32) -> (i32, i32) {
    %c0_i32 = arith.constant 0 : i32
    %c0_i32_0 = arith.constant 0 : i32
    %c0_i32_1 = arith.constant 0 : i32
    return %c0_i32, %c0_i32_0 : i32, i32
  }
  func.func @transform_5(%arg0: i32) -> (i32, i32) {
    %c0_i32 = arith.constant 0 : i32
    %c0_i32_0 = arith.constant 0 : i32
    %c0_i32_1 = arith.constant 0 : i32
    return %c0_i32, %c0_i32_0 : i32, i32
  }
  func.func @transform_6(%arg0: i32) -> (i32, i32) {
    %c0_i32 = arith.constant 0 : i32
    %c0_i32_0 = arith.constant 0 : i32
    %c0_i32_1 = arith.constant 0 : i32
    return %c0_i32, %c0_i32_0 : i32, i32
  }
  func.func @transform_7(%arg0: i32) -> (i32, i32) {
    %c0_i32 = arith.constant 0 : i32
    %c0_i32_0 = arith.constant 0 : i32
    %c0_i32_1 = arith.constant 0 : i32
    return %c0_i32, %c0_i32_0 : i32, i32
  }
  func.func @transform_8(%arg0: i32) -> (i32, i32) {
    %c0_i32 = arith.constant 0 : i32
    %c0_i32_0 = arith.constant 0 : i32
    %c0_i32_1 = arith.constant 0 : i32
    return %c0_i32, %c0_i32_0 : i32, i32
  }
  func.func @transform_9(%arg0: i32) -> (i32, i32) {
    %c0_i32 = arith.constant 0 : i32
    %c0_i32_0 = arith.constant 0 : i32
    return %arg0, %c0_i32 : i32, i32
  }
}

</mosaic_0001>

<bundles_post_ra>
// kernel: discriminator_forward.2
= control target key start
LH: loop header
LB: loop body
LE: loop exit
PB: predicated region body
PF: predicated region fallthrough
CT: control target
= control target key end

     0   :  { %s8620_s0 = inlined_call_operand.hbm [shape: bf16[896,1024], index: 0, kind: input, shape index: {}]   ;;  %s8621_s1 = inlined_call_operand.hbm [shape: f32[1,1024], index: 1, kind: input, shape index: {}]   ;;  %s8622_s2 = inlined_call_operand.hbm [shape: bf16[1024,512], index: 2, kind: input, shape index: {}]   ;;  %s8623_s3 = inlined_call_operand.hbm [shape: f32[1,512], index: 3, kind: input, shape index: {}]   ;;  %s8624_s4 = inlined_call_operand.hbm [shape: bf16[512,256], index: 4, kind: input, shape index: {}]   ;;  %s8625_s5 = inlined_call_operand.hbm [shape: f32[1,256], index: 5, kind: input, shape index: {}]   ;;  %s8626_s6 = inlined_call_operand.hbm [shape: bf16[256,128], index: 6, kind: input, shape index: {}]   ;;  %s8627_s7 = inlined_call_operand.hbm [shape: f32[1,128], index: 7, kind: input, shape index: {}]   ;;  %s8628_s8 = inlined_call_operand.vmem [shape: bf16[10,784], index: 8, kind: input, shape index: {}]   ;;  %s8629_s9 = inlined_call_operand.<no memory space> [shape: bf16[], index: 9, kind: input, shape index: {}]   ;;  %s8630_s10 = inlined_call_operand.vmem [shape: bf16[16,128], index: 10, kind: output, shape index: {}]  }
   0x1   :  { %v15_v0 = vstv %s8629_s9 }
   0x2   :  { %v8308_v1 = vunpack.i.l.bf16 %v15_v0 }
   0x3   :  { %20 = vsyncpa [#allocation8], 0 }
   0x4   :  { %21 = vsyncpa [#allocation10], 0 }
   0x5   :  { %22 = vsyncpa [#allocation13], 0 }
   0x6   :  { %23 = vsyncpa [#allocation16], 0 }
   0x7   :  { %24 = vsyncpa [#allocation19], 0  ;;  %s8232_s15 = smov [#allocation9]   ;;  %s8233_s17 = smov [#allocation12]  }
   0x8   :  { %s45_s16 = sshll.u32 %s8232_s15, 4  ;;  %s67_s18 = sshll.u32 %s8233_s17, 4  ;;  %s46_s16 = int_to_ptr.vmem [resolvable:$true] %s45_s16  ;;  %s68_s18 = int_to_ptr.vmem [resolvable:$true] %s67_s18 }
   0x9   :  { %s8046_s21 = scalar_lea.hbm %s8621_s1, 128 }
   0xa   :  { %p8047_p0 = scmp.ne.s32.totalorder %s8621_s1, %s8046_s21  ;;  %p8050_p1 = scmp.lt.u32.totalorder %s8046_s21, %s8621_s1 }
   0xc   :  { %p8052_p2 = pnand %p8050_p1, %p8047_p0 }
   0xe   :  { %8055 = shalt.err (!%p8052_p2)
}
   0xf   :  { %s8056_s25 = scalar_lea.vmem %s46_s16, 128  ;;  %p8061_p4 = scmp.lt.s32.totalorder %s46_s16, %s46_s16 }
  0x10   :  { %p8057_p3 = scmp.ne.s32.totalorder %s46_s16, %s8056_s25  ;;  %p8062_p5 = scmp.lt.s32.totalorder %s8056_s25, %s8056_s25 }
  0x12   :  { %p8063_p6 = por %p8062_p5, %p8061_p4 }
  0x14   :  { %p8064_p7 = pnand %p8063_p6, %p8057_p3 }
  0x16   :  { %8067 = shalt.err (!%p8064_p7)
}
  0x17   :  { %48 = dma.hbm_to_vmem [thread:$0]  %s8621_s1, 128, %s46_s16, [#allocation10]  }
  0x18   :  { %s8068_s30 = scalar_lea.hbm %s8623_s3, 64 }
  0x19   :  { %p8069_p8 = scmp.ne.s32.totalorder %s8623_s3, %s8068_s30  ;;  %p8072_p9 = scmp.lt.u32.totalorder %s8068_s30, %s8623_s3 }
  0x1b   :  { %p8074_p10 = pnand %p8072_p9, %p8069_p8 }
  0x1d   :  { %8077 = shalt.err (!%p8074_p10)
}
  0x1e   :  { %s8078_s15 = scalar_lea.vmem %s68_s18, 64  ;;  %p8083_p12 = scmp.lt.s32.totalorder %s68_s18, %s68_s18 }
  0x1f   :  { %p8079_p11 = scmp.ne.s32.totalorder %s68_s18, %s8078_s15  ;;  %p8084_p13 = scmp.lt.s32.totalorder %s8078_s15, %s8078_s15 }
  0x21   :  { %p8085_p0 = por %p8084_p13, %p8083_p12 }
  0x23   :  { %p8086_p1 = pnand %p8085_p0, %p8079_p11 }
  0x25   :  { %8089 = shalt.err (!%p8086_p1)
}
  0x26   :  { %70 = dma.hbm_to_vmem [thread:$0]  %s8623_s3, 64, %s68_s18, [#allocation13]  }
  0x27   :  { %s8234_s17 = smov [#allocation15]   ;;  %s8235_s20 = smov [#allocation7]  }
  0x28   :  { %s89_s19 = sshll.u32 %s8234_s17, 4  ;;  %s32_s21 = sshll.u32 %s8235_s20, 4  ;;  %s90_s19 = int_to_ptr.vmem [resolvable:$true] %s89_s19  ;;  %s8334_s21 = int_to_ptr.vmem [resolvable:$true] %s32_s21 }
  0x29   :  { %s8090_s9 = scalar_lea.hbm %s8625_s5, 32 }
  0x2a   :  { %p8091_p2 = scmp.ne.s32.totalorder %s8625_s5, %s8090_s9  ;;  %p8094_p3 = scmp.lt.u32.totalorder %s8090_s9, %s8625_s5 }
  0x2c   :  { %p8096_p4 = pnand %p8094_p3, %p8091_p2 }
  0x2e   :  { %8099 = shalt.err (!%p8096_p4)
}
  0x2f   :  { %s8100_s3 = scalar_lea.vmem %s90_s19, 32  ;;  %p8105_p6 = scmp.lt.s32.totalorder %s90_s19, %s90_s19 }
  0x30   :  { %p8101_p5 = scmp.ne.s32.totalorder %s90_s19, %s8100_s3  ;;  %p8106_p7 = scmp.lt.s32.totalorder %s8100_s3, %s8100_s3 }
  0x32   :  { %p8107_p8 = por %p8106_p7, %p8105_p6 }
  0x34   :  { %p8108_p9 = pnand %p8107_p8, %p8101_p5 }
  0x36   :  { %8111 = shalt.err (!%p8108_p9)
}
  0x37   :  { %92 = dma.hbm_to_vmem [thread:$0]  %s8625_s5, 32, %s90_s19, [#allocation16]  }
  0x38   :  { %s8112_s11 = scalar_lea.hbm %s8620_s0, 57344 }
  0x39   :  { %p8113_p10 = scmp.ne.s32.totalorder %s8620_s0, %s8112_s11  ;;  %p8116_p11 = scmp.lt.u32.totalorder %s8112_s11, %s8620_s0 }
  0x3b   :  { %p8118_p12 = pnand %p8116_p11, %p8113_p10 }
  0x3d   :  { %8121 = shalt.err (!%p8118_p12)
}
  0x3e   :  { %s8122_s1 = scalar_lea.vmem %s8334_s21, 57344  ;;  %p8127_p0 = scmp.lt.s32.totalorder %s8334_s21, %s8334_s21 }
  0x3f   :  { %p8123_p13 = scmp.ne.s32.totalorder %s8334_s21, %s8122_s1  ;;  %p8128_p1 = scmp.lt.s32.totalorder %s8122_s1, %s8122_s1 }
  0x41   :  { %p8129_p2 = por %p8128_p1, %p8127_p0 }
  0x43   :  { %p8130_p3 = pnand %p8129_p2, %p8123_p13 }
  0x45   :  { %8133 = shalt.err (!%p8130_p3)
}
  0x46   :  { %s8236_s5 = smov 512   ;;  %s8237_s16 = smov 32  }
  0x47   :  { %38 = dma.hbm_to_vmem [thread:$0]  %s8620_s0, 57344, %s8334_s21, [#allocation8], %s8236_s5, %s8236_s5, %s8237_s16  }
  0x48   :  { %s8238_s20 = smov [#allocation11]   ;;  %s8134_s24 = scalar_lea.hbm %s8622_s2, 32768 }
  0x49   :  { %s54_s22 = sshll.u32 %s8238_s20, 4  ;;  %p8135_p4 = scmp.ne.s32.totalorder %s8622_s2, %s8134_s24  ;;  %s55_s22 = int_to_ptr.vmem [resolvable:$true] %s54_s22 }
  0x4a   :  { %p8138_p5 = scmp.lt.u32.totalorder %s8134_s24, %s8622_s2 }
  0x4c   :  { %p8140_p6 = pnand %p8138_p5, %p8135_p4 }
  0x4e   :  { %8143 = shalt.err (!%p8140_p6)
}
  0x4f   :  { %s8144_s18 = scalar_lea.vmem %s55_s22, 32768  ;;  %p8149_p8 = scmp.lt.s32.totalorder %s55_s22, %s55_s22 }
  0x50   :  { %p8145_p7 = scmp.ne.s32.totalorder %s55_s22, %s8144_s18  ;;  %p8150_p9 = scmp.lt.s32.totalorder %s8144_s18, %s8144_s18 }
  0x52   :  { %p8151_p10 = por %p8150_p9, %p8149_p8 }
  0x54   :  { %p8152_p11 = pnand %p8151_p10, %p8145_p7 }
  0x56   :  { %8155 = shalt.err (!%p8152_p11)
}
  0x57   :  { %s8239_s0 = smov 256   ;;  %s8240_s21 = smov 16  }
  0x58   :  { %60 = dma.hbm_to_vmem [thread:$0]  %s8622_s2, 32768, %s55_s22, [#allocation10], %s8239_s0, %s8239_s0, %s8240_s21  }
  0x59   :  { %s8241_s30 = smov [#allocation14]   ;;  %s8156_s14 = scalar_lea.hbm %s8624_s4, 8192 }
  0x5a   :  { %s76_s11 = sshll.u32 %s8241_s30, 4  ;;  %p8157_p12 = scmp.ne.s32.totalorder %s8624_s4, %s8156_s14  ;;  %s77_s11 = int_to_ptr.vmem [resolvable:$true] %s76_s11 }
  0x5b   :  { %p8160_p13 = scmp.lt.u32.totalorder %s8156_s14, %s8624_s4 }
  0x5d   :  { %p8162_p0 = pnand %p8160_p13, %p8157_p12 }
  0x5f   :  { %8165 = shalt.err (!%p8162_p0)
}
  0x60   :  { %s8166_s17 = scalar_lea.vmem %s77_s11, 8192  ;;  %p8171_p2 = scmp.lt.s32.totalorder %s77_s11, %s77_s11 }
  0x61   :  { %p8167_p1 = scmp.ne.s32.totalorder %s77_s11, %s8166_s17  ;;  %p8172_p3 = scmp.lt.s32.totalorder %s8166_s17, %s8166_s17 }
  0x63   :  { %p8173_p4 = por %p8172_p3, %p8171_p2 }
  0x65   :  { %p8174_p5 = pnand %p8173_p4, %p8167_p1 }
  0x67   :  { %8177 = shalt.err (!%p8174_p5)
}
  0x68   :  { %s8242_s2 = smov 128   ;;  %s8243_s19 = smov 8  }
  0x69   :  { %82 = dma.hbm_to_vmem [thread:$0]  %s8624_s4, 8192, %s77_s11, [#allocation13], %s8242_s2, %s8242_s2, %s8243_s19  }
  0x6a   :  { %s8244_s23 = smov [#allocation17]   ;;  %s8178_s26 = scalar_lea.hbm %s8626_s6, 2048 }
  0x6b   :  { %s98_s9 = sshll.u32 %s8244_s23, 4  ;;  %p8179_p6 = scmp.ne.s32.totalorder %s8626_s6, %s8178_s26  ;;  %s99_s9 = int_to_ptr.vmem [resolvable:$true] %s98_s9 }
  0x6c   :  { %p8182_p7 = scmp.lt.u32.totalorder %s8178_s26, %s8626_s6 }
  0x6e   :  { %p8184_p8 = pnand %p8182_p7, %p8179_p6 }
  0x70   :  { %8187 = shalt.err (!%p8184_p8)
}
  0x71   :  { %s8188_s21 = scalar_lea.vmem %s99_s9, 2048  ;;  %p8193_p10 = scmp.lt.s32.totalorder %s99_s9, %s99_s9 }
  0x72   :  { %p8189_p9 = scmp.ne.s32.totalorder %s99_s9, %s8188_s21  ;;  %p8194_p11 = scmp.lt.s32.totalorder %s8188_s21, %s8188_s21 }
  0x74   :  { %p8195_p12 = por %p8194_p11, %p8193_p10 }
  0x76   :  { %p8196_p13 = pnand %p8195_p12, %p8189_p9 }
  0x78   :  { %8199 = shalt.err (!%p8196_p13)
}
  0x79   :  { %s8245_s4 = smov 64   ;;  %s8246_s28 = smov 4  }
  0x7a   :  { %104 = dma.hbm_to_vmem [thread:$0]  %s8626_s6, 2048, %s99_s9, [#allocation16], %s8245_s4, %s8245_s4, %s8246_s28  }
  0x7b   :  { %s8247_s11 = smov [#allocation18]   ;;  %s8200_s15 = scalar_lea.hbm %s8627_s7, 16 }
  0x7c   :  { %s111_s12 = sshll.u32 %s8247_s11, 4  ;;  %p8201_p0 = scmp.ne.s32.totalorder %s8627_s7, %s8200_s15  ;;  %s112_s12 = int_to_ptr.vmem [resolvable:$true] %s111_s12 }
  0x7d   :  { %p8204_p1 = scmp.lt.u32.totalorder %s8200_s15, %s8627_s7 }
  0x7f   :  { %p8206_p2 = pnand %p8204_p1, %p8201_p0 }
  0x81   :  { %8209 = shalt.err (!%p8206_p2)
}
  0x82   :  { %s8210_s2 = scalar_lea.vmem %s112_s12, 16  ;;  %s8214_s6 = scalar_lea.vmem %s112_s12, 32 }
  0x83   :  { %p8211_p3 = scmp.ne.s32.totalorder %s112_s12, %s8210_s2  ;;  %p8215_p4 = scmp.lt.s32.totalorder %s112_s12, %s112_s12 }
  0x84   :  { %p8216_p5 = scmp.lt.s32.totalorder %s8214_s6, %s8210_s2 }
  0x86   :  { %p8217_p6 = por %p8216_p5, %p8215_p4 }
  0x88   :  { %p8218_p7 = pnand %p8217_p6, %p8211_p3 }
  0x8a   :  { %8221 = shalt.err (!%p8218_p7)
}
  0x8b   :  { %114 = dma.hbm_to_vmem [thread:$0]  %s8627_s7, 16, %s112_s12, [#allocation19]  }
  0x8c   :  { %8222 = dma.done.wait [#allocation8], 57344  }
  0x8d   :  { %8223 = vsyncadd [#allocation8], 4294909952 }
  0x8e   :  { %8224 = dma.done.wait [#allocation10], 32896  }
  0x8f   :  { %8225 = vsyncadd [#allocation10], 4294934400 }
  0x90   :  { %8226 = dma.done.wait [#allocation13], 8256  }
  0x91   :  { %8227 = vsyncadd [#allocation13], 4294959040 }
  0x92   :  { %8228 = dma.done.wait [#allocation16], 2080  }
  0x93   :  { %8229 = vsyncadd [#allocation16], 4294965216 }
  0x94   :  { %8230 = dma.done.wait [#allocation19], 16  }
  0x95   :  { %8231 = vsyncadd [#allocation19], 4294967280  ;;  %v471_v2 = vld [vmem:[#allocation7] sm:$0xff]  ;;  %v263_v31 = vlaneseq }
  0x96   :  { %v475_v3 = vld [vmem:[#allocation7 + $0x20] sm:$0xff] }
  0x97   :  { %v599_v4 = vld [vmem:[#allocation7 + $0x400] sm:$0xff]  ;;  %v6579_v5 = vcombine.high %v471_v2, %v475_v3  ;;  %v6578_v7 = vcombine.low %v471_v2, %v475_v3  ;;  %v8414_v40 = vshrl.u32 %v263_v31, 7  ;;  %v8429_v2 = vld [vmem:[%s8628_s8 + $0x8] sm:$0xff]  }
  0x98   :  { %v603_v6 = vld [vmem:[#allocation7 + $0x420] sm:$0xff] }
  0x99   :  { %v479_v8 = vld [vmem:[#allocation7 + $0x40] sm:$0xff]  ;;  %v6707_v10 = vcombine.high %v599_v4, %v603_v6  ;;  %v6706_v11 = vcombine.low %v599_v4, %v603_v6  ;;  %3237 = vmatprep.subr.bf16.mxu1 %v6579_v5  ;;  %v8417_v49 = vadd.s32 8, %v8414_v40 }
  0x9a   :  { %v483_v9 = vld [vmem:[#allocation7 + $0x60] sm:$0xff]  ;;  %3238 = vmatpush1.bf16.msra.mxu1 %v6578_v7 }
  0x9b   :  { %v6587_v12 = vcombine.high %v479_v8, %v483_v9  ;;  %v607_v13 = vld [vmem:[#allocation7 + $0x440] sm:$0xff]  ;;  %3280 = vmatprep.subr.bf16.mxu0 %v6707_v10  ;;  %v6586_v20 = vcombine.low %v479_v8, %v483_v9  ;;  %vm288_vm0 = vcmp.lt.s32.totalorder %v8417_v49, 10 }
  0x9c   :  { %v611_v14 = vld [vmem:[#allocation7 + $0x460] sm:$0xff]  ;;  %3281 = vmatpush1.bf16.msra.mxu0 %v6706_v11 }
  0x9d   :  { %v487_v15 = vld [vmem:[#allocation7 + $0x80] sm:$0xff]  ;;  %v6715_v16 = vcombine.high %v607_v13, %v611_v14  ;;  %3239 = vmatprep.subr.bf16.mxu1 %v6587_v12  ;;  %v6714_v21 = vcombine.low %v607_v13, %v611_v14  ;;  %v8248_v13 = vmov 0.0  }
  0x9e   :  { %v491_v17 = vld [vmem:[#allocation7 + $0xa0] sm:$0xff]  ;;  %3240 = vmatpush1.bf16.msra.mxu1 %v6586_v20 }
  0x9f   :  { %v615_v18 = vld [vmem:[#allocation7 + $0x480] sm:$0xff]  ;;  %v6595_v22 = vcombine.high %v487_v15, %v491_v17  ;;  %3282 = vmatprep.subr.bf16.mxu0 %v6715_v16  ;;  %v6594_v28 = vcombine.low %v487_v15, %v491_v17 }
  0xa0   :  { %v619_v19 = vld [vmem:[#allocation7 + $0x4a0] sm:$0xff]  ;;  %3283 = vmatpush1.bf16.msra.mxu0 %v6714_v21 }
  0xa1   :  { %v6723_v23 = vcombine.high %v615_v18, %v619_v19  ;;  %v495_v24 = vld [vmem:[#allocation7 + $0xc0] sm:$0xff]  ;;  %3241 = vmatprep.subr.bf16.mxu1 %v6595_v22  ;;  %v6722_v29 = vcombine.low %v615_v18, %v619_v19 }
  0xa2   :  { %v499_v25 = vld [vmem:[#allocation7 + $0xe0] sm:$0xff]  ;;  %3242 = vmatpush1.bf16.msra.mxu1 %v6594_v28 }
  0xa3   :  { %v623_v26 = vld [vmem:[#allocation7 + $0x4c0] sm:$0xff]  ;;  %v6603_v30 = vcombine.high %v495_v24, %v499_v25  ;;  %3284 = vmatprep.subr.bf16.mxu0 %v6723_v23  ;;  %v6602_v37 = vcombine.low %v495_v24, %v499_v25 }
  0xa4   :  { %v627_v27 = vld [vmem:[#allocation7 + $0x4e0] sm:$0xff]  ;;  %3285 = vmatpush1.bf16.msra.mxu0 %v6722_v29 }
  0xa5   :  { %v6731_v32 = vcombine.high %v623_v26, %v627_v27  ;;  %v503_v33 = vld [vmem:[#allocation7 + $0x100] sm:$0xff]  ;;  %3243 = vmatprep.subr.bf16.mxu1 %v6603_v30  ;;  %v6730_v38 = vcombine.low %v623_v26, %v627_v27 }
  0xa6   :  { %v507_v34 = vld [vmem:[#allocation7 + $0x120] sm:$0xff]  ;;  %3244 = vmatpush1.bf16.msra.mxu1 %v6602_v37 }
  0xa7   :  { %v631_v35 = vld [vmem:[#allocation7 + $0x500] sm:$0xff]  ;;  %v6611_v39 = vcombine.high %v503_v33, %v507_v34  ;;  %3286 = vmatprep.subr.bf16.mxu0 %v6731_v32  ;;  %v6610_v46 = vcombine.low %v503_v33, %v507_v34 }
  0xa8   :  { %v635_v36 = vld [vmem:[#allocation7 + $0x520] sm:$0xff]  ;;  %3287 = vmatpush1.bf16.msra.mxu0 %v6730_v38 }
  0xa9   :  { %v6739_v41 = vcombine.high %v631_v35, %v635_v36  ;;  %v511_v42 = vld [vmem:[#allocation7 + $0x140] sm:$0xff]  ;;  %3245 = vmatprep.subr.bf16.mxu1 %v6611_v39  ;;  %v6738_v47 = vcombine.low %v631_v35, %v635_v36 }
  0xaa   :  { %v515_v43 = vld [vmem:[#allocation7 + $0x160] sm:$0xff]  ;;  %3246 = vmatpush1.bf16.msra.mxu1 %v6610_v46 }
  0xab   :  { %v639_v44 = vld [vmem:[#allocation7 + $0x540] sm:$0xff]  ;;  %v6619_v48 = vcombine.high %v511_v42, %v515_v43  ;;  %3288 = vmatprep.subr.bf16.mxu0 %v6739_v41  ;;  %v6618_v55 = vcombine.low %v511_v42, %v515_v43 }
  0xac   :  { %v643_v45 = vld [vmem:[#allocation7 + $0x560] sm:$0xff]  ;;  %3289 = vmatpush1.bf16.msra.mxu0 %v6738_v47 }
  0xad   :  { %v6747_v50 = vcombine.high %v639_v44, %v643_v45  ;;  %v519_v51 = vld [vmem:[#allocation7 + $0x180] sm:$0xff]  ;;  %3247 = vmatprep.subr.bf16.mxu1 %v6619_v48  ;;  %v6746_v57 = vcombine.low %v639_v44, %v643_v45 }
  0xae   :  { %v523_v52 = vld [vmem:[#allocation7 + $0x1a0] sm:$0xff]  ;;  %3248 = vmatpush1.bf16.msra.mxu1 %v6618_v55 }
  0xaf   :  { %v647_v53 = vld [vmem:[#allocation7 + $0x580] sm:$0xff]  ;;  %v6627_v58 = vcombine.high %v519_v51, %v523_v52  ;;  %3290 = vmatprep.subr.bf16.mxu0 %v6747_v50  ;;  %v6626_v3 = vcombine.low %v519_v51, %v523_v52 }
  0xb0   :  { %v651_v54 = vld [vmem:[#allocation7 + $0x5a0] sm:$0xff]  ;;  %3291 = vmatpush1.bf16.msra.mxu0 %v6746_v57 }
  0xb1   :  { %v527_v56 = vld [vmem:[#allocation7 + $0x1c0] sm:$0xff]  ;;  %v6755_v62 = vcombine.high %v647_v53, %v651_v54  ;;  %v6754_v4 = vcombine.low %v647_v53, %v651_v54  ;;  %3249 = vmatprep.subr.bf16.mxu1 %v6627_v58 }
  0xb2   :  { %v531_v59 = vld [vmem:[#allocation7 + $0x1e0] sm:$0xff]  ;;  %3250 = vmatpush1.bf16.msra.mxu1 %v6626_v3 }
  0xb3   :  { %v139_v60 = vld [vmem:[%s8628_s8] sm:$0xff]   ;;  %v6635_v12 = vcombine.high %v527_v56, %v531_v59  ;;  %3292 = vmatprep.subr.bf16.mxu0 %v6755_v62  ;;  %v6634_v25 = vcombine.low %v527_v56, %v531_v59 }
  0xb4   :  { %v6564_v61 = vld [vmem:[%s8628_s8 + $0x1c] sm:$0xff]   ;;  %154 = vst [vmem:[#allocation20] sm:$0xff] %v139_v60   ;;  %v6566_v7 = vld [vmem:[%s8628_s8 + $0x24] sm:$0xff]   ;;  %3293 = vmatpush1.bf16.msra.mxu0 %v6754_v4 }
  0xb5   :  { %v283_v63 = vunpack.c.l.bf16 %v6564_v61  ;;  %v310_v0 = vunpack.c.h.bf16 %v6564_v61  ;;  %v655_v5 = vld [vmem:[#allocation7 + $0x5c0] sm:$0xff]  ;;  %v337_v10 = vunpack.c.l.bf16 %v6566_v7  ;;  %v364_v11 = vunpack.c.h.bf16 %v6566_v7  ;;  %3251 = vmatprep.subr.bf16.mxu1 %v6635_v12 }
  0xb6   :  { %v659_v6 = vld [vmem:[#allocation7 + $0x5e0] sm:$0xff]  ;;  %3252 = vmatpush1.bf16.msra.mxu1 %v6634_v25 }
  0xb7   :  { %v289_v8 = vsel %vm288_vm0, %v283_v63, %v8308_v1  ;;  %v316_v9 = vsel %vm288_vm0, %v310_v0, %v8308_v1  ;;  %v6763_v16 = vcombine.high %v655_v5, %v659_v6  ;;  %v535_v17 = vld [vmem:[#allocation7 + $0x200] sm:$0xff]  ;;  %v343_v19 = vsel %vm288_vm0, %v337_v10, %v8308_v1  ;;  %v6568_v10 = vld [vmem:[%s8628_s8 + $0x2c] sm:$0xff]  }
  0xb8   :  { %v296_v14 = vpack.c.bf16 %v8248_v13, %v289_v8  ;;  %v323_v15 = vpack.c.bf16 %v8248_v13, %v316_v9  ;;  %v539_v18 = vld [vmem:[#allocation7 + $0x220] sm:$0xff]  ;;  %v370_v20 = vsel %vm288_vm0, %v364_v11, %v8308_v1  ;;  %v350_v23 = vpack.c.bf16 %v8248_v13, %v343_v19  ;;  %v8463_v9 = vld [vmem:[%s8628_s8 + $0x10] sm:$0xff]  }
  0xb9   :  { %v663_v21 = vld [vmem:[#allocation7 + $0x600] sm:$0xff]  ;;  %v377_v24 = vpack.c.bf16 %v8248_v13, %v370_v20  ;;  %v6762_v26 = vcombine.low %v655_v5, %v659_v6  ;;  %v6643_v27 = vcombine.high %v535_v17, %v539_v18  ;;  %3294 = vmatprep.subr.bf16.mxu0 %v6763_v16  ;;  %v6642_v34 = vcombine.low %v535_v17, %v539_v18 }
  0xba   :  { %v667_v22 = vld [vmem:[#allocation7 + $0x620] sm:$0xff]  ;;  %298 = vst [vmem:[#allocation20 + $0x1c] sm:$0xf] %v296_v14  ;;  %325 = vst [vmem:[#allocation20 + $0x20] sm:$0xf] %v323_v15  ;;  %v391_v12 = vunpack.c.l.bf16 %v6568_v10  ;;  %v418_v14 = vunpack.c.h.bf16 %v6568_v10  ;;  %v488_v10 = vld [vmem:[#allocation7 + $0x88] sm:$0xff] }
  0xbb   :  { %352 = vst [vmem:[#allocation20 + $0x24] sm:$0xf] %v350_v23  ;;  %379 = vst [vmem:[#allocation20 + $0x28] sm:$0xf] %v377_v24  ;;  %v6771_v28 = vcombine.high %v663_v21, %v667_v22  ;;  %v543_v29 = vld [vmem:[#allocation7 + $0x240] sm:$0xff]  ;;  %3295 = vmatpush1.bf16.msra.mxu0 %v6762_v26  ;;  %3253 = vmatprep.subr.bf16.mxu1 %v6643_v27  ;;  %v6770_v35 = vcombine.low %v663_v21, %v667_v22  ;;  %v264_v22 = vand.u32 127, %v263_v31 }
  0xbc   :  { %v547_v30 = vld [vmem:[#allocation7 + $0x260] sm:$0xff]  ;;  %3254 = vmatpush1.bf16.msra.mxu1 %v6642_v34  ;;  %v397_v20 = vsel %vm288_vm0, %v391_v12, %v8308_v1  ;;  %v424_v21 = vsel %vm288_vm0, %v418_v14, %v8308_v1 }
  0xbd   :  { %v671_v32 = vld [vmem:[#allocation7 + $0x640] sm:$0xff]  ;;  %v6651_v36 = vcombine.high %v543_v29, %v547_v30  ;;  %3296 = vmatprep.subr.bf16.mxu0 %v6771_v28  ;;  %v6650_v44 = vcombine.low %v543_v29, %v547_v30  ;;  %v404_v25 = vpack.c.bf16 %v8248_v13, %v397_v20  ;;  %v431_v26 = vpack.c.bf16 %v8248_v13, %v424_v21 }
  0xbe   :  { %v675_v33 = vld [vmem:[#allocation7 + $0x660] sm:$0xff]  ;;  %v265_v34 = vadd.s32 768, %v264_v22 }
  0xbf   :  { %v551_v37 = vld [vmem:[#allocation7 + $0x280] sm:$0xff]  ;;  %v6779_v38 = vcombine.high %v671_v32, %v675_v33  ;;  %3297 = vmatpush1.bf16.msra.mxu0 %v6770_v35  ;;  %3255 = vmatprep.subr.bf16.mxu1 %v6651_v36  ;;  %v6778_v46 = vcombine.low %v671_v32, %v675_v33  ;;  %406 = vst [vmem:[#allocation20 + $0x2c] sm:$0xf] %v404_v25  ;;  %433 = vst [vmem:[#allocation20 + $0x30] sm:$0xf] %v431_v26  ;;  %v504_v26 = vld [vmem:[#allocation7 + $0x108] sm:$0xff] }
  0xc0   :  { %v555_v39 = vld [vmem:[#allocation7 + $0x2a0] sm:$0xff]  ;;  %3256 = vmatpush1.bf16.msra.mxu1 %v6650_v44  ;;  %v6563_v44 = vld [vmem:[%s8628_s8 + $0x18] ss:$28 sps:$4 sm:$0xff]   ;;  %vm266_vm1 = vcmp.lt.s32.totalorder %v265_v34, 784 }
  0xc1   :  { %v8450_v41 = vld [vmem:[#allocation20 + $0x4] ss:$28 sps:$4 sm:$0xff]   ;;  %v679_v42 = vld [vmem:[#allocation7 + $0x680] sm:$0xff]  ;;  %v6659_v47 = vcombine.high %v551_v37, %v555_v39  ;;  %3298 = vmatprep.subr.bf16.mxu0 %v6779_v38  ;;  %v6658_v55 = vcombine.low %v551_v37, %v555_v39 }
  0xc2   :  { %v683_v43 = vld [vmem:[#allocation7 + $0x6a0] sm:$0xff]  ;;  %3269 = vmatprep.mubr.bf16.mxu1 %v8450_v41  ;;  %v8453_v45 = vld [vmem:[#allocation20 + $0x24] sm:$0xff] }
  0xc3   :  { %v8457_v48 = vcombine.high %v8429_v2, %v8453_v45  ;;  %v6787_v50 = vcombine.high %v679_v42, %v683_v43  ;;  %v559_v51 = vld [vmem:[#allocation7 + $0x2c0] sm:$0xff]  ;;  %3299 = vmatpush1.bf16.msra.mxu0 %v6778_v46  ;;  %3257 = vmatprep.subr.bf16.mxu1 %v6659_v47  ;;  %v6786_v56 = vcombine.low %v679_v42, %v683_v43  ;;  %v472_v42 = vld [vmem:[#allocation7 + $0x8] sm:$0xff] }
  0xc4   :  { %v563_v52 = vld [vmem:[#allocation7 + $0x2e0] sm:$0xff]  ;;  %3258 = vmatpush1.bf16.msra.mxu1 %v6658_v55  ;;  %v476_v43 = vld [vmem:[#allocation7 + $0x28] sm:$0xff] }
  0xc5   :  { %v687_v53 = vld [vmem:[#allocation7 + $0x6c0] sm:$0xff]  ;;  %3312 = vmatprep.mubr.bf16.mxu0 %v8457_v48  ;;  %v6667_v57 = vcombine.high %v559_v51, %v563_v52  ;;  %3300 = vmatprep.subr.bf16.mxu0 %v6787_v50  ;;  %v6666_v63 = vcombine.low %v559_v51, %v563_v52  ;;  %v256_v50 = vunpack.c.l.bf16 %v6563_v44  ;;  %v445_v51 = vunpack.c.h.bf16 %v6563_v44  ;;  %v524_v44 = vld [vmem:[#allocation7 + $0x1a8] sm:$0xff] }
  0xc6   :  { %v691_v54 = vld [vmem:[#allocation7 + $0x6e0] sm:$0xff] }
  0xc7   :  { %v6795_v58 = vcombine.high %v687_v53, %v691_v54  ;;  %v567_v59 = vld [vmem:[#allocation7 + $0x300] sm:$0xff]  ;;  %3301 = vmatpush1.bf16.msra.mxu0 %v6786_v56  ;;  %3259 = vmatprep.subr.bf16.mxu1 %v6667_v57  ;;  %v6794_v0 = vcombine.low %v687_v53, %v691_v54  ;;  %v6581_v54 = vcombine.high %v472_v42, %v476_v43 }
  0xc8   :  { %v571_v60 = vld [vmem:[#allocation7 + $0x320] sm:$0xff]  ;;  %3260 = vmatpush1.bf16.msra.mxu1 %v6666_v63  ;;  %v267_v55 = vsel %vm266_vm1, %v256_v50, %v8308_v1 }
  0xc9   :  { %v695_v61 = vld [vmem:[#allocation7 + $0x700] sm:$0xff]  ;;  %v6675_v3 = vcombine.high %v567_v59, %v571_v60  ;;  %3302 = vmatprep.subr.bf16.mxu0 %v6795_v58  ;;  %v6674_v11 = vcombine.low %v567_v59, %v571_v60  ;;  %v480_v58 = vld [vmem:[#allocation7 + $0x48] sm:$0xff]  ;;  %v269_v60 = vpack.c.bf16 %v8248_v13, %v267_v55 }
  0xca   :  { %v699_v62 = vld [vmem:[#allocation7 + $0x720] sm:$0xff]  ;;  %v484_v59 = vld [vmem:[#allocation7 + $0x68] sm:$0xff] }
  0xcb   :  { %v575_v4 = vld [vmem:[#allocation7 + $0x340] sm:$0xff]  ;;  %v6803_v6 = vcombine.high %v695_v61, %v699_v62  ;;  %3303 = vmatpush1.bf16.msra.mxu0 %v6794_v0  ;;  %3261 = vmatprep.subr.bf16.mxu1 %v6675_v3  ;;  %v6802_v15 = vcombine.low %v695_v61, %v699_v62  ;;  %v451_v61 = vsel %vm288_vm0, %v445_v51, %v8308_v1  ;;  %v8486_v62 = vld [vmem:[#allocation20] ss:$28 sps:$4 sm:$0xff]  }
  0xcc   :  { %v579_v5 = vld [vmem:[#allocation7 + $0x360] sm:$0xff]  ;;  %3262 = vmatpush1.bf16.msra.mxu1 %v6674_v11  ;;  %v456_v3 = vsel %vm266_vm1, %v451_v61, %v8308_v1  ;;  %271 = vst [vmem:[#allocation20 + $0x18] sm:$0xf] %v269_v60  ;;  %v492_v11 = vld [vmem:[#allocation7 + $0xa8] sm:$0xff] }
  0xcd   :  { %v703_v7 = vld [vmem:[#allocation7 + $0x740] sm:$0xff]  ;;  %v6683_v16 = vcombine.high %v575_v4, %v579_v5  ;;  %3304 = vmatprep.subr.bf16.mxu0 %v6803_v6  ;;  %v6682_v27 = vcombine.low %v575_v4, %v579_v5  ;;  %v6580_v4 = vcombine.low %v472_v42, %v476_v43  ;;  %v8494_v5 = vcombine.low %v8429_v2, %v8453_v45  ;;  %v520_v42 = vld [vmem:[#allocation7 + $0x188] sm:$0xff] }
  0xce   :  { %v707_v8 = vld [vmem:[#allocation7 + $0x760] sm:$0xff]  ;;  %v458_v6 = vpack.c.bf16 %v8248_v13, %v456_v3  ;;  %v6588_v13 = vcombine.low %v480_v58, %v484_v59  ;;  %v6597_v14 = vcombine.high %v488_v10, %v492_v11  ;;  %v6596_v20 = vcombine.low %v488_v10, %v492_v11  ;;  %v532_v55 = vld [vmem:[#allocation7 + $0x1e8] sm:$0xff] }
  0xcf   :  { %v6811_v17 = vcombine.high %v703_v7, %v707_v8  ;;  %v583_v18 = vld [vmem:[#allocation7 + $0x380] sm:$0xff]  ;;  %3305 = vmatpush1.bf16.msra.mxu0 %v6802_v15  ;;  %3263 = vmatprep.subr.bf16.mxu1 %v6683_v16  ;;  %v6810_v28 = vcombine.low %v703_v7, %v707_v8  ;;  %v6589_v7 = vcombine.high %v480_v58, %v484_v59  ;;  %v496_v16 = vld [vmem:[#allocation7 + $0xc8] sm:$0xff] }
  0xd0   :  { %v587_v19 = vld [vmem:[#allocation7 + $0x3a0] sm:$0xff]  ;;  %3264 = vmatpush1.bf16.msra.mxu1 %v6682_v27  ;;  %460 = vst [vmem:[#allocation20 + $0x34] sm:$0xf] %v458_v6  ;;  %v508_v27 = vld [vmem:[#allocation7 + $0x128] sm:$0xff]  ;;  %v6629_v50 = vcombine.high %v520_v42, %v524_v44 }
  0xd1   :  { %v711_v23 = vld [vmem:[#allocation7 + $0x780] sm:$0xff]  ;;  %v6691_v29 = vcombine.high %v583_v18, %v587_v19  ;;  %3306 = vmatprep.subr.bf16.mxu0 %v6811_v17  ;;  %v6690_v36 = vcombine.low %v583_v18, %v587_v19  ;;  %v500_v17 = vld [vmem:[#allocation7 + $0xe8] sm:$0xff] }
  0xd2   :  { %v715_v24 = vld [vmem:[#allocation7 + $0x7a0] sm:$0xff]  ;;  %v6605_v22 = vcombine.high %v496_v16, %v500_v17  ;;  %v536_v61 = vld [vmem:[#allocation7 + $0x208] sm:$0xff] }
  0xd3   :  { %v6819_v30 = vcombine.high %v711_v23, %v715_v24  ;;  %v591_v32 = vld [vmem:[#allocation7 + $0x3c0] sm:$0xff]  ;;  %3307 = vmatpush1.bf16.msra.mxu0 %v6810_v28  ;;  %3265 = vmatprep.subr.bf16.mxu1 %v6691_v29  ;;  %v6818_v37 = vcombine.low %v711_v23, %v715_v24  ;;  %v6604_v28 = vcombine.low %v496_v16, %v500_v17  ;;  %v540_v3 = vld [vmem:[#allocation7 + $0x228] sm:$0xff] }
  0xd4   :  { %v595_v33 = vld [vmem:[#allocation7 + $0x3e0] sm:$0xff]  ;;  %3266 = vmatpush1.bf16.msra.mxu1 %v6690_v36  ;;  %v544_v10 = vld [vmem:[#allocation7 + $0x248] sm:$0xff] }
  0xd5   :  { %v719_v31 = vld [vmem:[#allocation7 + $0x7c0] sm:$0xff]  ;;  %v6699_v38 = vcombine.high %v591_v32, %v595_v33  ;;  %3308 = vmatprep.subr.bf16.mxu0 %v6819_v30  ;;  %v6698_v52 = vcombine.low %v591_v32, %v595_v33  ;;  %v6613_v30 = vcombine.high %v504_v26, %v508_v27  ;;  %v512_v33 = vld [vmem:[#allocation7 + $0x148] sm:$0xff] }
  0xd6   :  { %v723_v35 = vld [vmem:[#allocation7 + $0x7e0] sm:$0xff]  ;;  %v552_v16 = vld [vmem:[#allocation7 + $0x288] sm:$0xff] }
  0xd7   :  { %v6827_v39 = vcombine.high %v719_v31, %v723_v35  ;;  %v727_v46 = vld [vmem:[#allocation7 + $0x800] sm:$0xff]  ;;  %3309 = vmatpush1.bf16.msra.mxu0 %v6818_v37  ;;  %3267 = vmatprep.subr.bf16.mxu1 %v6699_v38  ;;  %v6826_v53 = vcombine.low %v719_v31, %v723_v35  ;;  %v516_v31 = vld [vmem:[#allocation7 + $0x168] sm:$0xff]  ;;  %v6612_v35 = vcombine.low %v504_v26, %v508_v27 }
  0xd8   :  { %v731_v47 = vld [vmem:[#allocation7 + $0x820] sm:$0xff]  ;;  %3268 = vmatpush1.bf16.msra.mxu1 %v6698_v52  ;;  %v6621_v37 = vcombine.high %v512_v33, %v516_v31  ;;  %v564_v26 = vld [vmem:[#allocation7 + $0x2e8] sm:$0xff] }
  0xd9   :  { %3310 = vmatprep.subr.bf16.mxu0 %v6827_v39  ;;  %v6835_v56 = vcombine.high %v727_v46, %v731_v47  ;;  %v735_v57 = vld [vmem:[#allocation7 + $0x840] sm:$0xff]  ;;  %v6834_v49 = vcombine.low %v727_v46, %v731_v47  ;;  %3409 = vmatprep.subr.bf16.mxu1 %v6581_v54  ;;  %v6620_v46 = vcombine.low %v512_v33, %v516_v31 }
  0xda   :  { %v739_v63 = vld [vmem:[#allocation7 + $0x860] sm:$0xff] }
  0xdb   :  { %v8488_v0 = vld [vmem:[#allocation20 + $0x2c] sm:$0xff]  ;;  %3311 = vmatpush1.bf16.msra.mxu0 %v6826_v53  ;;  %v6843_v8 = vcombine.high %v735_v57, %v739_v63  ;;  %3270 = vmatmul.mubr.bf16.vlgmr.msra.gmra.mrb[0].mxu1 %v8486_v62  ;;  %v6842_v12 = vcombine.low %v735_v57, %v739_v63  ;;  %v528_v53 = vld [vmem:[#allocation7 + $0x1c8] sm:$0xff] }
  0xdc   :  { %3323 = vmatprep.subr.bf16.mxu0 %v6835_v56  ;;  %v8499_v1 = vcombine.high %v8463_v9, %v8488_v0  ;;  %v743_v2 = vld [vmem:[#allocation7 + $0x880] sm:$0xff]  ;;  %3410 = vmatpush1.bf16.msra.mxu1 %v6580_v4  ;;  %v6628_v56 = vcombine.low %v520_v42, %v524_v44  ;;  %v6637_v58 = vcombine.high %v528_v53, %v532_v55 }
  0xdd   :  { %v747_v45 = vld [vmem:[#allocation7 + $0x8a0] sm:$0xff]  ;;  %3411 = vmatprep.subr.bf16.mxu1 %v6589_v7  ;;  %3441 = vmatprep.mubr.bf16.mxu1 %v8450_v41  ;;  %v6636_v4 = vcombine.low %v528_v53, %v532_v55 }
  0xde   :  { %3313 = vmatmul.mubr.bf16.vlgmr.msra.gmra.mrb[0].mxu0 %v8494_v5  ;;  %v6851_v15 = vcombine.high %v743_v2, %v747_v45  ;;  %v751_v18 = vld [vmem:[#allocation7 + $0x8c0] sm:$0xff]  ;;  %v6850_v21 = vcombine.low %v743_v2, %v747_v45  ;;  %v548_v2 = vld [vmem:[#allocation7 + $0x268] sm:$0xff]  ;;  %v6644_v45 = vcombine.low %v536_v61, %v540_v3 }
  0xdf   :  { %3324 = vmatpush1.bf16.msra.mxu0 %v6834_v49  ;;  %3355 = vmatprep.mubr.bf16.mxu0 %v8499_v1  ;;  %v755_v19 = vld [vmem:[#allocation7 + $0x8e0] sm:$0xff]  ;;  %v6645_v49 = vcombine.high %v536_v61, %v540_v3 }
  0xe0   :  { %3325 = vmatprep.subr.bf16.mxu0 %v6843_v8  ;;  %3412 = vmatpush1.bf16.msra.mxu1 %v6588_v13  ;;  %v759_v23 = vld [vmem:[#allocation7 + $0x900] sm:$0xff]  ;;  %v6859_v24 = vcombine.high %v751_v18, %v755_v19  ;;  %v6858_v29 = vcombine.low %v751_v18, %v755_v19  ;;  %v556_v18 = vld [vmem:[#allocation7 + $0x2a8] sm:$0xff]  ;;  %v6652_v19 = vcombine.low %v544_v10, %v548_v2 }
  0xe1   :  { %3413 = vmatprep.subr.bf16.mxu1 %v6597_v14  ;;  %v763_v25 = vld [vmem:[#allocation7 + $0x920] sm:$0xff]  ;;  %v6660_v27 = vcombine.low %v552_v16, %v556_v18 }
  0xe2   :  { %v767_v32 = vld [vmem:[#allocation7 + $0x940] sm:$0xff]  ;;  %v6867_v34 = vcombine.high %v759_v23, %v763_v25  ;;  %v6866_v36 = vcombine.low %v759_v23, %v763_v25 }
  0xe3   :  { %3326 = vmatpush1.bf16.msra.mxu0 %v6842_v12  ;;  %v771_v41 = vld [vmem:[#allocation7 + $0x960] sm:$0xff]  ;;  %v6653_v12 = vcombine.high %v544_v10, %v548_v2 }
  0xe4   :  { %3327 = vmatprep.subr.bf16.mxu0 %v6851_v15  ;;  %3414 = vmatpush1.bf16.msra.mxu1 %v6596_v20  ;;  %v775_v38 = vld [vmem:[#allocation7 + $0x980] sm:$0xff]  ;;  %v6875_v43 = vcombine.high %v767_v32, %v771_v41  ;;  %v6874_v47 = vcombine.low %v767_v32, %v771_v41  ;;  %v568_v41 = vld [vmem:[#allocation7 + $0x308] sm:$0xff] }
  0xe5   :  { %3415 = vmatprep.subr.bf16.mxu1 %v6605_v22  ;;  %v779_v39 = vld [vmem:[#allocation7 + $0x9a0] sm:$0xff] }
  0xe6   :  { %v783_v51 = vld [vmem:[#allocation7 + $0x9c0] sm:$0xff]  ;;  %v6883_v54 = vcombine.high %v775_v38, %v779_v39  ;;  %v6882_v57 = vcombine.low %v775_v38, %v779_v39  ;;  %v576_v39 = vld [vmem:[#allocation7 + $0x348] sm:$0xff] }
  0xe7   :  { %3328 = vmatpush1.bf16.msra.mxu0 %v6850_v21  ;;  %v787_v52 = vld [vmem:[#allocation7 + $0x9e0] sm:$0xff]  ;;  %v6661_v21 = vcombine.high %v552_v16, %v556_v18 }
  0xe8   :  { %3329 = vmatprep.subr.bf16.mxu0 %v6859_v24  ;;  %3416 = vmatpush1.bf16.msra.mxu1 %v6604_v28  ;;  %v791_v59 = vld [vmem:[#allocation7 + $0xa00] sm:$0xff]  ;;  %v6891_v63 = vcombine.high %v783_v51, %v787_v52  ;;  %v6890_v6 = vcombine.low %v783_v51, %v787_v52  ;;  %v560_v24 = vld [vmem:[#allocation7 + $0x2c8] sm:$0xff] }
  0xe9   :  { %3417 = vmatprep.subr.bf16.mxu1 %v6613_v30  ;;  %v795_v60 = vld [vmem:[#allocation7 + $0xa20] sm:$0xff]  ;;  %v6668_v31 = vcombine.low %v560_v24, %v564_v26  ;;  %v584_v52 = vld [vmem:[#allocation7 + $0x388] sm:$0xff] }
  0xea   :  { %v799_v7 = vld [vmem:[#allocation7 + $0xa40] sm:$0xff]  ;;  %v6899_v11 = vcombine.high %v791_v59, %v795_v60  ;;  %v6898_v13 = vcombine.low %v791_v59, %v795_v60  ;;  %v592_v60 = vld [vmem:[#allocation7 + $0x3c8] sm:$0xff] }
  0xeb   :  { %3330 = vmatpush1.bf16.msra.mxu0 %v6858_v29  ;;  %v803_v8 = vld [vmem:[#allocation7 + $0xa60] sm:$0xff]  ;;  %v6669_v29 = vcombine.high %v560_v24, %v564_v26  ;;  %v616_v24 = vld [vmem:[#allocation7 + $0x488] sm:$0xff] }
  0xec   :  { %3331 = vmatprep.subr.bf16.mxu0 %v6867_v34  ;;  %3418 = vmatpush1.bf16.msra.mxu1 %v6612_v35  ;;  %v807_v14 = vld [vmem:[#allocation7 + $0xa80] sm:$0xff]  ;;  %v6907_v17 = vcombine.high %v799_v7, %v803_v8  ;;  %v6906_v20 = vcombine.low %v799_v7, %v803_v8  ;;  %v572_v34 = vld [vmem:[#allocation7 + $0x328] sm:$0xff] }
  0xed   :  { %3419 = vmatprep.subr.bf16.mxu1 %v6621_v37  ;;  %v811_v15 = vld [vmem:[#allocation7 + $0xaa0] sm:$0xff]  ;;  %v6676_v44 = vcombine.low %v568_v41, %v572_v34  ;;  %v600_v8 = vld [vmem:[#allocation7 + $0x408] sm:$0xff] }
  0xee   :  { %v815_v22 = vld [vmem:[#allocation7 + $0xac0] sm:$0xff]  ;;  %v6915_v25 = vcombine.high %v807_v14, %v811_v15  ;;  %v6914_v28 = vcombine.low %v807_v14, %v811_v15  ;;  %v608_v15 = vld [vmem:[#allocation7 + $0x448] sm:$0xff] }
  0xef   :  { %3332 = vmatpush1.bf16.msra.mxu0 %v6866_v36  ;;  %v819_v23 = vld [vmem:[#allocation7 + $0xae0] sm:$0xff]  ;;  %v6677_v36 = vcombine.high %v568_v41, %v572_v34  ;;  %v620_v26 = vld [vmem:[#allocation7 + $0x4a8] sm:$0xff] }
  0xf0   :  { %3333 = vmatprep.subr.bf16.mxu0 %v6875_v43  ;;  %3420 = vmatpush1.bf16.msra.mxu1 %v6620_v46  ;;  %v823_v30 = vld [vmem:[#allocation7 + $0xb00] sm:$0xff]  ;;  %v6923_v33 = vcombine.high %v815_v22, %v819_v23  ;;  %v6922_v35 = vcombine.low %v815_v22, %v819_v23  ;;  %v580_v43 = vld [vmem:[#allocation7 + $0x368] sm:$0xff] }
  0xf1   :  { %3421 = vmatprep.subr.bf16.mxu1 %v6629_v50  ;;  %v827_v32 = vld [vmem:[#allocation7 + $0xb20] sm:$0xff]  ;;  %v6684_v55 = vcombine.low %v576_v39, %v580_v43  ;;  %v628_v41 = vld [vmem:[#allocation7 + $0x4e8] sm:$0xff] }
  0xf2   :  { %v831_v37 = vld [vmem:[#allocation7 + $0xb40] sm:$0xff]  ;;  %v6931_v42 = vcombine.high %v823_v30, %v827_v32  ;;  %v6930_v46 = vcombine.low %v823_v30, %v827_v32  ;;  %v624_v30 = vld [vmem:[#allocation7 + $0x4c8] sm:$0xff] }
  0xf3   :  { %3334 = vmatpush1.bf16.msra.mxu0 %v6874_v47  ;;  %v835_v38 = vld [vmem:[#allocation7 + $0xb60] sm:$0xff]  ;;  %v6685_v47 = vcombine.high %v576_v39, %v580_v43  ;;  %v636_v39 = vld [vmem:[#allocation7 + $0x528] sm:$0xff] }
  0xf4   :  { %3335 = vmatprep.subr.bf16.mxu0 %v6883_v54  ;;  %3422 = vmatpush1.bf16.msra.mxu1 %v6628_v56  ;;  %v839_v50 = vld [vmem:[#allocation7 + $0xb80] sm:$0xff]  ;;  %v6939_v53 = vcombine.high %v831_v37, %v835_v38  ;;  %v588_v54 = vld [vmem:[#allocation7 + $0x3a8] sm:$0xff]  ;;  %v6938_v56 = vcombine.low %v831_v37, %v835_v38 }
  0xf5   :  { %3423 = vmatprep.subr.bf16.mxu1 %v6637_v58  ;;  %v843_v51 = vld [vmem:[#allocation7 + $0xba0] sm:$0xff]  ;;  %v6692_v3 = vcombine.low %v584_v52, %v588_v54  ;;  %v632_v37 = vld [vmem:[#allocation7 + $0x508] sm:$0xff] }
  0xf6   :  { %v847_v58 = vld [vmem:[#allocation7 + $0xbc0] sm:$0xff]  ;;  %v6947_v61 = vcombine.high %v839_v50, %v843_v51 }
  0xf7   :  { %3336 = vmatpush1.bf16.msra.mxu0 %v6882_v57  ;;  %v6693_v57 = vcombine.high %v584_v52, %v588_v54  ;;  %v851_v59 = vld [vmem:[#allocation7 + $0xbe0] sm:$0xff]  ;;  %v644_v52 = vld [vmem:[#allocation7 + $0x568] sm:$0xff] }
  0xf8   :  { %3337 = vmatprep.subr.bf16.mxu0 %v6891_v63  ;;  %3424 = vmatpush1.bf16.msra.mxu1 %v6636_v4  ;;  %v596_v63 = vld [vmem:[#allocation7 + $0x3e8] sm:$0xff]  ;;  %v6946_v4 = vcombine.low %v839_v50, %v843_v51  ;;  %v859_v7 = vld [vmem:[#allocation7 + $0xc20] sm:$0xff]  ;;  %v6955_v10 = vcombine.high %v847_v58, %v851_v59 }
  0xf9   :  { %3425 = vmatprep.subr.bf16.mxu1 %v6645_v49  ;;  %v855_v49 = vld [vmem:[#allocation7 + $0xc00] sm:$0xff]  ;;  %v6700_v2 = vcombine.low %v592_v60, %v596_v63  ;;  %v640_v50 = vld [vmem:[#allocation7 + $0x548] sm:$0xff] }
  0xfa   :  { %v867_v14 = vld [vmem:[#allocation7 + $0xc60] sm:$0xff]  ;;  %v6963_v16 = vcombine.high %v855_v49, %v859_v7 }
  0xfb   :  { %3338 = vmatpush1.bf16.msra.mxu0 %v6890_v6  ;;  %v6701_v6 = vcombine.high %v592_v60, %v596_v63  ;;  %v871_v22 = vld [vmem:[#allocation7 + $0xc80] sm:$0xff]  ;;  %v652_v60 = vld [vmem:[#allocation7 + $0x5a8] sm:$0xff] }
  0xfc   :  { %3339 = vmatprep.subr.bf16.mxu0 %v6899_v11  ;;  %3426 = vmatpush1.bf16.msra.mxu1 %v6644_v45  ;;  %v604_v11 = vld [vmem:[#allocation7 + $0x428] sm:$0xff]  ;;  %v6954_v45 = vcombine.low %v847_v58, %v851_v59  ;;  %v875_v23 = vld [vmem:[#allocation7 + $0xca0] sm:$0xff] }
  0xfd   :  { %3427 = vmatprep.subr.bf16.mxu1 %v6653_v12  ;;  %v863_v12 = vld [vmem:[#allocation7 + $0xc40] sm:$0xff]  ;;  %v6708_v18 = vcombine.low %v600_v8, %v604_v11  ;;  %v6979_v32 = vcombine.high %v871_v22, %v875_v23  ;;  %v6978_v34 = vcombine.low %v871_v22, %v875_v23  ;;  %v648_v58 = vld [vmem:[#allocation7 + $0x588] sm:$0xff]  ;;  %v481_v22 = vld [vmem:[#allocation7 + $0x50] sm:$0xff] }
  0xfe   :  { %v485_v23 = vld [vmem:[#allocation7 + $0x70] sm:$0xff] }
  0xff   :  { %3340 = vmatpush1.bf16.msra.mxu0 %v6898_v13  ;;  %v6709_v13 = vcombine.high %v600_v8, %v604_v11  ;;  %v660_v8 = vld [vmem:[#allocation7 + $0x5e8] sm:$0xff] }
 0x100   :  { %3341 = vmatprep.subr.bf16.mxu0 %v6907_v17  ;;  %3428 = vmatpush1.bf16.msra.mxu1 %v6652_v19  ;;  %v612_v17 = vld [vmem:[#allocation7 + $0x468] sm:$0xff]  ;;  %v8507_v19 = vcombine.low %v8463_v9, %v8488_v0  ;;  %v6725_v9 = vcombine.high %v616_v24, %v620_v26  ;;  %v879_v0 = vld [vmem:[#allocation7 + $0xcc0] sm:$0xff] }
 0x101   :  { %3429 = vmatprep.subr.bf16.mxu1 %v6661_v21  ;;  %v6717_v21 = vcombine.high %v608_v15, %v612_v17 }
 0x103   :  { %3342 = vmatpush1.bf16.msra.mxu0 %v6906_v20  ;;  %v6962_v20 = vcombine.low %v855_v49, %v859_v7  ;;  %v656_v7 = vld [vmem:[#allocation7 + $0x5c8] sm:$0xff] }
 0x104   :  { %3343 = vmatprep.subr.bf16.mxu0 %v6915_v25  ;;  %3430 = vmatpush1.bf16.msra.mxu1 %v6660_v27  ;;  %v6971_v25 = vcombine.high %v863_v12, %v867_v14  ;;  %v6716_v27 = vcombine.low %v608_v15, %v612_v17  ;;  %v477_v15 = vld [vmem:[#allocation7 + $0x30] sm:$0xff]  ;;  %v672_v17 = vld [vmem:[#allocation7 + $0x648] sm:$0xff] }
 0x105   :  { %3431 = vmatprep.subr.bf16.mxu1 %v6669_v29  ;;  %v883_v29 = vld [vmem:[#allocation7 + $0xce0] sm:$0xff] }
 0x106   :  { %v6987_v38 = vcombine.high %v879_v0, %v883_v29  ;;  %v6986_v43 = vcombine.low %v879_v0, %v883_v29  ;;  %v684_v0 = vld [vmem:[#allocation7 + $0x6a8] sm:$0xff]  ;;  %v489_v29 = vld [vmem:[#allocation7 + $0x90] sm:$0xff] }
 0x107   :  { %3344 = vmatpush1.bf16.msra.mxu0 %v6914_v28  ;;  %v6970_v28 = vcombine.low %v863_v12, %v867_v14  ;;  %v473_v12 = vld [vmem:[#allocation7 + $0x10] sm:$0xff] }
 0x108   :  { %3345 = vmatprep.subr.bf16.mxu0 %v6923_v33  ;;  %3432 = vmatpush1.bf16.msra.mxu1 %v6668_v31  ;;  %v8249_v33 = vmov 0   ;;  %v6733_v31 = vcombine.high %v624_v30, %v628_v41 }
 0x109   :  { %3433 = vmatprep.subr.bf16.mxu1 %v6677_v36  ;;  %v891_v36 = vld [vmem:[#allocation7 + $0xd20] sm:$0xff] }
 0x10b   :  { %3346 = vmatpush1.bf16.msra.mxu0 %v6922_v35  ;;  %v887_v35 = vld [vmem:[#allocation7 + $0xd00] sm:$0xff] }
 0x10c   :  { %3347 = vmatprep.subr.bf16.mxu0 %v6931_v42  ;;  %3434 = vmatpush1.bf16.msra.mxu1 %v6676_v44  ;;  %v6732_v42 = vcombine.low %v624_v30, %v628_v41  ;;  %v6741_v44 = vcombine.high %v632_v37, %v636_v39  ;;  %v6995_v51 = vcombine.high %v887_v35, %v891_v36 }
 0x10d   :  { %3435 = vmatprep.subr.bf16.mxu1 %v6685_v47  ;;  %v899_v47 = vld [vmem:[#allocation7 + $0xd60] sm:$0xff]  ;;  %v6994_v54 = vcombine.low %v887_v35, %v891_v36  ;;  %v6591_v30 = vcombine.high %v481_v22, %v485_v23  ;;  %v692_v35 = vld [vmem:[#allocation7 + $0x6e8] sm:$0xff]  ;;  %v497_v36 = vld [vmem:[#allocation7 + $0xd0] sm:$0xff] }
 0x10f   :  { %3348 = vmatpush1.bf16.msra.mxu0 %v6930_v46  ;;  %v895_v46 = vld [vmem:[#allocation7 + $0xd40] sm:$0xff] }
 0x110   :  { %3349 = vmatprep.subr.bf16.mxu0 %v6939_v53  ;;  %3436 = vmatpush1.bf16.msra.mxu1 %v6684_v55  ;;  %v6740_v53 = vcombine.low %v632_v37, %v636_v39  ;;  %v6749_v55 = vcombine.high %v640_v50, %v644_v52  ;;  %v7003_v59 = vcombine.high %v895_v46, %v899_v47  ;;  %v8040_v39 = vld [vmem:[#allocation20 + $0x4] ss:$28 sps:$4 sm:$0xff]  }
 0x111   :  { %3437 = vmatprep.subr.bf16.mxu1 %v6693_v57  ;;  %v907_v57 = vld [vmem:[#allocation7 + $0xda0] sm:$0xff]  ;;  %v7002_v63 = vcombine.low %v895_v46, %v899_v47  ;;  %v696_v46 = vld [vmem:[#allocation7 + $0x708] sm:$0xff] }
 0x112   :  { %v700_v47 = vld [vmem:[#allocation7 + $0x728] sm:$0xff] }
 0x113   :  { %3350 = vmatpush1.bf16.msra.mxu0 %v6938_v56  ;;  %v903_v56 = vld [vmem:[#allocation7 + $0xd80] sm:$0xff] }
 0x114   :  { %3351 = vmatprep.subr.bf16.mxu0 %v6947_v61  ;;  %3438 = vmatpush1.bf16.msra.mxu1 %v6692_v3  ;;  %v6748_v61 = vcombine.low %v640_v50, %v644_v52  ;;  %v6757_v3 = vcombine.high %v648_v58, %v652_v60  ;;  %v7011_v49 = vcombine.high %v903_v56, %v907_v57  ;;  %v505_v50 = vld [vmem:[#allocation7 + $0x110] sm:$0xff] }
 0x115   :  { %3439 = vmatprep.subr.bf16.mxu1 %v6701_v6  ;;  %v915_v6 = vld [vmem:[#allocation7 + $0xde0] sm:$0xff]  ;;  %v7010_v11 = vcombine.low %v903_v56, %v907_v57  ;;  %v509_v52 = vld [vmem:[#allocation7 + $0x130] sm:$0xff]  ;;  %v704_v56 = vld [vmem:[#allocation7 + $0x748] sm:$0xff] }
 0x116   :  { %v708_v57 = vld [vmem:[#allocation7 + $0x768] sm:$0xff] }
 0x117   :  { %3352 = vmatpush1.bf16.msra.mxu0 %v6946_v4  ;;  %v911_v4 = vld [vmem:[#allocation7 + $0xdc0] sm:$0xff] }
 0x118   :  { %3353 = vmatprep.subr.bf16.mxu0 %v6955_v10  ;;  %3440 = vmatpush1.bf16.msra.mxu1 %v6700_v2  ;;  %v6756_v10 = vcombine.low %v648_v58, %v652_v60  ;;  %v6765_v2 = vcombine.high %v656_v7, %v660_v8  ;;  %v7019_v14 = vcombine.high %v911_v4, %v915_v6  ;;  %v513_v58 = vld [vmem:[#allocation7 + $0x150] sm:$0xff] }
 0x119   :  { %3452 = vmatprep.subr.bf16.mxu1 %v6709_v13  ;;  %v668_v13 = vld [vmem:[#allocation7 + $0x628] sm:$0xff]  ;;  %v517_v60 = vld [vmem:[#allocation7 + $0x170] sm:$0xff] }
 0x11b   :  { %3354 = vmatpush1.bf16.msra.mxu0 %v6954_v45  ;;  %3442 = vmatmul.mubr.bf16.vlgmr.msra.gmra.mrb[4].mxu1 %v8486_v62  ;;  %v6724_v62 = vcombine.low %v616_v24, %v620_v26  ;;  %v664_v45 = vld [vmem:[#allocation7 + $0x608] sm:$0xff] }
 0x11c   :  { %3366 = vmatprep.subr.bf16.mxu0 %v6963_v16  ;;  %3453 = vmatpush1.bf16.msra.mxu1 %v6708_v18  ;;  %v6764_v16 = vcombine.low %v656_v7, %v660_v8  ;;  %v7018_v18 = vcombine.low %v911_v4, %v915_v6  ;;  %v7535_v24 = vld [vmem:[#allocation20 + $0x18] ss:$28 sps:$4 sm:$0xff]   ;;  %v6772_v26 = vcombine.low %v664_v45, %v668_v13  ;;  %v525_v8 = vld [vmem:[#allocation7 + $0x1b0] sm:$0xff] }
 0x11d   :  { %3454 = vmatprep.subr.bf16.mxu1 %v6717_v21  ;;  %3484 = vmatprep.mubr.bf16.mxu1 %v8457_v48  ;;  %v676_v21 = vld [vmem:[#allocation7 + $0x668] sm:$0xff]  ;;  %v6623_v7 = vcombine.high %v513_v58, %v517_v60 }
 0x11e   :  { %3356 = vmatmul.mubr.bf16.vlgmr.msra.gmra.mrb[0].mxu0 %v8507_v19  ;;  %v6780_v41 = vcombine.low %v672_v17, %v676_v21  ;;  %v712_v4 = vld [vmem:[#allocation7 + $0x788] sm:$0xff] }
 0x11f   :  { %3367 = vmatpush1.bf16.msra.mxu0 %v6962_v20  ;;  %3398 = vmatprep.mubr.bf16.mxu0 %v8249_v33  ;;  %v6773_v20 = vcombine.high %v664_v45, %v668_v13  ;;  %v716_v6 = vld [vmem:[#allocation7 + $0x7a8] sm:$0xff] }
 0x120   :  { %3368 = vmatprep.subr.bf16.mxu0 %v6971_v25  ;;  %3455 = vmatpush1.bf16.msra.mxu1 %v6716_v27  ;;  %v6583_v25 = vcombine.high %v473_v12, %v477_v15  ;;  %v6582_v27 = vcombine.low %v473_v12, %v477_v15  ;;  %v720_v45 = vld [vmem:[#allocation7 + $0x7c8] sm:$0xff]  ;;  %v529_v12 = vld [vmem:[#allocation7 + $0x1d0] sm:$0xff] }
 0x121   :  { %3456 = vmatprep.subr.bf16.mxu1 %v6725_v9  ;;  %v680_v9 = vld [vmem:[#allocation7 + $0x688] sm:$0xff]  ;;  %v533_v15 = vld [vmem:[#allocation7 + $0x1f0] sm:$0xff] }
 0x122   :  { %v724_v13 = vld [vmem:[#allocation7 + $0x7e8] sm:$0xff] }
 0x123   :  { %3369 = vmatpush1.bf16.msra.mxu0 %v6970_v28  ;;  %v6781_v28 = vcombine.high %v672_v17, %v676_v21  ;;  %v732_v21 = vld [vmem:[#allocation7 + $0x828] sm:$0xff] }
 0x124   :  { %3370 = vmatprep.subr.bf16.mxu0 %v6979_v32  ;;  %3457 = vmatpush1.bf16.msra.mxu1 %v6724_v62  ;;  %v493_v32 = vld [vmem:[#allocation7 + $0xb0] sm:$0xff]  ;;  %v6590_v62 = vcombine.low %v481_v22, %v485_v23  ;;  %v6639_v23 = vcombine.high %v529_v12, %v533_v15 }
 0x125   :  { %3458 = vmatprep.subr.bf16.mxu1 %v6733_v31  ;;  %v688_v31 = vld [vmem:[#allocation7 + $0x6c8] sm:$0xff]  ;;  %v6599_v37 = vcombine.high %v489_v29, %v493_v32  ;;  %v537_v22 = vld [vmem:[#allocation7 + $0x210] sm:$0xff] }
 0x127   :  { %3371 = vmatpush1.bf16.msra.mxu0 %v6978_v34  ;;  %v6789_v34 = vcombine.high %v680_v9, %v684_v0 }
 0x128   :  { %3372 = vmatprep.subr.bf16.mxu0 %v6987_v38  ;;  %3459 = vmatpush1.bf16.msra.mxu1 %v6732_v42  ;;  %v501_v38 = vld [vmem:[#allocation7 + $0xf0] sm:$0xff]  ;;  %v6788_v42 = vcombine.low %v680_v9, %v684_v0  ;;  %v740_v9 = vld [vmem:[#allocation7 + $0x868] sm:$0xff] }
 0x129   :  { %3460 = vmatprep.subr.bf16.mxu1 %v6741_v44  ;;  %v6797_v44 = vcombine.high %v688_v31, %v692_v35  ;;  %v545_v0 = vld [vmem:[#allocation7 + $0x250] sm:$0xff] }
 0x12b   :  { %3373 = vmatpush1.bf16.msra.mxu0 %v6986_v43  ;;  %v6598_v43 = vcombine.low %v489_v29, %v493_v32 }
 0x12c   :  { %3374 = vmatprep.subr.bf16.mxu0 %v6995_v51  ;;  %3461 = vmatpush1.bf16.msra.mxu1 %v6740_v53  ;;  %v6607_v51 = vcombine.high %v497_v36, %v501_v38  ;;  %v6796_v53 = vcombine.low %v688_v31, %v692_v35  ;;  %v748_v31 = vld [vmem:[#allocation7 + $0x8a8] sm:$0xff]  ;;  %v553_v35 = vld [vmem:[#allocation7 + $0x290] sm:$0xff] }
 0x12d   :  { %3462 = vmatprep.subr.bf16.mxu1 %v6749_v55  ;;  %v6805_v55 = vcombine.high %v696_v46, %v700_v47 }
 0x12f   :  { %3375 = vmatpush1.bf16.msra.mxu0 %v6994_v54  ;;  %v6606_v54 = vcombine.low %v497_v36, %v501_v38 }
 0x130   :  { %3376 = vmatprep.subr.bf16.mxu0 %v7003_v59  ;;  %3463 = vmatpush1.bf16.msra.mxu1 %v6748_v61  ;;  %v6615_v59 = vcombine.high %v505_v50, %v509_v52  ;;  %v6804_v61 = vcombine.low %v696_v46, %v700_v47  ;;  %v561_v46 = vld [vmem:[#allocation7 + $0x2d0] sm:$0xff] }
 0x131   :  { %3464 = vmatprep.subr.bf16.mxu1 %v6757_v3  ;;  %v6813_v3 = vcombine.high %v704_v56, %v708_v57 }
 0x133   :  { %3377 = vmatpush1.bf16.msra.mxu0 %v7002_v63  ;;  %v6614_v63 = vcombine.low %v505_v50, %v509_v52  ;;  %v565_v50 = vld [vmem:[#allocation7 + $0x2f0] sm:$0xff] }
 0x134   :  { %3378 = vmatprep.subr.bf16.mxu0 %v7011_v49  ;;  %3465 = vmatpush1.bf16.msra.mxu1 %v6756_v10  ;;  %v521_v49 = vld [vmem:[#allocation7 + $0x190] sm:$0xff]  ;;  %v6812_v10 = vcombine.low %v704_v56, %v708_v57  ;;  %v6671_v57 = vcombine.high %v561_v46, %v565_v50 }
 0x135   :  { %3466 = vmatprep.subr.bf16.mxu1 %v6765_v2  ;;  %v6821_v2 = vcombine.high %v712_v4, %v716_v6  ;;  %v6630_v17 = vcombine.low %v521_v49, %v525_v8  ;;  %v569_v56 = vld [vmem:[#allocation7 + $0x310] sm:$0xff] }
 0x137   :  { %3379 = vmatpush1.bf16.msra.mxu0 %v7010_v11  ;;  %v6622_v11 = vcombine.low %v513_v58, %v517_v60  ;;  %v573_v58 = vld [vmem:[#allocation7 + $0x330] sm:$0xff]  ;;  %v6670_v60 = vcombine.low %v561_v46, %v565_v50 }
 0x138   :  { %3380 = vmatprep.subr.bf16.mxu0 %v7019_v14  ;;  %3467 = vmatpush1.bf16.msra.mxu1 %v6764_v16  ;;  %v6631_v14 = vcombine.high %v521_v49, %v525_v8  ;;  %v6820_v16 = vcombine.low %v712_v4, %v716_v6  ;;  %v577_v4 = vld [vmem:[#allocation7 + $0x350] sm:$0xff]  ;;  %v6679_v6 = vcombine.high %v569_v56, %v573_v58 }
 0x139   :  { %3468 = vmatprep.subr.bf16.mxu1 %v6773_v20  ;;  %v728_v20 = vld [vmem:[#allocation7 + $0x808] sm:$0xff]  ;;  %v581_v49 = vld [vmem:[#allocation7 + $0x370] sm:$0xff]  ;;  %v6678_v8 = vcombine.low %v569_v56, %v573_v58 }
 0x13a   :  { %v6836_v32 = vcombine.low %v728_v20, %v732_v21  ;;  %v621_v46 = vld [vmem:[#allocation7 + $0x4b0] sm:$0xff] }
 0x13b   :  { %3381 = vmatpush1.bf16.msra.mxu0 %v7018_v18  ;;  %v6829_v18 = vcombine.high %v720_v45, %v724_v13 }
 0x13c   :  { %3581 = vmatprep.subr.bf16.mxu0 %v6583_v25  ;;  %3469 = vmatpush1.bf16.msra.mxu1 %v6772_v26  ;;  %v6828_v25 = vcombine.low %v720_v45, %v724_v13  ;;  %v6638_v26 = vcombine.low %v529_v12, %v533_v15  ;;  %v585_v45 = vld [vmem:[#allocation7 + $0x390] sm:$0xff]  ;;  %v6687_v13 = vcombine.high %v577_v4, %v581_v49 }
 0x13d   :  { %3470 = vmatprep.subr.bf16.mxu1 %v6781_v28  ;;  %v736_v28 = vld [vmem:[#allocation7 + $0x848] sm:$0xff]  ;;  %v589_v12 = vld [vmem:[#allocation7 + $0x3b0] sm:$0xff]  ;;  %v6686_v15 = vcombine.low %v577_v4, %v581_v49 }
 0x13e   :  { %3399 = vmatmul.mubr.bf16.vlgmr.msra.gmra.mrb[0].mxu0 %v7535_v24  ;;  %v541_v24 = vld [vmem:[#allocation7 + $0x230] sm:$0xff]  ;;  %v6844_v38 = vcombine.low %v736_v28, %v740_v9 }
 0x13f   :  { %3582 = vmatpush1.bf16.msra.mxu0 %v6582_v27  ;;  %3613 = vmatprep.mubr.bf16.mxu0 %v8040_v39  ;;  %v6837_v27 = vcombine.high %v728_v20, %v732_v21  ;;  %v6647_v29 = vcombine.high %v537_v22, %v541_v24  ;;  %v593_v20 = vld [vmem:[#allocation7 + $0x3d0] sm:$0xff]  ;;  %v6695_v21 = vcombine.high %v585_v45, %v589_v12 }
 0x140   :  { %3583 = vmatprep.subr.bf16.mxu0 %v6591_v30  ;;  %3471 = vmatpush1.bf16.msra.mxu1 %v6780_v41  ;;  %v549_v30 = vld [vmem:[#allocation7 + $0x270] sm:$0xff]  ;;  %v6646_v41 = vcombine.low %v537_v22, %v541_v24  ;;  %v6694_v24 = vcombine.low %v585_v45, %v589_v12 }
 0x141   :  { %3472 = vmatprep.subr.bf16.mxu1 %v6789_v34  ;;  %v744_v34 = vld [vmem:[#allocation7 + $0x888] sm:$0xff]  ;;  %v6655_v36 = vcombine.high %v545_v0, %v549_v30  ;;  %v6654_v39 = vcombine.low %v545_v0, %v549_v30  ;;  %v597_v22 = vld [vmem:[#allocation7 + $0x3f0] sm:$0xff] }
 0x142   :  { %v605_v0 = vld [vmem:[#allocation7 + $0x430] sm:$0xff]  ;;  %v6702_v30 = vcombine.low %v593_v20, %v597_v22 }
 0x143   :  { %3584 = vmatpush1.bf16.msra.mxu0 %v6590_v62  ;;  %v6845_v62 = vcombine.high %v736_v28, %v740_v9  ;;  %v601_v28 = vld [vmem:[#allocation7 + $0x410] sm:$0xff]  ;;  %v6703_v9 = vcombine.high %v593_v20, %v597_v22 }
 0x144   :  { %3585 = vmatprep.subr.bf16.mxu0 %v6599_v37  ;;  %3473 = vmatpush1.bf16.msra.mxu1 %v6788_v42  ;;  %v557_v37 = vld [vmem:[#allocation7 + $0x2b0] sm:$0xff]  ;;  %v6853_v42 = vcombine.high %v744_v34, %v748_v31 }
 0x145   :  { %3474 = vmatprep.subr.bf16.mxu1 %v6797_v44  ;;  %v756_v44 = vld [vmem:[#allocation7 + $0x8e8] sm:$0xff]  ;;  %v6663_v47 = vcombine.high %v553_v35, %v557_v37  ;;  %v6662_v52 = vcombine.low %v553_v35, %v557_v37  ;;  %v613_v35 = vld [vmem:[#allocation7 + $0x470] sm:$0xff]  ;;  %v6710_v37 = vcombine.low %v601_v28, %v605_v0 }
 0x147   :  { %3586 = vmatpush1.bf16.msra.mxu0 %v6598_v43  ;;  %v752_v43 = vld [vmem:[#allocation7 + $0x8c8] sm:$0xff] }
 0x148   :  { %3587 = vmatprep.subr.bf16.mxu0 %v6607_v51  ;;  %3475 = vmatpush1.bf16.msra.mxu1 %v6796_v53  ;;  %v6852_v51 = vcombine.low %v744_v34, %v748_v31  ;;  %v6861_v53 = vcombine.high %v752_v43, %v756_v44  ;;  %v609_v34 = vld [vmem:[#allocation7 + $0x450] sm:$0xff]  ;;  %v6711_v31 = vcombine.high %v601_v28, %v605_v0 }
 0x149   :  { %3476 = vmatprep.subr.bf16.mxu1 %v6805_v55  ;;  %v764_v55 = vld [vmem:[#allocation7 + $0x928] sm:$0xff] }
 0x14b   :  { %3588 = vmatpush1.bf16.msra.mxu0 %v6606_v54  ;;  %v760_v54 = vld [vmem:[#allocation7 + $0x908] sm:$0xff] }
 0x14c   :  { %3589 = vmatprep.subr.bf16.mxu0 %v6615_v59  ;;  %3477 = vmatpush1.bf16.msra.mxu1 %v6804_v61  ;;  %v6860_v59 = vcombine.low %v752_v43, %v756_v44  ;;  %v6869_v61 = vcombine.high %v760_v54, %v764_v55  ;;  %v617_v43 = vld [vmem:[#allocation7 + $0x490] sm:$0xff]  ;;  %v6719_v44 = vcombine.high %v609_v34, %v613_v35 }
 0x14d   :  { %3478 = vmatprep.subr.bf16.mxu1 %v6813_v3  ;;  %v772_v3 = vld [vmem:[#allocation7 + $0x968] sm:$0xff]  ;;  %v6727_v56 = vcombine.high %v617_v43, %v621_v46 }
 0x14f   :  { %3590 = vmatpush1.bf16.msra.mxu0 %v6614_v63  ;;  %v768_v63 = vld [vmem:[#allocation7 + $0x948] sm:$0xff] }
 0x150   :  { %3591 = vmatprep.subr.bf16.mxu0 %v6623_v7  ;;  %3479 = vmatpush1.bf16.msra.mxu1 %v6812_v10  ;;  %v6868_v7 = vcombine.low %v760_v54, %v764_v55  ;;  %v6877_v10 = vcombine.high %v768_v63, %v772_v3  ;;  %v820_v54 = vld [vmem:[#allocation7 + $0xae8] sm:$0xff]  ;;  %v625_v55 = vld [vmem:[#allocation7 + $0x4d0] sm:$0xff] }
 0x151   :  { %3480 = vmatprep.subr.bf16.mxu1 %v6821_v2  ;;  %v780_v2 = vld [vmem:[#allocation7 + $0x9a8] sm:$0xff] }
 0x153   :  { %3592 = vmatpush1.bf16.msra.mxu0 %v6622_v11  ;;  %v776_v11 = vld [vmem:[#allocation7 + $0x988] sm:$0xff] }
 0x154   :  { %3593 = vmatprep.subr.bf16.mxu0 %v6631_v14  ;;  %3481 = vmatpush1.bf16.msra.mxu1 %v6820_v16  ;;  %v6876_v14 = vcombine.low %v768_v63, %v772_v3  ;;  %v6885_v16 = vcombine.high %v776_v11, %v780_v2  ;;  %v828_v63 = vld [vmem:[#allocation7 + $0xb28] sm:$0xff]  ;;  %v633_v3 = vld [vmem:[#allocation7 + $0x510] sm:$0xff] }
 0x155   :  { %3482 = vmatprep.subr.bf16.mxu1 %v6829_v18  ;;  %v788_v18 = vld [vmem:[#allocation7 + $0x9e8] sm:$0xff] }
 0x157   :  { %3594 = vmatpush1.bf16.msra.mxu0 %v6630_v17  ;;  %v784_v17 = vld [vmem:[#allocation7 + $0x9c8] sm:$0xff] }
 0x158   :  { %3595 = vmatprep.subr.bf16.mxu0 %v6639_v23  ;;  %3483 = vmatpush1.bf16.msra.mxu1 %v6828_v25  ;;  %v6884_v23 = vcombine.low %v776_v11, %v780_v2  ;;  %v6893_v25 = vcombine.high %v784_v17, %v788_v18  ;;  %v836_v11 = vld [vmem:[#allocation7 + $0xb68] sm:$0xff]  ;;  %v641_v2 = vld [vmem:[#allocation7 + $0x550] sm:$0xff] }
 0x159   :  { %3495 = vmatprep.subr.bf16.mxu1 %v6837_v27  ;;  %v796_v27 = vld [vmem:[#allocation7 + $0xa28] sm:$0xff] }
 0x15b   :  { %3596 = vmatpush1.bf16.msra.mxu0 %v6638_v26  ;;  %3485 = vmatmul.mubr.bf16.vlgmr.msra.gmra.mrb[4].mxu1 %v8494_v5  ;;  %v792_v26 = vld [vmem:[#allocation7 + $0xa08] sm:$0xff] }
 0x15c   :  { %3597 = vmatprep.subr.bf16.mxu0 %v6647_v29  ;;  %3496 = vmatpush1.bf16.msra.mxu1 %v6836_v32  ;;  %v6892_v29 = vcombine.low %v784_v17, %v788_v18  ;;  %v6901_v32 = vcombine.high %v792_v26, %v796_v27  ;;  %v844_v17 = vld [vmem:[#allocation7 + $0xba8] sm:$0xff]  ;;  %v649_v18 = vld [vmem:[#allocation7 + $0x590] sm:$0xff] }
 0x15d   :  { %3527 = vmatprep.mubr.bf16.mxu1 %v8499_v1  ;;  %3497 = vmatprep.subr.bf16.mxu1 %v6845_v62  ;;  %v804_v62 = vld [vmem:[#allocation7 + $0xa68] sm:$0xff] }
 0x15f   :  { %3598 = vmatpush1.bf16.msra.mxu0 %v6646_v41  ;;  %v800_v41 = vld [vmem:[#allocation7 + $0xa48] sm:$0xff] }
 0x160   :  { %3599 = vmatprep.subr.bf16.mxu0 %v6655_v36  ;;  %3498 = vmatpush1.bf16.msra.mxu1 %v6844_v38  ;;  %v6900_v36 = vcombine.low %v792_v26, %v796_v27  ;;  %v6909_v38 = vcombine.high %v800_v41, %v804_v62  ;;  %v6908_v50 = vcombine.low %v800_v41, %v804_v62  ;;  %v852_v26 = vld [vmem:[#allocation7 + $0xbe8] sm:$0xff]  ;;  %v657_v27 = vld [vmem:[#allocation7 + $0x5d0] sm:$0xff] }
 0x161   :  { %3499 = vmatprep.subr.bf16.mxu1 %v6853_v42  ;;  %v812_v42 = vld [vmem:[#allocation7 + $0xaa8] sm:$0xff] }
 0x162   :  { %v860_v62 = vld [vmem:[#allocation7 + $0xc28] sm:$0xff] }
 0x163   :  { %3600 = vmatpush1.bf16.msra.mxu0 %v6654_v39  ;;  %v808_v39 = vld [vmem:[#allocation7 + $0xa88] sm:$0xff] }
 0x164   :  { %3601 = vmatprep.subr.bf16.mxu0 %v6663_v47  ;;  %3500 = vmatpush1.bf16.msra.mxu1 %v6852_v51  ;;  %v8515_v47 = vld [vmem:[#allocation20] ss:$28 sps:$4 sm:$0xff]   ;;  %v6718_v51 = vcombine.low %v609_v34, %v613_v35  ;;  %v6916_v58 = vcombine.low %v808_v39, %v812_v42 }
 0x165   :  { %3501 = vmatprep.subr.bf16.mxu1 %v6861_v53  ;;  %v816_v53 = vld [vmem:[#allocation7 + $0xac8] sm:$0xff]  ;;  %v665_v34 = vld [vmem:[#allocation7 + $0x610] sm:$0xff] }
 0x166   :  { %v6924_v49 = vcombine.low %v816_v53, %v820_v54 }
 0x167   :  { %3602 = vmatpush1.bf16.msra.mxu0 %v6662_v52  ;;  %v6917_v52 = vcombine.high %v808_v39, %v812_v42  ;;  %v864_v39 = vld [vmem:[#allocation7 + $0xc48] sm:$0xff] }
 0x168   :  { %3603 = vmatprep.subr.bf16.mxu0 %v6671_v57  ;;  %3502 = vmatpush1.bf16.msra.mxu1 %v6860_v59  ;;  %v629_v57 = vld [vmem:[#allocation7 + $0x4f0] sm:$0xff]  ;;  %v6726_v59 = vcombine.low %v617_v43, %v621_v46  ;;  %v868_v42 = vld [vmem:[#allocation7 + $0xc68] sm:$0xff] }
 0x169   :  { %3503 = vmatprep.subr.bf16.mxu1 %v6869_v61  ;;  %v824_v61 = vld [vmem:[#allocation7 + $0xb08] sm:$0xff]  ;;  %v6735_v4 = vcombine.high %v625_v55, %v629_v57  ;;  %v673_v43 = vld [vmem:[#allocation7 + $0x650] sm:$0xff] }
 0x16a   :  { %v6932_v12 = vcombine.low %v824_v61, %v828_v63 }
 0x16b   :  { %3604 = vmatpush1.bf16.msra.mxu0 %v6670_v60  ;;  %v6925_v60 = vcombine.high %v816_v53, %v820_v54  ;;  %v872_v53 = vld [vmem:[#allocation7 + $0xc88] sm:$0xff] }
 0x16c   :  { %3605 = vmatprep.subr.bf16.mxu0 %v6679_v6  ;;  %3504 = vmatpush1.bf16.msra.mxu1 %v6868_v7  ;;  %v637_v6 = vld [vmem:[#allocation7 + $0x530] sm:$0xff]  ;;  %v6734_v7 = vcombine.low %v625_v55, %v629_v57  ;;  %v876_v54 = vld [vmem:[#allocation7 + $0xca8] sm:$0xff]  ;;  %v6972_v57 = vcombine.low %v864_v39, %v868_v42 }
 0x16d   :  { %3505 = vmatprep.subr.bf16.mxu1 %v6877_v10  ;;  %v832_v10 = vld [vmem:[#allocation7 + $0xb48] sm:$0xff]  ;;  %v6743_v45 = vcombine.high %v633_v3, %v637_v6  ;;  %v681_v55 = vld [vmem:[#allocation7 + $0x690] sm:$0xff] }
 0x16e   :  { %v6940_v22 = vcombine.low %v832_v10, %v836_v11 }
 0x16f   :  { %3606 = vmatpush1.bf16.msra.mxu0 %v6678_v8  ;;  %v6933_v8 = vcombine.high %v824_v61, %v828_v63  ;;  %v880_v61 = vld [vmem:[#allocation7 + $0xcc8] sm:$0xff] }
 0x170   :  { %3607 = vmatprep.subr.bf16.mxu0 %v6687_v13  ;;  %3506 = vmatpush1.bf16.msra.mxu1 %v6876_v14  ;;  %v645_v13 = vld [vmem:[#allocation7 + $0x570] sm:$0xff]  ;;  %v6742_v14 = vcombine.low %v633_v3, %v637_v6  ;;  %v884_v63 = vld [vmem:[#allocation7 + $0xce8] sm:$0xff]  ;;  %v6980_v6 = vcombine.low %v872_v53, %v876_v54 }
 0x171   :  { %3507 = vmatprep.subr.bf16.mxu1 %v6885_v16  ;;  %v840_v16 = vld [vmem:[#allocation7 + $0xb88] sm:$0xff]  ;;  %v6751_v20 = vcombine.high %v641_v2, %v645_v13  ;;  %v689_v3 = vld [vmem:[#allocation7 + $0x6d0] sm:$0xff] }
 0x172   :  { %v6948_v0 = vcombine.low %v840_v16, %v844_v17 }
 0x173   :  { %3608 = vmatpush1.bf16.msra.mxu0 %v6686_v15  ;;  %v6941_v15 = vcombine.high %v832_v10, %v836_v11  ;;  %v888_v10 = vld [vmem:[#allocation7 + $0xd08] sm:$0xff] }
 0x174   :  { %3609 = vmatprep.subr.bf16.mxu0 %v6695_v21  ;;  %3508 = vmatpush1.bf16.msra.mxu1 %v6884_v23  ;;  %v653_v21 = vld [vmem:[#allocation7 + $0x5b0] sm:$0xff]  ;;  %v6750_v23 = vcombine.low %v641_v2, %v645_v13  ;;  %v892_v11 = vld [vmem:[#allocation7 + $0xd28] sm:$0xff]  ;;  %v6988_v13 = vcombine.low %v880_v61, %v884_v63 }
 0x175   :  { %3509 = vmatprep.subr.bf16.mxu1 %v6893_v25  ;;  %v848_v25 = vld [vmem:[#allocation7 + $0xbc8] sm:$0xff]  ;;  %v6759_v28 = vcombine.high %v649_v18, %v653_v21  ;;  %v697_v2 = vld [vmem:[#allocation7 + $0x710] sm:$0xff] }
 0x176   :  { %v6956_v35 = vcombine.low %v848_v25, %v852_v26 }
 0x177   :  { %3610 = vmatpush1.bf16.msra.mxu0 %v6694_v24  ;;  %v6949_v24 = vcombine.high %v840_v16, %v844_v17  ;;  %v896_v16 = vld [vmem:[#allocation7 + $0xd48] sm:$0xff] }
 0x178   :  { %3611 = vmatprep.subr.bf16.mxu0 %v6703_v9  ;;  %3510 = vmatpush1.bf16.msra.mxu1 %v6892_v29  ;;  %v661_v9 = vld [vmem:[#allocation7 + $0x5f0] sm:$0xff]  ;;  %v6758_v29 = vcombine.low %v649_v18, %v653_v21  ;;  %v900_v17 = vld [vmem:[#allocation7 + $0xd68] sm:$0xff]  ;;  %v6996_v21 = vcombine.low %v888_v10, %v892_v11 }
 0x179   :  { %3511 = vmatprep.subr.bf16.mxu1 %v6901_v32  ;;  %v856_v32 = vld [vmem:[#allocation7 + $0xc08] sm:$0xff]  ;;  %v6767_v41 = vcombine.high %v657_v27, %v661_v9  ;;  %v705_v18 = vld [vmem:[#allocation7 + $0x750] sm:$0xff] }
 0x17a   :  { %v6964_v46 = vcombine.low %v856_v32, %v860_v62 }
 0x17b   :  { %3612 = vmatpush1.bf16.msra.mxu0 %v6702_v30  ;;  %v6957_v30 = vcombine.high %v848_v25, %v852_v26  ;;  %v904_v25 = vld [vmem:[#allocation7 + $0xd88] sm:$0xff] }
 0x17c   :  { %3624 = vmatprep.subr.bf16.mxu0 %v6711_v31  ;;  %3512 = vmatpush1.bf16.msra.mxu1 %v6900_v36  ;;  %v669_v31 = vld [vmem:[#allocation7 + $0x630] sm:$0xff]  ;;  %v6766_v36 = vcombine.low %v657_v27, %v661_v9  ;;  %v908_v26 = vld [vmem:[#allocation7 + $0xda8] sm:$0xff]  ;;  %v7004_v9 = vcombine.low %v896_v16, %v900_v17 }
 0x17d   :  { %3513 = vmatprep.subr.bf16.mxu1 %v6909_v38  ;;  %v6775_v38 = vcombine.high %v665_v34, %v669_v31  ;;  %v713_v27 = vld [vmem:[#allocation7 + $0x790] sm:$0xff] }
 0x17e   :  { %3614 = vmatmul.mubr.bf16.vlgmr.msra.gmra.mrb[4].mxu0 %v8515_v47 }
 0x17f   :  { %3625 = vmatpush1.bf16.msra.mxu0 %v6710_v37  ;;  %3656 = vmatprep.mubr.bf16.mxu0 %v8457_v48  ;;  %v6965_v37 = vcombine.high %v856_v32, %v860_v62  ;;  %v916_v62 = vld [vmem:[#allocation7 + $0xde8] sm:$0xff] }
 0x180   :  { %3626 = vmatprep.subr.bf16.mxu0 %v6719_v44  ;;  %3514 = vmatpush1.bf16.msra.mxu1 %v6908_v50  ;;  %v677_v44 = vld [vmem:[#allocation7 + $0x670] sm:$0xff]  ;;  %v6774_v50 = vcombine.low %v665_v34, %v669_v31 }
 0x181   :  { %3515 = vmatprep.subr.bf16.mxu1 %v6917_v52  ;;  %v6783_v52 = vcombine.high %v673_v43, %v677_v44  ;;  %v721_v31 = vld [vmem:[#allocation7 + $0x7d0] sm:$0xff] }
 0x183   :  { %3627 = vmatpush1.bf16.msra.mxu0 %v6718_v51  ;;  %v6973_v51 = vcombine.high %v864_v39, %v868_v42 }
 0x184   :  { %3628 = vmatprep.subr.bf16.mxu0 %v6727_v56  ;;  %3516 = vmatpush1.bf16.msra.mxu1 %v6916_v58  ;;  %v685_v56 = vld [vmem:[#allocation7 + $0x6b0] sm:$0xff]  ;;  %v6782_v58 = vcombine.low %v673_v43, %v677_v44  ;;  %v474_v44 = vld [vmem:[#allocation7 + $0x18] sm:$0xff] }
 0x185   :  { %3517 = vmatprep.subr.bf16.mxu1 %v6925_v60  ;;  %v6791_v60 = vcombine.high %v681_v55, %v685_v56 }
 0x187   :  { %3629 = vmatpush1.bf16.msra.mxu0 %v6726_v59  ;;  %v6981_v59 = vcombine.high %v872_v53, %v876_v54 }
 0x188   :  { %3630 = vmatprep.subr.bf16.mxu0 %v6735_v4  ;;  %3518 = vmatpush1.bf16.msra.mxu1 %v6924_v49  ;;  %v693_v4 = vld [vmem:[#allocation7 + $0x6f0] sm:$0xff]  ;;  %v6790_v49 = vcombine.low %v681_v55, %v685_v56  ;;  %v482_v56 = vld [vmem:[#allocation7 + $0x58] sm:$0xff] }
 0x189   :  { %3519 = vmatprep.subr.bf16.mxu1 %v6933_v8  ;;  %v6799_v8 = vcombine.high %v689_v3, %v693_v4 }
 0x18b   :  { %3631 = vmatpush1.bf16.msra.mxu0 %v6734_v7  ;;  %v6989_v7 = vcombine.high %v880_v61, %v884_v63 }
 0x18c   :  { %3632 = vmatprep.subr.bf16.mxu0 %v6743_v45  ;;  %3520 = vmatpush1.bf16.msra.mxu1 %v6932_v12  ;;  %v701_v45 = vld [vmem:[#allocation7 + $0x730] sm:$0xff]  ;;  %v6798_v12 = vcombine.low %v689_v3, %v693_v4  ;;  %v490_v4 = vld [vmem:[#allocation7 + $0x98] sm:$0xff] }
 0x18d   :  { %3521 = vmatprep.subr.bf16.mxu1 %v6941_v15  ;;  %v6807_v15 = vcombine.high %v697_v2, %v701_v45 }
 0x18f   :  { %3633 = vmatpush1.bf16.msra.mxu0 %v6742_v14  ;;  %v6997_v14 = vcombine.high %v888_v10, %v892_v11 }
 0x190   :  { %3634 = vmatprep.subr.bf16.mxu0 %v6751_v20  ;;  %3522 = vmatpush1.bf16.msra.mxu1 %v6940_v22  ;;  %v709_v20 = vld [vmem:[#allocation7 + $0x770] sm:$0xff]  ;;  %v6806_v22 = vcombine.low %v697_v2, %v701_v45 }
 0x191   :  { %3523 = vmatprep.subr.bf16.mxu1 %v6949_v24  ;;  %v6815_v24 = vcombine.high %v705_v18, %v709_v20 }
 0x193   :  { %3635 = vmatpush1.bf16.msra.mxu0 %v6750_v23  ;;  %v7005_v23 = vcombine.high %v896_v16, %v900_v17  ;;  %v8043_v16 = vld [vmem:[#allocation20 + $0x4] ss:$28 sps:$4 sm:$0xff]  }
 0x194   :  { %3636 = vmatprep.subr.bf16.mxu0 %v6759_v28  ;;  %3524 = vmatpush1.bf16.msra.mxu1 %v6948_v0  ;;  %v717_v28 = vld [vmem:[#allocation7 + $0x7b0] sm:$0xff]  ;;  %v6814_v0 = vcombine.low %v705_v18, %v709_v20 }
 0x195   :  { %3525 = vmatprep.subr.bf16.mxu1 %v6957_v30  ;;  %v6823_v32 = vcombine.high %v713_v27, %v717_v28  ;;  %v6822_v39 = vcombine.low %v713_v27, %v717_v28 }
 0x197   :  { %3637 = vmatpush1.bf16.msra.mxu0 %v6758_v29  ;;  %v7013_v29 = vcombine.high %v904_v25, %v908_v26 }
 0x198   :  { %3638 = vmatprep.subr.bf16.mxu0 %v6767_v41  ;;  %3526 = vmatpush1.bf16.msra.mxu1 %v6956_v35  ;;  %v912_v41 = vld [vmem:[#allocation7 + $0xdc8] sm:$0xff]  ;;  %v725_v35 = vld [vmem:[#allocation7 + $0x7f0] sm:$0xff] }
 0x199   :  { %3538 = vmatprep.subr.bf16.mxu1 %v6965_v37  ;;  %v7012_v37 = vcombine.low %v904_v25, %v908_v26  ;;  %v7021_v42 = vcombine.high %v912_v41, %v916_v62  ;;  %v6831_v43 = vcombine.high %v721_v31, %v725_v35  ;;  %v6830_v53 = vcombine.low %v721_v31, %v725_v35  ;;  %v765_v25 = vld [vmem:[#allocation7 + $0x930] sm:$0xff] }
 0x19b   :  { %3639 = vmatpush1.bf16.msra.mxu0 %v6766_v36  ;;  %3528 = vmatmul.mubr.bf16.vlgmr.msra.gmra.mrb[4].mxu1 %v8507_v19 }
 0x19c   :  { %3640 = vmatprep.subr.bf16.mxu0 %v6775_v38  ;;  %3539 = vmatpush1.bf16.msra.mxu1 %v6964_v46  ;;  %v478_v46 = vld [vmem:[#allocation7 + $0x38] sm:$0xff] }
 0x19d   :  { %3570 = vmatprep.mubr.bf16.mxu1 %v8249_v33  ;;  %3540 = vmatprep.subr.bf16.mxu1 %v6973_v51  ;;  %v733_v51 = vld [vmem:[#allocation7 + $0x830] sm:$0xff]  ;;  %v6585_v54 = vcombine.high %v474_v44, %v478_v46 }
 0x19f   :  { %3641 = vmatpush1.bf16.msra.mxu0 %v6774_v50  ;;  %v729_v50 = vld [vmem:[#allocation7 + $0x810] sm:$0xff] }
 0x1a0   :  { %3642 = vmatprep.subr.bf16.mxu0 %v6783_v52  ;;  %3541 = vmatpush1.bf16.msra.mxu1 %v6972_v57  ;;  %v7020_v52 = vcombine.low %v912_v41, %v916_v62  ;;  %v6839_v55 = vcombine.high %v729_v50, %v733_v51  ;;  %v486_v57 = vld [vmem:[#allocation7 + $0x78] sm:$0xff]  ;;  %v6838_v61 = vcombine.low %v729_v50, %v733_v51  ;;  %v773_v41 = vld [vmem:[#allocation7 + $0x970] sm:$0xff] }
 0x1a1   :  { %3542 = vmatprep.subr.bf16.mxu1 %v6981_v59  ;;  %v741_v59 = vld [vmem:[#allocation7 + $0x870] sm:$0xff]  ;;  %v6593_v63 = vcombine.high %v482_v56, %v486_v57  ;;  %v6592_v10 = vcombine.low %v482_v56, %v486_v57 }
 0x1a2   :  { %v789_v56 = vld [vmem:[#allocation7 + $0x9f0] sm:$0xff] }
 0x1a3   :  { %3643 = vmatpush1.bf16.msra.mxu0 %v6782_v58  ;;  %v737_v58 = vld [vmem:[#allocation7 + $0x850] sm:$0xff] }
 0x1a4   :  { %3644 = vmatprep.subr.bf16.mxu0 %v6791_v60  ;;  %3543 = vmatpush1.bf16.msra.mxu1 %v6980_v6  ;;  %v6584_v60 = vcombine.low %v474_v44, %v478_v46  ;;  %v6847_v3 = vcombine.high %v737_v58, %v741_v59  ;;  %v494_v6 = vld [vmem:[#allocation7 + $0xb8] sm:$0xff]  ;;  %v6846_v11 = vcombine.low %v737_v58, %v741_v59  ;;  %v781_v44 = vld [vmem:[#allocation7 + $0x9b0] sm:$0xff] }
 0x1a5   :  { %3544 = vmatprep.subr.bf16.mxu1 %v6989_v7  ;;  %v745_v7 = vld [vmem:[#allocation7 + $0x890] sm:$0xff]  ;;  %v6601_v2 = vcombine.high %v490_v4, %v494_v6  ;;  %v6600_v17 = vcombine.low %v490_v4, %v494_v6 }
 0x1a6   :  { %v797_v4 = vld [vmem:[#allocation7 + $0xa30] sm:$0xff] }
 0x1a7   :  { %3645 = vmatpush1.bf16.msra.mxu0 %v6790_v49  ;;  %v8529_v49 = vld [vmem:[#allocation20 + $0x18] ss:$28 sps:$4 sm:$0xff]  }
 0x1a8   :  { %3646 = vmatprep.subr.bf16.mxu0 %v6799_v8  ;;  %3545 = vmatpush1.bf16.msra.mxu1 %v6988_v13  ;;  %v749_v8 = vld [vmem:[#allocation7 + $0x8b0] sm:$0xff]  ;;  %v498_v13 = vld [vmem:[#allocation7 + $0xd8] sm:$0xff] }
 0x1a9   :  { %3546 = vmatprep.subr.bf16.mxu1 %v6997_v14  ;;  %v6855_v45 = vcombine.high %v745_v7, %v749_v8  ;;  %v753_v14 = vld [vmem:[#allocation7 + $0x8d0] sm:$0xff]  ;;  %v6854_v18 = vcombine.low %v745_v7, %v749_v8 }
 0x1ab   :  { %3647 = vmatpush1.bf16.msra.mxu0 %v6798_v12  ;;  %v502_v12 = vld [vmem:[#allocation7 + $0xf8] sm:$0xff] }
 0x1ac   :  { %3648 = vmatprep.subr.bf16.mxu0 %v6807_v15  ;;  %3547 = vmatpush1.bf16.msra.mxu1 %v6996_v21  ;;  %v757_v15 = vld [vmem:[#allocation7 + $0x8f0] sm:$0xff]  ;;  %v6609_v20 = vcombine.high %v498_v13, %v502_v12  ;;  %v6608_v26 = vcombine.low %v498_v13, %v502_v12 }
 0x1ad   :  { %3548 = vmatprep.subr.bf16.mxu1 %v7005_v23  ;;  %v6863_v21 = vcombine.high %v753_v14, %v757_v15  ;;  %v510_v23 = vld [vmem:[#allocation7 + $0x138] sm:$0xff]  ;;  %v6862_v27 = vcombine.low %v753_v14, %v757_v15  ;;  %v805_v13 = vld [vmem:[#allocation7 + $0xa70] sm:$0xff] }
 0x1ae   :  { %v8521_v30 = vpop.f32.mrb[0].mxu1 }
 0x1af   :  { %3649 = vmatpush1.bf16.msra.mxu0 %v6806_v22  ;;  %v8523_v34 = vpop.f32.mrb[1].mxu1  ;;  %v506_v22 = vld [vmem:[#allocation7 + $0x118] sm:$0xff] }
 0x1b0   :  { %3650 = vmatprep.subr.bf16.mxu0 %v6815_v24  ;;  %v8525_v36 = vpop.f32.mrb[2].mxu1  ;;  %3549 = vmatpush1.bf16.msra.mxu1 %v7004_v9  ;;  %v761_v24 = vld [vmem:[#allocation7 + $0x910] sm:$0xff]  ;;  %v6617_v28 = vcombine.high %v506_v22, %v510_v23  ;;  %v6616_v62 = vcombine.low %v506_v22, %v510_v23 }
 0x1b1   :  { %v8527_v38 = vpop.f32.mrb[3].mxu1  ;;  %3550 = vmatprep.subr.bf16.mxu1 %v7013_v29  ;;  %v6871_v9 = vcombine.high %v761_v24, %v765_v25  ;;  %v518_v29 = vld [vmem:[#allocation7 + $0x178] sm:$0xff]  ;;  %v6870_v31 = vcombine.low %v761_v24, %v765_v25 }
 0x1b3   :  { %3651 = vmatpush1.bf16.msra.mxu0 %v6814_v0  ;;  %v514_v0 = vld [vmem:[#allocation7 + $0x158] sm:$0xff] }
 0x1b4   :  { %3652 = vmatprep.subr.bf16.mxu0 %v6823_v32  ;;  %3551 = vmatpush1.bf16.msra.mxu1 %v7012_v37  ;;  %v769_v32 = vld [vmem:[#allocation7 + $0x950] sm:$0xff]  ;;  %v6625_v35 = vcombine.high %v514_v0, %v518_v29  ;;  %v6624_v46 = vcombine.low %v514_v0, %v518_v29 }
 0x1b5   :  { %3552 = vmatprep.subr.bf16.mxu1 %v7021_v42  ;;  %v6879_v37 = vcombine.high %v769_v32, %v773_v41  ;;  %v526_v42 = vld [vmem:[#allocation7 + $0x1b8] sm:$0xff]  ;;  %v6878_v50 = vcombine.low %v769_v32, %v773_v41 }
 0x1b7   :  { %3653 = vmatpush1.bf16.msra.mxu0 %v6822_v39  ;;  %v522_v39 = vld [vmem:[#allocation7 + $0x198] sm:$0xff] }
 0x1b8   :  { %3654 = vmatprep.subr.bf16.mxu0 %v6831_v43  ;;  %3553 = vmatpush1.bf16.msra.mxu1 %v7020_v52  ;;  %v777_v43 = vld [vmem:[#allocation7 + $0x990] sm:$0xff]  ;;  %v6633_v51 = vcombine.high %v522_v39, %v526_v42  ;;  %v6632_v57 = vcombine.low %v522_v39, %v526_v42 }
 0x1b9   :  { %3753 = vmatprep.subr.bf16.mxu1 %v6585_v54  ;;  %v6887_v52 = vcombine.high %v777_v43, %v781_v44  ;;  %v534_v54 = vld [vmem:[#allocation7 + $0x1f8] sm:$0xff]  ;;  %v6886_v58 = vcombine.low %v777_v43, %v781_v44 }
 0x1bb   :  { %3655 = vmatpush1.bf16.msra.mxu0 %v6830_v53  ;;  %3571 = vmatmul.mubr.bf16.vlgmr.msra.gmra.mrb[4].mxu1 %v8529_v49  ;;  %v530_v53 = vld [vmem:[#allocation7 + $0x1d8] sm:$0xff] }
 0x1bc   :  { %3667 = vmatprep.subr.bf16.mxu0 %v6839_v55  ;;  %3754 = vmatpush1.bf16.msra.mxu1 %v6584_v60  ;;  %v785_v55 = vld [vmem:[#allocation7 + $0x9d0] sm:$0xff]  ;;  %v6641_v59 = vcombine.high %v530_v53, %v534_v54  ;;  %v6640_v6 = vcombine.low %v530_v53, %v534_v54 }
 0x1bd   :  { %3755 = vmatprep.subr.bf16.mxu1 %v6593_v63  ;;  %3785 = vmatprep.mubr.bf16.mxu1 %v8043_v16  ;;  %v6895_v60 = vcombine.high %v785_v55, %v789_v56  ;;  %v542_v63 = vld [vmem:[#allocation7 + $0x238] sm:$0xff]  ;;  %v6894_v7 = vcombine.low %v785_v55, %v789_v56 }
 0x1be   :  { %3657 = vmatmul.mubr.bf16.vlgmr.msra.gmra.mrb[4].mxu0 %v8494_v5 }
 0x1bf   :  { %3668 = vmatpush1.bf16.msra.mxu0 %v6838_v61  ;;  %3699 = vmatprep.mubr.bf16.mxu0 %v8499_v1  ;;  %v538_v61 = vld [vmem:[#allocation7 + $0x218] sm:$0xff] }
 0x1c0   :  { %3669 = vmatprep.subr.bf16.mxu0 %v6847_v3  ;;  %3756 = vmatpush1.bf16.msra.mxu1 %v6592_v10  ;;  %v793_v3 = vld [vmem:[#allocation7 + $0xa10] sm:$0xff]  ;;  %v6649_v8 = vcombine.high %v538_v61, %v542_v63  ;;  %v6648_v12 = vcombine.low %v538_v61, %v542_v63 }
 0x1c1   :  { %3757 = vmatprep.subr.bf16.mxu1 %v6601_v2  ;;  %v6903_v10 = vcombine.high %v793_v3, %v797_v4  ;;  %v550_v2 = vld [vmem:[#allocation7 + $0x278] sm:$0xff]  ;;  %v6902_v14 = vcombine.low %v793_v3, %v797_v4 }
 0x1c3   :  { %3670 = vmatpush1.bf16.msra.mxu0 %v6846_v11  ;;  %v546_v11 = vld [vmem:[#allocation7 + $0x258] sm:$0xff] }
 0x1c4   :  { %3671 = vmatprep.subr.bf16.mxu0 %v6855_v45  ;;  %3758 = vmatpush1.bf16.msra.mxu1 %v6600_v17  ;;  %v801_v45 = vld [vmem:[#allocation7 + $0xa50] sm:$0xff]  ;;  %v6657_v15 = vcombine.high %v546_v11, %v550_v2  ;;  %v554_v17 = vld [vmem:[#allocation7 + $0x298] sm:$0xff]  ;;  %v6656_v22 = vcombine.low %v546_v11, %v550_v2 }
 0x1c5   :  { %3759 = vmatprep.subr.bf16.mxu1 %v6609_v20  ;;  %v6911_v16 = vcombine.high %v801_v45, %v805_v13  ;;  %v809_v20 = vld [vmem:[#allocation7 + $0xa90] sm:$0xff]  ;;  %v6910_v23 = vcombine.low %v801_v45, %v805_v13 }
 0x1c7   :  { %3672 = vmatpush1.bf16.msra.mxu0 %v6854_v18  ;;  %v558_v18 = vld [vmem:[#allocation7 + $0x2b8] sm:$0xff] }
 0x1c8   :  { %3673 = vmatprep.subr.bf16.mxu0 %v6863_v21  ;;  %3760 = vmatpush1.bf16.msra.mxu1 %v6608_v26  ;;  %v813_v21 = vld [vmem:[#allocation7 + $0xab0] sm:$0xff]  ;;  %v6665_v24 = vcombine.high %v554_v17, %v558_v18  ;;  %v562_v26 = vld [vmem:[#allocation7 + $0x2d8] sm:$0xff]  ;;  %v6664_v0 = vcombine.low %v554_v17, %v558_v18 }
 0x1c9   :  { %3761 = vmatprep.subr.bf16.mxu1 %v6617_v28  ;;  %v6919_v25 = vcombine.high %v809_v20, %v813_v21  ;;  %v817_v28 = vld [vmem:[#allocation7 + $0xad0] sm:$0xff]  ;;  %v6918_v29 = vcombine.low %v809_v20, %v813_v21 }
 0x1cb   :  { %3674 = vmatpush1.bf16.msra.mxu0 %v6862_v27  ;;  %v566_v27 = vld [vmem:[#allocation7 + $0x2f8] sm:$0xff] }
 0x1cc   :  { %3675 = vmatprep.subr.bf16.mxu0 %v6871_v9  ;;  %3762 = vmatpush1.bf16.msra.mxu1 %v6616_v62  ;;  %v821_v9 = vld [vmem:[#allocation7 + $0xaf0] sm:$0xff]  ;;  %v6673_v32 = vcombine.high %v562_v26, %v566_v27  ;;  %v570_v62 = vld [vmem:[#allocation7 + $0x318] sm:$0xff]  ;;  %v6672_v39 = vcombine.low %v562_v26, %v566_v27 }
 0x1cd   :  { %3763 = vmatprep.subr.bf16.mxu1 %v6625_v35  ;;  %v6927_v41 = vcombine.high %v817_v28, %v821_v9  ;;  %v825_v35 = vld [vmem:[#allocation7 + $0xb10] sm:$0xff]  ;;  %v6926_v42 = vcombine.low %v817_v28, %v821_v9 }
 0x1cf   :  { %3676 = vmatpush1.bf16.msra.mxu0 %v6870_v31  ;;  %v574_v31 = vld [vmem:[#allocation7 + $0x338] sm:$0xff] }
 0x1d0   :  { %3677 = vmatprep.subr.bf16.mxu0 %v6879_v37  ;;  %3764 = vmatpush1.bf16.msra.mxu1 %v6624_v46  ;;  %v829_v37 = vld [vmem:[#allocation7 + $0xb30] sm:$0xff]  ;;  %v6681_v43 = vcombine.high %v570_v62, %v574_v31  ;;  %v578_v46 = vld [vmem:[#allocation7 + $0x358] sm:$0xff]  ;;  %v6680_v53 = vcombine.low %v570_v62, %v574_v31 }
 0x1d1   :  { %3765 = vmatprep.subr.bf16.mxu1 %v6633_v51  ;;  %v6935_v44 = vcombine.high %v825_v35, %v829_v37  ;;  %v833_v51 = vld [vmem:[#allocation7 + $0xb50] sm:$0xff]  ;;  %v6934_v54 = vcombine.low %v825_v35, %v829_v37 }
 0x1d3   :  { %3678 = vmatpush1.bf16.msra.mxu0 %v6878_v50  ;;  %v582_v50 = vld [vmem:[#allocation7 + $0x378] sm:$0xff] }
 0x1d4   :  { %3679 = vmatprep.subr.bf16.mxu0 %v6887_v52  ;;  %3766 = vmatpush1.bf16.msra.mxu1 %v6632_v57  ;;  %v837_v52 = vld [vmem:[#allocation7 + $0xb70] sm:$0xff]  ;;  %v6689_v55 = vcombine.high %v578_v46, %v582_v50  ;;  %v586_v57 = vld [vmem:[#allocation7 + $0x398] sm:$0xff]  ;;  %v6688_v61 = vcombine.low %v578_v46, %v582_v50 }
 0x1d5   :  { %3767 = vmatprep.subr.bf16.mxu1 %v6641_v59  ;;  %v6943_v56 = vcombine.high %v833_v51, %v837_v52  ;;  %v841_v59 = vld [vmem:[#allocation7 + $0xb90] sm:$0xff]  ;;  %v6942_v63 = vcombine.low %v833_v51, %v837_v52  ;;  %v634_v52 = vld [vmem:[#allocation7 + $0x518] sm:$0xff] }
 0x1d7   :  { %3680 = vmatpush1.bf16.msra.mxu0 %v6886_v58  ;;  %v590_v58 = vld [vmem:[#allocation7 + $0x3b8] sm:$0xff] }
 0x1d8   :  { %3681 = vmatprep.subr.bf16.mxu0 %v6895_v60  ;;  %3768 = vmatpush1.bf16.msra.mxu1 %v6640_v6  ;;  %v845_v60 = vld [vmem:[#allocation7 + $0xbb0] sm:$0xff]  ;;  %v6697_v3 = vcombine.high %v586_v57, %v590_v58  ;;  %v594_v6 = vld [vmem:[#allocation7 + $0x3d8] sm:$0xff]  ;;  %v6696_v11 = vcombine.low %v586_v57, %v590_v58 }
 0x1d9   :  { %3769 = vmatprep.subr.bf16.mxu1 %v6649_v8  ;;  %v6951_v4 = vcombine.high %v841_v59, %v845_v60  ;;  %v849_v8 = vld [vmem:[#allocation7 + $0xbd0] sm:$0xff]  ;;  %v6950_v2 = vcombine.low %v841_v59, %v845_v60  ;;  %v642_v60 = vld [vmem:[#allocation7 + $0x558] sm:$0xff] }
 0x1db   :  { %3682 = vmatpush1.bf16.msra.mxu0 %v6894_v7  ;;  %v598_v7 = vld [vmem:[#allocation7 + $0x3f8] sm:$0xff] }
 0x1dc   :  { %3683 = vmatprep.subr.bf16.mxu0 %v6903_v10  ;;  %3770 = vmatpush1.bf16.msra.mxu1 %v6648_v12  ;;  %v853_v10 = vld [vmem:[#allocation7 + $0xbf0] sm:$0xff]  ;;  %v6705_v45 = vcombine.high %v594_v6, %v598_v7  ;;  %v602_v12 = vld [vmem:[#allocation7 + $0x418] sm:$0xff]  ;;  %v6704_v17 = vcombine.low %v594_v6, %v598_v7 }
 0x1dd   :  { %3771 = vmatprep.subr.bf16.mxu1 %v6657_v15  ;;  %v6959_v13 = vcombine.high %v849_v8, %v853_v10  ;;  %v857_v15 = vld [vmem:[#allocation7 + $0xc10] sm:$0xff]  ;;  %v6958_v18 = vcombine.low %v849_v8, %v853_v10 }
 0x1de   :  { %v901_v6 = vld [vmem:[#allocation7 + $0xd70] sm:$0xff] }
 0x1df   :  { %3684 = vmatpush1.bf16.msra.mxu0 %v6902_v14  ;;  %v606_v14 = vld [vmem:[#allocation7 + $0x438] sm:$0xff] }
 0x1e0   :  { %3685 = vmatprep.subr.bf16.mxu0 %v6911_v16  ;;  %3772 = vmatpush1.bf16.msra.mxu1 %v6656_v22  ;;  %v861_v16 = vld [vmem:[#allocation7 + $0xc30] sm:$0xff]  ;;  %v6713_v20 = vcombine.high %v602_v12, %v606_v14  ;;  %v610_v22 = vld [vmem:[#allocation7 + $0x458] sm:$0xff]  ;;  %v6712_v26 = vcombine.low %v602_v12, %v606_v14 }
 0x1e1   :  { %3773 = vmatprep.subr.bf16.mxu1 %v6665_v24  ;;  %v6967_v21 = vcombine.high %v857_v15, %v861_v16  ;;  %v865_v24 = vld [vmem:[#allocation7 + $0xc50] sm:$0xff]  ;;  %v6966_v27 = vcombine.low %v857_v15, %v861_v16 }
 0x1e2   :  { %v905_v14 = vld [vmem:[#allocation7 + $0xd90] sm:$0xff] }
 0x1e3   :  { %3686 = vmatpush1.bf16.msra.mxu0 %v6910_v23  ;;  %v614_v23 = vld [vmem:[#allocation7 + $0x478] sm:$0xff]  ;;  %v909_v15 = vld [vmem:[#allocation7 + $0xdb0] sm:$0xff] }
 0x1e4   :  { %3687 = vmatprep.subr.bf16.mxu0 %v6919_v25  ;;  %3774 = vmatpush1.bf16.msra.mxu1 %v6664_v0  ;;  %v869_v25 = vld [vmem:[#allocation7 + $0xc70] sm:$0xff]  ;;  %v6721_v28 = vcombine.high %v610_v22, %v614_v23  ;;  %v618_v0 = vld [vmem:[#allocation7 + $0x498] sm:$0xff]  ;;  %v6720_v62 = vcombine.low %v610_v22, %v614_v23 }
 0x1e5   :  { %3775 = vmatprep.subr.bf16.mxu1 %v6673_v32  ;;  %v6975_v9 = vcombine.high %v865_v24, %v869_v25  ;;  %v873_v32 = vld [vmem:[#allocation7 + $0xc90] sm:$0xff]  ;;  %v6974_v31 = vcombine.low %v865_v24, %v869_v25  ;;  %v658_v22 = vld [vmem:[#allocation7 + $0x5d8] sm:$0xff] }
 0x1e6   :  { %v662_v23 = vld [vmem:[#allocation7 + $0x5f8] sm:$0xff] }
 0x1e7   :  { %3688 = vmatpush1.bf16.msra.mxu0 %v6918_v29  ;;  %v622_v29 = vld [vmem:[#allocation7 + $0x4b8] sm:$0xff] }
 0x1e8   :  { %3689 = vmatprep.subr.bf16.mxu0 %v6927_v41  ;;  %3776 = vmatpush1.bf16.msra.mxu1 %v6672_v39  ;;  %v877_v41 = vld [vmem:[#allocation7 + $0xcb0] sm:$0xff]  ;;  %v6729_v35 = vcombine.high %v618_v0, %v622_v29  ;;  %v626_v39 = vld [vmem:[#allocation7 + $0x4d8] sm:$0xff] }
 0x1e9   :  { %3777 = vmatprep.subr.bf16.mxu1 %v6681_v43  ;;  %v6983_v37 = vcombine.high %v873_v32, %v877_v41  ;;  %v881_v43 = vld [vmem:[#allocation7 + $0xcd0] sm:$0xff]  ;;  %v6982_v46 = vcombine.low %v873_v32, %v877_v41 }
 0x1eb   :  { %3690 = vmatpush1.bf16.msra.mxu0 %v6926_v42  ;;  %v630_v42 = vld [vmem:[#allocation7 + $0x4f8] sm:$0xff] }
 0x1ec   :  { %3691 = vmatprep.subr.bf16.mxu0 %v6935_v44  ;;  %3778 = vmatpush1.bf16.msra.mxu1 %v6680_v53  ;;  %v885_v44 = vld [vmem:[#allocation7 + $0xcf0] sm:$0xff]  ;;  %v6737_v50 = vcombine.high %v626_v39, %v630_v42  ;;  %v638_v53 = vld [vmem:[#allocation7 + $0x538] sm:$0xff] }
 0x1ed   :  { %3779 = vmatprep.subr.bf16.mxu1 %v6689_v55  ;;  %v6991_v51 = vcombine.high %v881_v43, %v885_v44  ;;  %v893_v55 = vld [vmem:[#allocation7 + $0xd30] sm:$0xff]  ;;  %v6990_v57 = vcombine.low %v881_v43, %v885_v44  ;;  %v6745_v58 = vcombine.high %v634_v52, %v638_v53  ;;  %v6744_v7 = vcombine.low %v634_v52, %v638_v53  ;;  %v674_v52 = vld [vmem:[#allocation7 + $0x658] sm:$0xff] }
 0x1ee   :  { %v6768_v44 = vcombine.low %v658_v22, %v662_v23  ;;  %v678_v53 = vld [vmem:[#allocation7 + $0x678] sm:$0xff] }
 0x1ef   :  { %3692 = vmatpush1.bf16.msra.mxu0 %v6934_v54  ;;  %v889_v54 = vld [vmem:[#allocation7 + $0xd10] sm:$0xff] }
 0x1f0   :  { %3693 = vmatprep.subr.bf16.mxu0 %v6943_v56  ;;  %3780 = vmatpush1.bf16.msra.mxu1 %v6688_v61  ;;  %v6736_v56 = vcombine.low %v626_v39, %v630_v42  ;;  %v6999_v59 = vcombine.high %v889_v54, %v893_v55  ;;  %v646_v61 = vld [vmem:[#allocation7 + $0x578] sm:$0xff]  ;;  %v6998_v8 = vcombine.low %v889_v54, %v893_v55 }
 0x1f1   :  { %3781 = vmatprep.subr.bf16.mxu1 %v6697_v3  ;;  %v8544_v3 = vsub.s32 1, %v8414_v40  ;;  %v6753_v10 = vcombine.high %v642_v60, %v646_v61  ;;  %v6752_v16 = vcombine.low %v642_v60, %v646_v61  ;;  %v666_v39 = vld [vmem:[#allocation7 + $0x618] sm:$0xff]  ;;  %v6784_v61 = vcombine.low %v674_v52, %v678_v53 }
 0x1f2   :  { %v670_v42 = vld [vmem:[#allocation7 + $0x638] sm:$0xff] }
 0x1f3   :  { %3694 = vmatpush1.bf16.msra.mxu0 %v6942_v63  ;;  %v8541_v63 = vld [vmem:[#allocation9] sm:$0xff]  ;;  %v6776_v54 = vcombine.low %v666_v39, %v670_v42  ;;  %v7536_v55 = vld [vmem:[#allocation11] ss:$16 sps:$4 sm:$0xff]  }
 0x1f4   :  { %3695 = vmatprep.subr.bf16.mxu0 %v6951_v4  ;;  %3782 = vmatpush1.bf16.msra.mxu1 %v6696_v11  ;;  %v897_v4 = vld [vmem:[#allocation7 + $0xd50] sm:$0xff]  ;;  %v928_v12 = vrot.slane %v8541_v63, %v8544_v3 }
 0x1f5   :  { %3783 = vmatprep.subr.bf16.mxu1 %v6705_v45  ;;  %v650_v45 = vld [vmem:[#allocation7 + $0x598] sm:$0xff] }
 0x1f6   :  { %v3274_v24 = vadd.f32 %v8523_v34, %v928_v12  ;;  %v3278_v41 = vadd.f32 %v8527_v38, %v928_v12  ;;  %v6777_v38 = vcombine.high %v666_v39, %v670_v42  ;;  %v702_v12 = vld [vmem:[#allocation7 + $0x738] sm:$0xff] }
 0x1f7   :  { %3696 = vmatpush1.bf16.msra.mxu0 %v6950_v2  ;;  %v7007_v2 = vcombine.high %v897_v4, %v901_v6  ;;  %v7557_v39 = vld [vmem:[#allocation11 + $0xe0] ss:$16 sps:$4 sm:$0xff]  }
 0x1f8   :  { %3697 = vmatprep.subr.bf16.mxu0 %v6959_v13  ;;  %3784 = vmatpush1.bf16.msra.mxu1 %v6704_v17  ;;  %v654_v13 = vld [vmem:[#allocation7 + $0x5b8] sm:$0xff]  ;;  %v7006_v17 = vcombine.low %v897_v4, %v901_v6 }
 0x1f9   :  { %3796 = vmatprep.subr.bf16.mxu1 %v6713_v20  ;;  %v6760_v32 = vcombine.low %v650_v45, %v654_v13  ;;  %v7539_v4 = vld [vmem:[#allocation11 + $0x20] ss:$16 sps:$4 sm:$0xff]  }
 0x1fb   :  { %3698 = vmatpush1.bf16.msra.mxu0 %v6958_v18  ;;  %3786 = vmatmul.mubr.bf16.vlgmr.msra.gmra.mrb[8].mxu1 %v8515_v47  ;;  %v6728_v47 = vcombine.low %v618_v0, %v622_v29  ;;  %v6761_v18 = vcombine.high %v650_v45, %v654_v13  ;;  %v7014_v29 = vcombine.low %v905_v14, %v909_v15  ;;  %v698_v13 = vld [vmem:[#allocation7 + $0x718] sm:$0xff] }
 0x1fc   :  { %3710 = vmatprep.subr.bf16.mxu0 %v6967_v21  ;;  %3797 = vmatpush1.bf16.msra.mxu1 %v6712_v26  ;;  %v7015_v21 = vcombine.high %v905_v14, %v909_v15  ;;  %v913_v26 = vld [vmem:[#allocation7 + $0xdd0] sm:$0xff]  ;;  %v7545_v15 = vld [vmem:[#allocation11 + $0x60] ss:$16 sps:$4 sm:$0xff]  }
 0x1fd   :  { %3798 = vmatprep.subr.bf16.mxu1 %v6721_v28  ;;  %3828 = vmatprep.mubr.bf16.mxu1 %v8457_v48  ;;  %v8539_v48 = vsub.s32 0, %v8414_v40 }
 0x1fe   :  { %3700 = vmatmul.mubr.bf16.vlgmr.msra.gmra.mrb[4].mxu0 %v8507_v19 }
 0x1ff   :  { %3711 = vmatpush1.bf16.msra.mxu0 %v6966_v27  ;;  %3742 = vmatprep.mubr.bf16.mxu0 %v8249_v33  ;;  %v924_v11 = vrot.slane %v8541_v63, %v8539_v48  ;;  %v917_v27 = vld [vmem:[#allocation7 + $0xdf0] sm:$0xff] }
 0x200   :  { %3712 = vmatprep.subr.bf16.mxu0 %v6975_v9  ;;  %3799 = vmatpush1.bf16.msra.mxu1 %v6720_v62  ;;  %v7023_v34 = vcombine.high %v913_v26, %v917_v27 }
 0x201   :  { %3800 = vmatprep.subr.bf16.mxu1 %v6729_v35  ;;  %v3272_v20 = vadd.f32 %v8521_v30, %v924_v11  ;;  %v3276_v28 = vadd.f32 %v8525_v36, %v924_v11 }
 0x203   :  { %3713 = vmatpush1.bf16.msra.mxu0 %v6974_v31  ;;  %v6769_v31 = vcombine.high %v658_v22, %v662_v23  ;;  %v7548_v22 = vld [vmem:[#allocation11 + $0x80] ss:$16 sps:$4 sm:$0xff]  }
 0x204   :  { %3714 = vmatprep.subr.bf16.mxu0 %v6983_v37  ;;  %3801 = vmatpush1.bf16.msra.mxu1 %v6728_v47 }
 0x205   :  { %3802 = vmatprep.subr.bf16.mxu1 %v6737_v50  ;;  %v7538_v50 = vld [vmem:[#allocation11 + $0x4] ss:$16 sps:$4 sm:$0xff]  }
 0x207   :  { %3715 = vmatpush1.bf16.msra.mxu0 %v6982_v46  ;;  %v7022_v46 = vcombine.low %v913_v26, %v917_v27  ;;  %v718_v26 = vld [vmem:[#allocation7 + $0x7b8] sm:$0xff] }
 0x208   :  { %3716 = vmatprep.subr.bf16.mxu0 %v6991_v51  ;;  %3803 = vmatpush1.bf16.msra.mxu1 %v6736_v56  ;;  %v6785_v56 = vcombine.high %v674_v52, %v678_v53  ;;  %v746_v52 = vld [vmem:[#allocation7 + $0x898] sm:$0xff] }
 0x209   :  { %3804 = vmatprep.subr.bf16.mxu1 %v6745_v58  ;;  %v682_v58 = vld [vmem:[#allocation7 + $0x698] sm:$0xff] }
 0x20a   :  { %v750_v53 = vld [vmem:[#allocation7 + $0x8b8] sm:$0xff] }
 0x20b   :  { %3717 = vmatpush1.bf16.msra.mxu0 %v6990_v57  ;;  %v7541_v57 = vld [vmem:[#allocation11 + $0x24] ss:$16 sps:$4 sm:$0xff]  }
 0x20c   :  { %3718 = vmatprep.subr.bf16.mxu0 %v6999_v59  ;;  %3805 = vmatpush1.bf16.msra.mxu1 %v6744_v7  ;;  %v686_v59 = vld [vmem:[#allocation7 + $0x6b8] sm:$0xff] }
 0x20d   :  { %3806 = vmatprep.subr.bf16.mxu1 %v6753_v10  ;;  %v6793_v6 = vcombine.high %v682_v58, %v686_v59  ;;  %v7544_v7 = vld [vmem:[#allocation11 + $0x44] ss:$16 sps:$4 sm:$0xff]   ;;  %v6792_v11 = vcombine.low %v682_v58, %v686_v59 }
 0x20e   :  { %v694_v10 = vld [vmem:[#allocation7 + $0x6f8] sm:$0xff] }
 0x20f   :  { %3719 = vmatpush1.bf16.msra.mxu0 %v6998_v8  ;;  %v690_v8 = vld [vmem:[#allocation7 + $0x6d8] sm:$0xff] }
 0x210   :  { %3720 = vmatprep.subr.bf16.mxu0 %v7007_v2  ;;  %3807 = vmatpush1.bf16.msra.mxu1 %v6752_v16  ;;  %v7542_v2 = vld [vmem:[#allocation11 + $0x40] ss:$16 sps:$4 sm:$0xff]   ;;  %v6801_v45 = vcombine.high %v690_v8, %v694_v10  ;;  %v6800_v14 = vcombine.low %v690_v8, %v694_v10  ;;  %v6809_v16 = vcombine.high %v698_v13, %v702_v12 }
 0x211   :  { %v3400_v25 = vpop.f32.mrb[0].mxu0  ;;  %3808 = vmatprep.subr.bf16.mxu1 %v6761_v18  ;;  %v706_v18 = vld [vmem:[#allocation7 + $0x758] sm:$0xff] }
 0x212   :  { %v7409_v9 = vadd.f32 %v3400_v25, %v3272_v20  ;;  %v3402_v0 = vpop.f32.mrb[1].mxu0  ;;  %v710_v20 = vld [vmem:[#allocation7 + $0x778] sm:$0xff] }
 0x213   :  { %v7411_v62 = vadd.f32 %v3402_v0, %v3274_v24  ;;  %v3404_v30 = vpop.f32.mrb[2].mxu0  ;;  %3721 = vmatpush1.bf16.msra.mxu0 %v7006_v17  ;;  %v7550_v17 = vld [vmem:[#allocation11 + $0x84] ss:$16 sps:$4 sm:$0xff]   ;;  %v6817_v23 = vcombine.high %v706_v18, %v710_v20  ;;  %v6816_v27 = vcombine.low %v706_v18, %v710_v20  ;;  %v7569_v10 = vld [vmem:[#allocation11 + $0x160] ss:$16 sps:$4 sm:$0xff]  }
 0x214   :  { %v7413_v35 = vadd.f32 %v3404_v30, %v3276_v28  ;;  %v3406_v37 = vpop.f32.mrb[3].mxu0  ;;  %3722 = vmatprep.subr.bf16.mxu0 %v7015_v21  ;;  %3809 = vmatpush1.bf16.msra.mxu1 %v6760_v32  ;;  %v6808_v21 = vcombine.low %v698_v13, %v702_v12  ;;  %v7553_v24 = vld [vmem:[#allocation11 + $0xa4] ss:$16 sps:$4 sm:$0xff]   ;;  %v7551_v28 = vld [vmem:[#allocation11 + $0xa0] ss:$16 sps:$4 sm:$0xff]  }
 0x215   :  { %v7415_v43 = vadd.f32 %v3406_v37, %v3278_v41  ;;  %3810 = vmatprep.subr.bf16.mxu1 %v6769_v31  ;;  %v714_v25 = vld [vmem:[#allocation7 + $0x798] sm:$0xff] }
 0x216   :  { %v8554_v36 = vpack.c.bf16 %v7413_v35, %v7409_v9  ;;  %v6825_v9 = vcombine.high %v714_v25, %v718_v26  ;;  %v7556_v0 = vld [vmem:[#allocation11 + $0xc4] ss:$16 sps:$4 sm:$0xff]   ;;  %v6824_v41 = vcombine.low %v714_v25, %v718_v26  ;;  %v7572_v12 = vld [vmem:[#allocation11 + $0x180] ss:$16 sps:$4 sm:$0xff]  }
 0x217   :  { %v3926_v47 = vpack.c.bf16 %v7415_v43, %v7411_v62  ;;  %3723 = vmatpush1.bf16.msra.mxu0 %v7014_v29  ;;  %v722_v29 = vld [vmem:[#allocation7 + $0x7d8] sm:$0xff] }
 0x218   :  { %3724 = vmatprep.subr.bf16.mxu0 %v7023_v34  ;;  %3811 = vmatpush1.bf16.msra.mxu1 %v6768_v44  ;;  %v726_v32 = vld [vmem:[#allocation7 + $0x7f8] sm:$0xff] }
 0x219   :  { %v3934_v51 = vmul.bf16 1045249613, %v3926_v47  ;;  %3812 = vmatprep.subr.bf16.mxu1 %v6777_v38  ;;  %v7554_v62 = vld [vmem:[#allocation11 + $0xc0] ss:$16 sps:$4 sm:$0xff]   ;;  %v6833_v30 = vcombine.high %v722_v29, %v726_v32  ;;  %v7559_v31 = vld [vmem:[#allocation11 + $0xe4] ss:$16 sps:$4 sm:$0xff]   ;;  %v6832_v34 = vcombine.low %v722_v29, %v726_v32 }
 0x21a   :  { %v730_v35 = vld [vmem:[#allocation7 + $0x818] sm:$0xff] }
 0x21b   :  { %3725 = vmatpush1.bf16.msra.mxu0 %v7022_v46  ;;  %v8556_v60 = vmax.bf16 %v3934_v51, %v3926_v47  ;;  %v734_v37 = vld [vmem:[#allocation7 + $0x838] sm:$0xff] }
 0x21c   :  { %5507 = vmatprep.subr.bf16.mxu0 %v7538_v50  ;;  %3813 = vmatpush1.bf16.msra.mxu1 %v6776_v54  ;;  %v6841_v42 = vcombine.high %v730_v35, %v734_v37  ;;  %v7562_v43 = vld [vmem:[#allocation11 + $0x104] ss:$16 sps:$4 sm:$0xff]   ;;  %v6840_v46 = vcombine.low %v730_v35, %v734_v37  ;;  %v7560_v38 = vld [vmem:[#allocation11 + $0x100] ss:$16 sps:$4 sm:$0xff]  }
 0x21d   :  { %3814 = vmatprep.subr.bf16.mxu1 %v6785_v56  ;;  %v738_v44 = vld [vmem:[#allocation7 + $0x858] sm:$0xff]  ;;  %v6857_v56 = vcombine.high %v746_v52, %v750_v53 }
 0x21e   :  { %3743 = vmatmul.mubr.bf16.vlgmr.msra.gmra.mrb[4].mxu0 %v8529_v49  ;;  %v7547_v49 = vld [vmem:[#allocation11 + $0x64] ss:$16 sps:$4 sm:$0xff]   ;;  %v7575_v20 = vld [vmem:[#allocation11 + $0x1a0] ss:$16 sps:$4 sm:$0xff]  }
 0x21f   :  { %5508 = vmatpush1.bf16.msra.mxu0 %v7536_v55  ;;  %5539 = vmatprep.mubr.bf16.mxu0 %v8556_v60  ;;  %v742_v47 = vld [vmem:[#allocation7 + $0x878] sm:$0xff] }
 0x220   :  { %5509 = vmatprep.subr.bf16.mxu0 %v7541_v57  ;;  %3815 = vmatpush1.bf16.msra.mxu1 %v6784_v61  ;;  %v6849_v50 = vcombine.high %v738_v44, %v742_v47  ;;  %v7565_v51 = vld [vmem:[#allocation11 + $0x124] ss:$16 sps:$4 sm:$0xff]   ;;  %v6848_v54 = vcombine.low %v738_v44, %v742_v47  ;;  %v7563_v55 = vld [vmem:[#allocation11 + $0x120] ss:$16 sps:$4 sm:$0xff]   ;;  %v6856_v61 = vcombine.low %v746_v52, %v750_v53 }
 0x221   :  { %3816 = vmatprep.subr.bf16.mxu1 %v6793_v6  ;;  %v7568_v57 = vld [vmem:[#allocation11 + $0x144] ss:$16 sps:$4 sm:$0xff]   ;;  %v7578_v26 = vld [vmem:[#allocation11 + $0x1c0] ss:$16 sps:$4 sm:$0xff]  }
 0x222   :  { %v754_v58 = vld [vmem:[#allocation7 + $0x8d8] sm:$0xff] }
 0x223   :  { %5510 = vmatpush1.bf16.msra.mxu0 %v7539_v4  ;;  %v758_v59 = vld [vmem:[#allocation7 + $0x8f8] sm:$0xff] }
 0x224   :  { %5511 = vmatprep.subr.bf16.mxu0 %v7544_v7  ;;  %3817 = vmatpush1.bf16.msra.mxu1 %v6792_v11  ;;  %v7566_v4 = vld [vmem:[#allocation11 + $0x140] ss:$16 sps:$4 sm:$0xff]   ;;  %v6865_v6 = vcombine.high %v754_v58, %v758_v59 }
 0x225   :  { %3818 = vmatprep.subr.bf16.mxu1 %v6801_v45  ;;  %v762_v7 = vld [vmem:[#allocation7 + $0x918] sm:$0xff] }
 0x226   :  { %v766_v8 = vld [vmem:[#allocation7 + $0x938] sm:$0xff] }
 0x227   :  { %5512 = vmatpush1.bf16.msra.mxu0 %v7542_v2  ;;  %v6873_v11 = vcombine.high %v762_v7, %v766_v8  ;;  %v7574_v2 = vld [vmem:[#allocation11 + $0x184] ss:$16 sps:$4 sm:$0xff]   ;;  %v6872_v13 = vcombine.low %v762_v7, %v766_v8  ;;  %v7581_v32 = vld [vmem:[#allocation11 + $0x1e0] ss:$16 sps:$4 sm:$0xff]  }
 0x228   :  { %5513 = vmatprep.subr.bf16.mxu0 %v7547_v49  ;;  %3819 = vmatpush1.bf16.msra.mxu1 %v6800_v14  ;;  %v770_v45 = vld [vmem:[#allocation7 + $0x958] sm:$0xff] }
 0x229   :  { %3820 = vmatprep.subr.bf16.mxu1 %v6809_v16  ;;  %v774_v49 = vld [vmem:[#allocation7 + $0x978] sm:$0xff] }
 0x22a   :  { %v6881_v14 = vcombine.high %v770_v45, %v774_v49  ;;  %v778_v16 = vld [vmem:[#allocation7 + $0x998] sm:$0xff]  ;;  %v6880_v18 = vcombine.low %v770_v45, %v774_v49 }
 0x22b   :  { %5514 = vmatpush1.bf16.msra.mxu0 %v7545_v15  ;;  %v7577_v15 = vld [vmem:[#allocation11 + $0x1a4] ss:$16 sps:$4 sm:$0xff]  }
 0x22c   :  { %5515 = vmatprep.subr.bf16.mxu0 %v7550_v17  ;;  %3821 = vmatpush1.bf16.msra.mxu1 %v6808_v21  ;;  %v782_v17 = vld [vmem:[#allocation7 + $0x9b8] sm:$0xff] }
 0x22d   :  { %3822 = vmatprep.subr.bf16.mxu1 %v6817_v23  ;;  %v6889_v21 = vcombine.high %v778_v16, %v782_v17  ;;  %v786_v23 = vld [vmem:[#allocation7 + $0x9d8] sm:$0xff]  ;;  %v6888_v25 = vcombine.low %v778_v16, %v782_v17 }
 0x22e   :  { %v806_v35 = vld [vmem:[#allocation7 + $0xa78] sm:$0xff] }
 0x22f   :  { %5516 = vmatpush1.bf16.msra.mxu0 %v7548_v22  ;;  %v7580_v22 = vld [vmem:[#allocation11 + $0x1c4] ss:$16 sps:$4 sm:$0xff]  }
 0x230   :  { %5517 = vmatprep.subr.bf16.mxu0 %v7553_v24  ;;  %3823 = vmatpush1.bf16.msra.mxu1 %v6816_v27  ;;  %v790_v24 = vld [vmem:[#allocation7 + $0x9f8] sm:$0xff] }
 0x231   :  { %3824 = vmatprep.subr.bf16.mxu1 %v6825_v9  ;;  %v6897_v27 = vcombine.high %v786_v23, %v790_v24  ;;  %v794_v9 = vld [vmem:[#allocation7 + $0xa18] sm:$0xff]  ;;  %v6896_v29 = vcombine.low %v786_v23, %v790_v24 }
 0x232   :  { %v810_v44 = vld [vmem:[#allocation7 + $0xa98] sm:$0xff] }
 0x233   :  { %5518 = vmatpush1.bf16.msra.mxu0 %v7551_v28  ;;  %v7583_v28 = vld [vmem:[#allocation11 + $0x1e4] ss:$16 sps:$4 sm:$0xff]  }
 0x234   :  { %5519 = vmatprep.subr.bf16.mxu0 %v7556_v0  ;;  %3825 = vmatpush1.bf16.msra.mxu1 %v6824_v41  ;;  %v798_v0 = vld [vmem:[#allocation7 + $0xa38] sm:$0xff] }
 0x235   :  { %3826 = vmatprep.subr.bf16.mxu1 %v6833_v30  ;;  %v6905_v41 = vcombine.high %v794_v9, %v798_v0  ;;  %v7586_v30 = vld [vmem:[#allocation11 + $0x204] ss:$16 sps:$4 sm:$0xff]   ;;  %v6904_v37 = vcombine.low %v794_v9, %v798_v0 }
 0x236   :  { %v814_v47 = vld [vmem:[#allocation7 + $0xab8] sm:$0xff] }
 0x237   :  { %5520 = vmatpush1.bf16.msra.mxu0 %v7554_v62  ;;  %v3933_v62 = vmul.bf16 1045249613, %v8554_v36  ;;  %v818_v52 = vld [vmem:[#allocation7 + $0xad8] sm:$0xff] }
 0x238   :  { %5521 = vmatprep.subr.bf16.mxu0 %v7559_v31  ;;  %3827 = vmatpush1.bf16.msra.mxu1 %v6832_v34  ;;  %v802_v31 = vld [vmem:[#allocation7 + $0xa58] sm:$0xff] }
 0x239   :  { %3839 = vmatprep.subr.bf16.mxu1 %v6841_v42  ;;  %v7584_v34 = vld [vmem:[#allocation11 + $0x200] ss:$16 sps:$4 sm:$0xff]   ;;  %v8564_v42 = vmax.bf16 %v3933_v62, %v8554_v36 }
 0x23a   :  { %v822_v53 = vld [vmem:[#allocation7 + $0xaf8] sm:$0xff] }
 0x23b   :  { %5522 = vmatpush1.bf16.msra.mxu0 %v7557_v39  ;;  %3829 = vmatmul.mubr.bf16.vlgmr.msra.gmra.mrb[8].mxu1 %v8494_v5  ;;  %v7571_v5 = vld [vmem:[#allocation11 + $0x164] ss:$16 sps:$4 sm:$0xff]   ;;  %v6913_v39 = vcombine.high %v802_v31, %v806_v35  ;;  %v7590_v36 = vld [vmem:[#allocation11 + $0x240] ss:$16 sps:$4 sm:$0xff]  }
 0x23c   :  { %5523 = vmatprep.subr.bf16.mxu0 %v7562_v43  ;;  %3840 = vmatpush1.bf16.msra.mxu1 %v6840_v46  ;;  %v7589_v43 = vld [vmem:[#allocation11 + $0x224] ss:$16 sps:$4 sm:$0xff]   ;;  %v6912_v46 = vcombine.low %v802_v31, %v806_v35  ;;  %v7611_v35 = vld [vmem:[#allocation11 + $0x320] ss:$16 sps:$4 sm:$0xff]  }
 0x23d   :  { %3871 = vmatprep.mubr.bf16.mxu1 %v8499_v1  ;;  %3841 = vmatprep.subr.bf16.mxu1 %v6849_v50  ;;  %v6864_v1 = vcombine.low %v754_v58, %v758_v59  ;;  %v6921_v50 = vcombine.high %v810_v44, %v814_v47  ;;  %v830_v58 = vld [vmem:[#allocation7 + $0xb38] sm:$0xff]  ;;  %v6928_v59 = vcombine.low %v818_v52, %v822_v53 }
 0x23e   :  { %v838_v7 = vld [vmem:[#allocation7 + $0xb78] sm:$0xff] }
 0x23f   :  { %5524 = vmatpush1.bf16.msra.mxu0 %v7560_v38  ;;  %v7587_v38 = vld [vmem:[#allocation11 + $0x220] ss:$16 sps:$4 sm:$0xff]  }
 0x240   :  { %5525 = vmatprep.subr.bf16.mxu0 %v7565_v51  ;;  %3842 = vmatpush1.bf16.msra.mxu1 %v6848_v54  ;;  %v7592_v51 = vld [vmem:[#allocation11 + $0x244] ss:$16 sps:$4 sm:$0xff]   ;;  %v6920_v54 = vcombine.low %v810_v44, %v814_v47  ;;  %v7614_v47 = vld [vmem:[#allocation11 + $0x340] ss:$16 sps:$4 sm:$0xff]  }
 0x241   :  { %3843 = vmatprep.subr.bf16.mxu1 %v6857_v56  ;;  %v7595_v56 = vld [vmem:[#allocation11 + $0x264] ss:$16 sps:$4 sm:$0xff]  }
 0x242   :  { %v846_v45 = vld [vmem:[#allocation7 + $0xbb8] sm:$0xff] }
 0x243   :  { %5526 = vmatpush1.bf16.msra.mxu0 %v7563_v55  ;;  %v6929_v55 = vcombine.high %v818_v52, %v822_v53  ;;  %v854_v16 = vld [vmem:[#allocation7 + $0xbf8] sm:$0xff] }
 0x244   :  { %5527 = vmatprep.subr.bf16.mxu0 %v7568_v57  ;;  %3844 = vmatpush1.bf16.msra.mxu1 %v6856_v61  ;;  %v826_v57 = vld [vmem:[#allocation7 + $0xb18] sm:$0xff] }
 0x245   :  { %3845 = vmatprep.subr.bf16.mxu1 %v6865_v6  ;;  %v7593_v61 = vld [vmem:[#allocation11 + $0x260] ss:$16 sps:$4 sm:$0xff]   ;;  %v7598_v6 = vld [vmem:[#allocation11 + $0x284] ss:$16 sps:$4 sm:$0xff]   ;;  %v6936_v8 = vcombine.low %v826_v57, %v830_v58 }
 0x246   :  { %v862_v23 = vld [vmem:[#allocation7 + $0xc38] sm:$0xff] }
 0x247   :  { %5528 = vmatpush1.bf16.msra.mxu0 %v7566_v4  ;;  %v6937_v4 = vcombine.high %v826_v57, %v830_v58  ;;  %v870_v9 = vld [vmem:[#allocation7 + $0xc78] sm:$0xff]  ;;  %v931_v57 = vsub.s32 2, %v8414_v40 }
 0x248   :  { %5529 = vmatprep.subr.bf16.mxu0 %v7571_v5  ;;  %3846 = vmatpush1.bf16.msra.mxu1 %v6864_v1  ;;  %v834_v5 = vld [vmem:[#allocation7 + $0xb58] sm:$0xff] }
 0x249   :  { %3847 = vmatprep.subr.bf16.mxu1 %v6873_v11  ;;  %v7596_v1 = vld [vmem:[#allocation11 + $0x280] ss:$16 sps:$4 sm:$0xff]   ;;  %v7601_v11 = vld [vmem:[#allocation11 + $0x2a4] ss:$16 sps:$4 sm:$0xff]   ;;  %v6944_v49 = vcombine.low %v834_v5, %v838_v7 }
 0x24a   :  { %v874_v62 = vld [vmem:[#allocation7 + $0xc98] sm:$0xff] }
 0x24b   :  { %5530 = vmatpush1.bf16.msra.mxu0 %v7569_v10  ;;  %v6945_v10 = vcombine.high %v834_v5, %v838_v7  ;;  %v7622_v53 = vld [vmem:[#allocation11 + $0x384] ss:$16 sps:$4 sm:$0xff]   ;;  %v932_v7 = vrot.slane %v8541_v63, %v931_v57 }
 0x24c   :  { %5531 = vmatprep.subr.bf16.mxu0 %v7574_v2  ;;  %3848 = vmatpush1.bf16.msra.mxu1 %v6872_v13  ;;  %v842_v2 = vld [vmem:[#allocation7 + $0xb98] sm:$0xff] }
 0x24d   :  { %3849 = vmatprep.subr.bf16.mxu1 %v6881_v14  ;;  %v7599_v13 = vld [vmem:[#allocation11 + $0x2a0] ss:$16 sps:$4 sm:$0xff]   ;;  %v7604_v14 = vld [vmem:[#allocation11 + $0x2c4] ss:$16 sps:$4 sm:$0xff]   ;;  %v6952_v17 = vcombine.low %v842_v2, %v846_v45 }
 0x24f   :  { %5532 = vmatpush1.bf16.msra.mxu0 %v7572_v12  ;;  %v6953_v12 = vcombine.high %v842_v2, %v846_v45  ;;  %v7628_v2 = vld [vmem:[#allocation11 + $0x3c4] ss:$16 sps:$4 sm:$0xff]  }
 0x250   :  { %5533 = vmatprep.subr.bf16.mxu0 %v7577_v15  ;;  %3850 = vmatpush1.bf16.msra.mxu1 %v6880_v18  ;;  %v850_v15 = vld [vmem:[#allocation7 + $0xbd8] sm:$0xff] }
 0x251   :  { %3851 = vmatprep.subr.bf16.mxu1 %v6889_v21  ;;  %v7602_v18 = vld [vmem:[#allocation11 + $0x2c0] ss:$16 sps:$4 sm:$0xff]   ;;  %v7607_v21 = vld [vmem:[#allocation11 + $0x2e4] ss:$16 sps:$4 sm:$0xff]   ;;  %v6960_v24 = vcombine.low %v850_v15, %v854_v16 }
 0x252   :  { %v914_v45 = vld [vmem:[#allocation7 + $0xdd8] sm:$0xff] }
 0x253   :  { %5534 = vmatpush1.bf16.msra.mxu0 %v7575_v20  ;;  %v6961_v20 = vcombine.high %v850_v15, %v854_v16 }
 0x254   :  { %5535 = vmatprep.subr.bf16.mxu0 %v7580_v22  ;;  %3852 = vmatpush1.bf16.msra.mxu1 %v6888_v25  ;;  %v858_v22 = vld [vmem:[#allocation7 + $0xc18] sm:$0xff] }
 0x255   :  { %3853 = vmatprep.subr.bf16.mxu1 %v6897_v27  ;;  %v7605_v25 = vld [vmem:[#allocation11 + $0x2e0] ss:$16 sps:$4 sm:$0xff]   ;;  %v7610_v27 = vld [vmem:[#allocation11 + $0x304] ss:$16 sps:$4 sm:$0xff]   ;;  %v6968_v0 = vcombine.low %v858_v22, %v862_v23 }
 0x257   :  { %5536 = vmatpush1.bf16.msra.mxu0 %v7578_v26  ;;  %v6969_v26 = vcombine.high %v858_v22, %v862_v23  ;;  %v7631_v23 = vld [vmem:[#allocation11 + $0x3e4] ss:$16 sps:$4 sm:$0xff]  }
 0x258   :  { %5537 = vmatprep.subr.bf16.mxu0 %v7583_v28  ;;  %3854 = vmatpush1.bf16.msra.mxu1 %v6896_v29  ;;  %v866_v28 = vld [vmem:[#allocation7 + $0xc58] sm:$0xff] }
 0x259   :  { %3855 = vmatprep.subr.bf16.mxu1 %v6905_v41  ;;  %v7608_v29 = vld [vmem:[#allocation11 + $0x300] ss:$16 sps:$4 sm:$0xff]   ;;  %v7613_v41 = vld [vmem:[#allocation11 + $0x324] ss:$16 sps:$4 sm:$0xff]   ;;  %v6976_v31 = vcombine.low %v866_v28, %v870_v9 }
 0x25b   :  { %5538 = vmatpush1.bf16.msra.mxu0 %v7581_v32  ;;  %v6977_v32 = vcombine.high %v866_v28, %v870_v9 }
 0x25c   :  { %5550 = vmatprep.subr.bf16.mxu0 %v7586_v30  ;;  %3856 = vmatpush1.bf16.msra.mxu1 %v6904_v37  ;;  %v878_v30 = vld [vmem:[#allocation7 + $0xcb8] sm:$0xff] }
 0x25d   :  { %3857 = vmatprep.subr.bf16.mxu1 %v6913_v39  ;;  %v6985_v37 = vcombine.high %v874_v62, %v878_v30  ;;  %v882_v39 = vld [vmem:[#allocation7 + $0xcd8] sm:$0xff]  ;;  %v6984_v44 = vcombine.low %v874_v62, %v878_v30 }
 0x25e   :  { %5540 = vmatmul.mubr.bf16.vlgmr.msra.gmra.mrb[8].mxu0 %v8564_v42  ;;  %v7656_v30 = vld [vmem:[#allocation11 + $0x400] ss:$16 sps:$4 sm:$0xff]  }
 0x25f   :  { %5551 = vmatpush1.bf16.msra.mxu0 %v7584_v34  ;;  %v7616_v34 = vld [vmem:[#allocation11 + $0x344] ss:$16 sps:$4 sm:$0xff]  }
 0x260   :  { %5552 = vmatprep.subr.bf16.mxu0 %v7589_v43  ;;  %3858 = vmatpush1.bf16.msra.mxu1 %v6912_v46  ;;  %v886_v43 = vld [vmem:[#allocation7 + $0xcf8] sm:$0xff] }
 0x261   :  { %3859 = vmatprep.subr.bf16.mxu1 %v6921_v50  ;;  %v6993_v46 = vcombine.high %v882_v39, %v886_v43  ;;  %v894_v50 = vld [vmem:[#allocation7 + $0xd38] sm:$0xff] }
 0x263   :  { %5553 = vmatpush1.bf16.msra.mxu0 %v7587_v38  ;;  %v890_v38 = vld [vmem:[#allocation7 + $0xd18] sm:$0xff] }
 0x264   :  { %5554 = vmatprep.subr.bf16.mxu0 %v7592_v51  ;;  %3860 = vmatpush1.bf16.msra.mxu1 %v6920_v54  ;;  %v7617_v51 = vld [vmem:[#allocation11 + $0x360] ss:$16 sps:$4 sm:$0xff]   ;;  %v7001_v52 = vcombine.high %v890_v38, %v894_v50 }
 0x265   :  { %3861 = vmatprep.subr.bf16.mxu1 %v6929_v55  ;;  %v898_v54 = vld [vmem:[#allocation7 + $0xd58] sm:$0xff]  ;;  %v7000_v55 = vcombine.low %v890_v38, %v894_v50  ;;  %v7641_v38 = vld [vmem:[#allocation11 + $0x68] ss:$16 sps:$4 sm:$0xff]   ;;  %v7646_v50 = vld [vmem:[#allocation11 + $0x8c] ss:$16 sps:$4 sm:$0xff]  }
 0x267   :  { %5555 = vmatpush1.bf16.msra.mxu0 %v7590_v36  ;;  %v902_v36 = vld [vmem:[#allocation7 + $0xd78] sm:$0xff] }
 0x268   :  { %5556 = vmatprep.subr.bf16.mxu0 %v7595_v56  ;;  %3862 = vmatpush1.bf16.msra.mxu1 %v6928_v59  ;;  %v7620_v56 = vld [vmem:[#allocation11 + $0x380] ss:$16 sps:$4 sm:$0xff]   ;;  %v7009_v58 = vcombine.high %v898_v54, %v902_v36  ;;  %v935_v59 = vsub.s32 3, %v8414_v40  ;;  %v7008_v5 = vcombine.low %v898_v54, %v902_v36  ;;  %v7688_v54 = vld [vmem:[#allocation11 + $0x4a4] ss:$16 sps:$4 sm:$0xff]  }
 0x269   :  { %3863 = vmatprep.subr.bf16.mxu1 %v6937_v4  ;;  %v906_v4 = vld [vmem:[#allocation7 + $0xd98] sm:$0xff]  ;;  %v7647_v36 = vld [vmem:[#allocation11 + $0xa8] ss:$16 sps:$4 sm:$0xff]  }
 0x26b   :  { %5557 = vmatpush1.bf16.msra.mxu0 %v7593_v61  ;;  %v7625_v61 = vld [vmem:[#allocation11 + $0x3a4] ss:$16 sps:$4 sm:$0xff]  }
 0x26c   :  { %5558 = vmatprep.subr.bf16.mxu0 %v7598_v6  ;;  %3864 = vmatpush1.bf16.msra.mxu1 %v6936_v8  ;;  %v910_v6 = vld [vmem:[#allocation7 + $0xdb8] sm:$0xff] }
 0x26d   :  { %3865 = vmatprep.subr.bf16.mxu1 %v6945_v10  ;;  %v7623_v8 = vld [vmem:[#allocation11 + $0x3a0] ss:$16 sps:$4 sm:$0xff]  }
 0x26f   :  { %5559 = vmatpush1.bf16.msra.mxu0 %v7596_v1  ;;  %v7017_v1 = vcombine.high %v906_v4, %v910_v6 }
 0x270   :  { %5560 = vmatprep.subr.bf16.mxu0 %v7601_v11  ;;  %3866 = vmatpush1.bf16.msra.mxu1 %v6944_v49  ;;  %v936_v11 = vrot.slane %v8541_v63, %v935_v59  ;;  %v918_v49 = vld [vmem:[#allocation7 + $0xdf8] sm:$0xff] }
 0x271   :  { %3867 = vmatprep.subr.bf16.mxu1 %v6953_v12 }
 0x273   :  { %5561 = vmatpush1.bf16.msra.mxu0 %v7599_v13 }
 0x274   :  { %5562 = vmatprep.subr.bf16.mxu0 %v7604_v14  ;;  %3868 = vmatpush1.bf16.msra.mxu1 %v6952_v17  ;;  %v7016_v14 = vcombine.low %v906_v4, %v910_v6  ;;  %v7655_v4 = vld [vmem:[#allocation11 + $0xec] ss:$16 sps:$4 sm:$0xff]   ;;  %v7692_v6 = vld [vmem:[#allocation11 + $0x4c0] ss:$16 sps:$4 sm:$0xff]  }
 0x275   :  { %3869 = vmatprep.subr.bf16.mxu1 %v6961_v20  ;;  %v7025_v20 = vcombine.high %v914_v45, %v918_v49 }
 0x277   :  { %5563 = vmatpush1.bf16.msra.mxu0 %v7602_v18  ;;  %v7626_v18 = vld [vmem:[#allocation11 + $0x3c0] ss:$16 sps:$4 sm:$0xff]  }
 0x278   :  { %5564 = vmatprep.subr.bf16.mxu0 %v7607_v21  ;;  %3870 = vmatpush1.bf16.msra.mxu1 %v6960_v24 }
 0x279   :  { %3882 = vmatprep.subr.bf16.mxu1 %v6969_v26  ;;  %v7629_v26 = vld [vmem:[#allocation11 + $0x3e0] ss:$16 sps:$4 sm:$0xff]  }
 0x27b   :  { %5565 = vmatpush1.bf16.msra.mxu0 %v7605_v25  ;;  %3872 = vmatmul.mubr.bf16.vlgmr.msra.gmra.mrb[8].mxu1 %v8507_v19  ;;  %v7619_v19 = vld [vmem:[#allocation11 + $0x364] ss:$16 sps:$4 sm:$0xff]   ;;  %v7024_v25 = vcombine.low %v914_v45, %v918_v49  ;;  %v7704_v45 = vld [vmem:[#allocation11 + $0x500] ss:$16 sps:$4 sm:$0xff]  }
 0x27c   :  { %5566 = vmatprep.subr.bf16.mxu0 %v7610_v27  ;;  %3883 = vmatpush1.bf16.msra.mxu1 %v6968_v0  ;;  %v7634_v27 = vld [vmem:[#allocation11 + $0xc] ss:$16 sps:$4 sm:$0xff]   ;;  %v7658_v0 = vld [vmem:[#allocation11 + $0x404] ss:$16 sps:$4 sm:$0xff]  }
 0x27d   :  { %3914 = vmatprep.mubr.bf16.mxu1 %v8249_v33  ;;  %3884 = vmatprep.subr.bf16.mxu1 %v6977_v32  ;;  %v6992_v33 = vcombine.low %v882_v39, %v886_v43  ;;  %v7632_v32 = vld [vmem:[#allocation11 + $0x8] ss:$16 sps:$4 sm:$0xff]   ;;  %v7662_v39 = vld [vmem:[#allocation11 + $0x420] ss:$16 sps:$4 sm:$0xff]   ;;  %v7670_v43 = vld [vmem:[#allocation11 + $0x444] ss:$16 sps:$4 sm:$0xff]  }
 0x27e   :  { %v7712_v49 = vld [vmem:[#allocation11 + $0x524] ss:$16 sps:$4 sm:$0xff]  }
 0x27f   :  { %5567 = vmatpush1.bf16.msra.mxu0 %v7608_v29 }
 0x280   :  { %5568 = vmatprep.subr.bf16.mxu0 %v7613_v41  ;;  %3885 = vmatpush1.bf16.msra.mxu1 %v6976_v31  ;;  %v7637_v41 = vld [vmem:[#allocation11 + $0x2c] ss:$16 sps:$4 sm:$0xff]  }
 0x281   :  { %3886 = vmatprep.subr.bf16.mxu1 %v6985_v37  ;;  %v8044_v31 = vld [vmem:[#allocation20 + $0x18] ss:$28 sps:$4 sm:$0xff]   ;;  %v7635_v37 = vld [vmem:[#allocation11 + $0x28] ss:$16 sps:$4 sm:$0xff]  }
 0x283   :  { %5569 = vmatpush1.bf16.msra.mxu0 %v7611_v35  ;;  %v7664_v35 = vld [vmem:[#allocation11 + $0x424] ss:$16 sps:$4 sm:$0xff]  }
 0x284   :  { %5570 = vmatprep.subr.bf16.mxu0 %v7616_v34  ;;  %3887 = vmatpush1.bf16.msra.mxu1 %v6984_v44  ;;  %v7640_v34 = vld [vmem:[#allocation11 + $0x4c] ss:$16 sps:$4 sm:$0xff]   ;;  %v7638_v44 = vld [vmem:[#allocation11 + $0x48] ss:$16 sps:$4 sm:$0xff]  }
 0x285   :  { %3888 = vmatprep.subr.bf16.mxu1 %v6993_v46  ;;  %v7668_v46 = vld [vmem:[#allocation11 + $0x440] ss:$16 sps:$4 sm:$0xff]  }
 0x287   :  { %5571 = vmatpush1.bf16.msra.mxu0 %v7614_v47  ;;  %v7643_v47 = vld [vmem:[#allocation11 + $0x6c] ss:$16 sps:$4 sm:$0xff]  }
 0x288   :  { %5572 = vmatprep.subr.bf16.mxu0 %v7619_v19  ;;  %3889 = vmatpush1.bf16.msra.mxu1 %v6992_v33  ;;  %v7676_v19 = vld [vmem:[#allocation11 + $0x464] ss:$16 sps:$4 sm:$0xff]  }
 0x289   :  { %3890 = vmatprep.subr.bf16.mxu1 %v7001_v52  ;;  %v7682_v33 = vld [vmem:[#allocation11 + $0x484] ss:$16 sps:$4 sm:$0xff]   ;;  %v7649_v52 = vld [vmem:[#allocation11 + $0xac] ss:$16 sps:$4 sm:$0xff]  }
 0x28b   :  { %5573 = vmatpush1.bf16.msra.mxu0 %v7617_v51  ;;  %v7644_v51 = vld [vmem:[#allocation11 + $0x88] ss:$16 sps:$4 sm:$0xff]  }
 0x28c   :  { %5574 = vmatprep.subr.bf16.mxu0 %v7622_v53  ;;  %3891 = vmatpush1.bf16.msra.mxu1 %v7000_v55  ;;  %v7680_v53 = vld [vmem:[#allocation11 + $0x480] ss:$16 sps:$4 sm:$0xff]   ;;  %v7652_v55 = vld [vmem:[#allocation11 + $0xcc] ss:$16 sps:$4 sm:$0xff]  }
 0x28d   :  { %3892 = vmatprep.subr.bf16.mxu1 %v7009_v58  ;;  %v7694_v58 = vld [vmem:[#allocation11 + $0x4c4] ss:$16 sps:$4 sm:$0xff]  }
 0x28e   :  { %v3572_v10 = vpop.f32.mrb[4].mxu1 }
 0x28f   :  { %5575 = vmatpush1.bf16.msra.mxu0 %v7620_v56  ;;  %v3574_v13 = vpop.f32.mrb[5].mxu1  ;;  %v7416_v15 = vadd.f32 %v3572_v10, %v932_v7  ;;  %v7686_v56 = vld [vmem:[#allocation11 + $0x4a0] ss:$16 sps:$4 sm:$0xff]   ;;  %v7706_v10 = vld [vmem:[#allocation11 + $0x504] ss:$16 sps:$4 sm:$0xff]  }
 0x290   :  { %5576 = vmatprep.subr.bf16.mxu0 %v7625_v61  ;;  %v3576_v12 = vpop.f32.mrb[6].mxu1  ;;  %3893 = vmatpush1.bf16.msra.mxu1 %v7008_v5  ;;  %v7417_v21 = vadd.f32 %v3574_v13, %v936_v11  ;;  %v7650_v61 = vld [vmem:[#allocation11 + $0xc8] ss:$16 sps:$4 sm:$0xff]   ;;  %v7700_v5 = vld [vmem:[#allocation11 + $0x4e4] ss:$16 sps:$4 sm:$0xff]  }
 0x291   :  { %v7418_v16 = vadd.f32 %v3576_v12, %v932_v7  ;;  %v3578_v17 = vpop.f32.mrb[7].mxu1  ;;  %3894 = vmatprep.subr.bf16.mxu1 %v7017_v1  ;;  %v7653_v7 = vld [vmem:[#allocation11 + $0xe8] ss:$16 sps:$4 sm:$0xff]   ;;  %v7698_v1 = vld [vmem:[#allocation11 + $0x4e0] ss:$16 sps:$4 sm:$0xff]  }
 0x292   :  { %v7419_v22 = vadd.f32 %v3578_v17, %v936_v11  ;;  %v7659_v11 = vld [vmem:[#allocation11 + $0x108] ss:$16 sps:$4 sm:$0xff]   ;;  %v7673_v12 = vld [vmem:[#allocation11 + $0x14c] ss:$16 sps:$4 sm:$0xff]  }
 0x293   :  { %5577 = vmatpush1.bf16.msra.mxu0 %v7623_v8  ;;  %v3927_v63 = vpack.c.bf16 %v7418_v16, %v7416_v15  ;;  %v7661_v8 = vld [vmem:[#allocation11 + $0x10c] ss:$16 sps:$4 sm:$0xff]   ;;  %v7665_v13 = vld [vmem:[#allocation11 + $0x128] ss:$16 sps:$4 sm:$0xff]   ;;  %v7718_v15 = vld [vmem:[#allocation11 + $0x544] ss:$16 sps:$4 sm:$0xff]  }
 0x294   :  { %5578 = vmatprep.subr.bf16.mxu0 %v7628_v2  ;;  %v3928_v24 = vpack.c.bf16 %v7419_v22, %v7417_v21  ;;  %3895 = vmatpush1.bf16.msra.mxu1 %v7016_v14  ;;  %v7667_v2 = vld [vmem:[#allocation11 + $0x12c] ss:$16 sps:$4 sm:$0xff]   ;;  %v7710_v14 = vld [vmem:[#allocation11 + $0x520] ss:$16 sps:$4 sm:$0xff]   ;;  %v7671_v16 = vld [vmem:[#allocation11 + $0x148] ss:$16 sps:$4 sm:$0xff]  }
 0x295   :  { %3896 = vmatprep.subr.bf16.mxu1 %v7025_v20  ;;  %v3935_v28 = vmul.bf16 1045249613, %v3927_v63  ;;  %v7679_v17 = vld [vmem:[#allocation11 + $0x16c] ss:$16 sps:$4 sm:$0xff]   ;;  %v7724_v20 = vld [vmem:[#allocation11 + $0x564] ss:$16 sps:$4 sm:$0xff]  }
 0x296   :  { %v3936_v9 = vmul.bf16 1045249613, %v3928_v24  ;;  %v7677_v21 = vld [vmem:[#allocation11 + $0x168] ss:$16 sps:$4 sm:$0xff]   ;;  %v7685_v22 = vld [vmem:[#allocation11 + $0x18c] ss:$16 sps:$4 sm:$0xff]  }
 0x297   :  { %5579 = vmatpush1.bf16.msra.mxu0 %v7626_v18  ;;  %v8579_v62 = vmax.bf16 %v3935_v28, %v3927_v63  ;;  %v7716_v18 = vld [vmem:[#allocation11 + $0x540] ss:$16 sps:$4 sm:$0xff]   ;;  %v7730_v63 = vld [vmem:[#allocation11 + $0x584] ss:$16 sps:$4 sm:$0xff]   ;;  %v7689_v28 = vld [vmem:[#allocation11 + $0x1a8] ss:$16 sps:$4 sm:$0xff]  }
 0x298   :  { %5580 = vmatprep.subr.bf16.mxu0 %v7631_v23  ;;  %3897 = vmatpush1.bf16.msra.mxu1 %v7024_v25  ;;  %v8577_v29 = vmax.bf16 %v3936_v9, %v3928_v24  ;;  %v7722_v23 = vld [vmem:[#allocation11 + $0x560] ss:$16 sps:$4 sm:$0xff]   ;;  %v7683_v24 = vld [vmem:[#allocation11 + $0x188] ss:$16 sps:$4 sm:$0xff]   ;;  %v7691_v25 = vld [vmem:[#allocation11 + $0x1ac] ss:$16 sps:$4 sm:$0xff]  }
 0x299   :  { %5679 = vmatprep.subr.bf16.mxu1 %v7634_v27  ;;  %v7736_v27 = vld [vmem:[#allocation11 + $0x5a4] ss:$16 sps:$4 sm:$0xff]   ;;  %v7697_v9 = vld [vmem:[#allocation11 + $0x1cc] ss:$16 sps:$4 sm:$0xff]  }
 0x29a   :  { %5582 = vmatprep.mubr.bf16.mxu0 %v8577_v29 }
 0x29b   :  { %5581 = vmatpush1.bf16.msra.mxu0 %v7629_v26  ;;  %3915 = vmatmul.mubr.bf16.vlgmr.msra.gmra.mrb[8].mxu1 %v8044_v31  ;;  %v7728_v26 = vld [vmem:[#allocation11 + $0x580] ss:$16 sps:$4 sm:$0xff]  }
 0x29c   :  { %5593 = vmatprep.subr.bf16.mxu0 %v7658_v0  ;;  %5680 = vmatpush1.bf16.msra.mxu1 %v7632_v32  ;;  %v7734_v0 = vld [vmem:[#allocation11 + $0x5a0] ss:$16 sps:$4 sm:$0xff]   ;;  %v7742_v32 = vld [vmem:[#allocation11 + $0x5c4] ss:$16 sps:$4 sm:$0xff]  }
 0x29d   :  { %5711 = vmatprep.mubr.bf16.mxu1 %v8556_v60  ;;  %5681 = vmatprep.subr.bf16.mxu1 %v7637_v41  ;;  %v7674_v60 = vld [vmem:[#allocation11 + $0x460] ss:$16 sps:$4 sm:$0xff]   ;;  %v7695_v41 = vld [vmem:[#allocation11 + $0x1c8] ss:$16 sps:$4 sm:$0xff]  }
 0x29e   :  { %5583 = vmatmul.mubr.bf16.vlgmr.msra.gmra.mrb[8].mxu0 %v8579_v62  ;;  %v7740_v31 = vld [vmem:[#allocation11 + $0x5c0] ss:$16 sps:$4 sm:$0xff]  }
 0x29f   :  { %5594 = vmatpush1.bf16.msra.mxu0 %v7656_v30  ;;  %v7703_v30 = vld [vmem:[#allocation11 + $0x1ec] ss:$16 sps:$4 sm:$0xff]  }
 0x2a0   :  { %5595 = vmatprep.subr.bf16.mxu0 %v7664_v35  ;;  %5682 = vmatpush1.bf16.msra.mxu1 %v7635_v37  ;;  %v7748_v35 = vld [vmem:[#allocation11 + $0x5e4] ss:$16 sps:$4 sm:$0xff]   ;;  %v7701_v37 = vld [vmem:[#allocation11 + $0x1e8] ss:$16 sps:$4 sm:$0xff]  }
 0x2a1   :  { %5683 = vmatprep.subr.bf16.mxu1 %v7640_v34  ;;  %v7709_v34 = vld [vmem:[#allocation11 + $0x20c] ss:$16 sps:$4 sm:$0xff]  }
 0x2a3   :  { %5596 = vmatpush1.bf16.msra.mxu0 %v7662_v39  ;;  %v7746_v39 = vld [vmem:[#allocation11 + $0x5e0] ss:$16 sps:$4 sm:$0xff]  }
 0x2a4   :  { %5597 = vmatprep.subr.bf16.mxu0 %v7670_v43  ;;  %5684 = vmatpush1.bf16.msra.mxu1 %v7638_v44  ;;  %v7802_v43 = vld [vmem:[#allocation11 + $0x604] ss:$16 sps:$4 sm:$0xff]   ;;  %v7707_v44 = vld [vmem:[#allocation11 + $0x208] ss:$16 sps:$4 sm:$0xff]  }
 0x2a5   :  { %5685 = vmatprep.subr.bf16.mxu1 %v7643_v47  ;;  %v7715_v47 = vld [vmem:[#allocation11 + $0x22c] ss:$16 sps:$4 sm:$0xff]  }
 0x2a7   :  { %5598 = vmatpush1.bf16.msra.mxu0 %v7668_v46  ;;  %v7713_v46 = vld [vmem:[#allocation11 + $0x228] ss:$16 sps:$4 sm:$0xff]  }
 0x2a8   :  { %5599 = vmatprep.subr.bf16.mxu0 %v7676_v19  ;;  %5686 = vmatpush1.bf16.msra.mxu1 %v7641_v38  ;;  %v7721_v19 = vld [vmem:[#allocation11 + $0x24c] ss:$16 sps:$4 sm:$0xff]   ;;  %v7719_v38 = vld [vmem:[#allocation11 + $0x248] ss:$16 sps:$4 sm:$0xff]  }
 0x2a9   :  { %5687 = vmatprep.subr.bf16.mxu1 %v7646_v50  ;;  %v7727_v50 = vld [vmem:[#allocation11 + $0x26c] ss:$16 sps:$4 sm:$0xff]  }
 0x2ab   :  { %5600 = vmatpush1.bf16.msra.mxu0 %v7674_v60  ;;  %v7725_v60 = vld [vmem:[#allocation11 + $0x268] ss:$16 sps:$4 sm:$0xff]  }
 0x2ac   :  { %5601 = vmatprep.subr.bf16.mxu0 %v7682_v33  ;;  %5688 = vmatpush1.bf16.msra.mxu1 %v7644_v51  ;;  %v7733_v33 = vld [vmem:[#allocation11 + $0x28c] ss:$16 sps:$4 sm:$0xff]   ;;  %v7731_v51 = vld [vmem:[#allocation11 + $0x288] ss:$16 sps:$4 sm:$0xff]  }
 0x2ad   :  { %5689 = vmatprep.subr.bf16.mxu1 %v7649_v52  ;;  %v7739_v52 = vld [vmem:[#allocation11 + $0x2ac] ss:$16 sps:$4 sm:$0xff]  }
 0x2af   :  { %5602 = vmatpush1.bf16.msra.mxu0 %v7680_v53  ;;  %v943_v53 = vsub.s32 5, %v8414_v40 }
 0x2b0   :  { %5603 = vmatprep.subr.bf16.mxu0 %v7688_v54  ;;  %5690 = vmatpush1.bf16.msra.mxu1 %v7647_v36  ;;  %v7745_v54 = vld [vmem:[#allocation11 + $0x2cc] ss:$16 sps:$4 sm:$0xff]  }
 0x2b1   :  { %5691 = vmatprep.subr.bf16.mxu1 %v7652_v55  ;;  %v8588_v36 = vld [vmem:[#allocation9] sm:$0xff] }
 0x2b3   :  { %5604 = vmatpush1.bf16.msra.mxu0 %v7686_v56 }
 0x2b4   :  { %5605 = vmatprep.subr.bf16.mxu0 %v7694_v58  ;;  %5692 = vmatpush1.bf16.msra.mxu1 %v7650_v61  ;;  %v944_v58 = vrot.slane %v8588_v36, %v943_v53  ;;  %v7848_v53 = vld [vmem:[#allocation11 + $0x700] ss:$16 sps:$4 sm:$0xff]  }
 0x2b5   :  { %5693 = vmatprep.subr.bf16.mxu1 %v7655_v4  ;;  %v7743_v4 = vld [vmem:[#allocation11 + $0x2c8] ss:$16 sps:$4 sm:$0xff]  }
 0x2b7   :  { %5606 = vmatpush1.bf16.msra.mxu0 %v7692_v6 }
 0x2b8   :  { %5607 = vmatprep.subr.bf16.mxu0 %v7700_v5  ;;  %5694 = vmatpush1.bf16.msra.mxu1 %v7653_v7  ;;  %v7751_v5 = vld [vmem:[#allocation11 + $0x2ec] ss:$16 sps:$4 sm:$0xff]  }
 0x2b9   :  { %5695 = vmatprep.subr.bf16.mxu1 %v7661_v8 }
 0x2bb   :  { %5608 = vmatpush1.bf16.msra.mxu0 %v7698_v1 }
 0x2bc   :  { %5609 = vmatprep.subr.bf16.mxu0 %v7706_v10  ;;  %5696 = vmatpush1.bf16.msra.mxu1 %v7659_v11 }
 0x2bd   :  { %5697 = vmatprep.subr.bf16.mxu1 %v7667_v2 }
 0x2bf   :  { %5610 = vmatpush1.bf16.msra.mxu0 %v7704_v45  ;;  %v7749_v45 = vld [vmem:[#allocation11 + $0x2e8] ss:$16 sps:$4 sm:$0xff]  }
 0x2c0   :  { %5611 = vmatprep.subr.bf16.mxu0 %v7712_v49  ;;  %5698 = vmatpush1.bf16.msra.mxu1 %v7665_v13  ;;  %v7754_v13 = vld [vmem:[#allocation11 + $0x30c] ss:$16 sps:$4 sm:$0xff]  }
 0x2c1   :  { %5699 = vmatprep.subr.bf16.mxu1 %v7673_v12 }
 0x2c3   :  { %5612 = vmatpush1.bf16.msra.mxu0 %v7710_v14 }
 0x2c4   :  { %5613 = vmatprep.subr.bf16.mxu0 %v7718_v15  ;;  %5700 = vmatpush1.bf16.msra.mxu1 %v7671_v16  ;;  %v7752_v15 = vld [vmem:[#allocation11 + $0x308] ss:$16 sps:$4 sm:$0xff]  }
 0x2c5   :  { %5701 = vmatprep.subr.bf16.mxu1 %v7679_v17  ;;  %v7757_v17 = vld [vmem:[#allocation11 + $0x32c] ss:$16 sps:$4 sm:$0xff]  }
 0x2c7   :  { %5614 = vmatpush1.bf16.msra.mxu0 %v7716_v18  ;;  %v7800_v18 = vld [vmem:[#allocation11 + $0x600] ss:$16 sps:$4 sm:$0xff]  }
 0x2c8   :  { %5615 = vmatprep.subr.bf16.mxu0 %v7724_v20  ;;  %5702 = vmatpush1.bf16.msra.mxu1 %v7677_v21  ;;  %v7808_v21 = vld [vmem:[#allocation11 + $0x624] ss:$16 sps:$4 sm:$0xff]  }
 0x2c9   :  { %5703 = vmatprep.subr.bf16.mxu1 %v7685_v22  ;;  %v7755_v22 = vld [vmem:[#allocation11 + $0x328] ss:$16 sps:$4 sm:$0xff]  }
 0x2cb   :  { %5616 = vmatpush1.bf16.msra.mxu0 %v7722_v23  ;;  %v7760_v23 = vld [vmem:[#allocation11 + $0x34c] ss:$16 sps:$4 sm:$0xff]  }
 0x2cc   :  { %5617 = vmatprep.subr.bf16.mxu0 %v7730_v63  ;;  %5704 = vmatpush1.bf16.msra.mxu1 %v7683_v24  ;;  %v7806_v63 = vld [vmem:[#allocation11 + $0x620] ss:$16 sps:$4 sm:$0xff]   ;;  %v7814_v24 = vld [vmem:[#allocation11 + $0x644] ss:$16 sps:$4 sm:$0xff]  }
 0x2cd   :  { %5705 = vmatprep.subr.bf16.mxu1 %v7691_v25  ;;  %v7758_v25 = vld [vmem:[#allocation11 + $0x348] ss:$16 sps:$4 sm:$0xff]  }
 0x2cf   :  { %5618 = vmatpush1.bf16.msra.mxu0 %v7728_v26  ;;  %v7763_v26 = vld [vmem:[#allocation11 + $0x36c] ss:$16 sps:$4 sm:$0xff]  }
 0x2d0   :  { %5619 = vmatprep.subr.bf16.mxu0 %v7736_v27  ;;  %5706 = vmatpush1.bf16.msra.mxu1 %v7689_v28  ;;  %v7812_v27 = vld [vmem:[#allocation11 + $0x640] ss:$16 sps:$4 sm:$0xff]   ;;  %v7820_v28 = vld [vmem:[#allocation11 + $0x664] ss:$16 sps:$4 sm:$0xff]  }
 0x2d1   :  { %5707 = vmatprep.subr.bf16.mxu1 %v7697_v9  ;;  %v7761_v9 = vld [vmem:[#allocation11 + $0x368] ss:$16 sps:$4 sm:$0xff]  }
 0x2d3   :  { %5620 = vmatpush1.bf16.msra.mxu0 %v7734_v0  ;;  %v7766_v0 = vld [vmem:[#allocation11 + $0x38c] ss:$16 sps:$4 sm:$0xff]  }
 0x2d4   :  { %5621 = vmatprep.subr.bf16.mxu0 %v7742_v32  ;;  %5708 = vmatpush1.bf16.msra.mxu1 %v7695_v41  ;;  %v7818_v32 = vld [vmem:[#allocation11 + $0x660] ss:$16 sps:$4 sm:$0xff]   ;;  %v7826_v41 = vld [vmem:[#allocation11 + $0x684] ss:$16 sps:$4 sm:$0xff]  }
 0x2d5   :  { %5709 = vmatprep.subr.bf16.mxu1 %v7703_v30  ;;  %v7764_v30 = vld [vmem:[#allocation11 + $0x388] ss:$16 sps:$4 sm:$0xff]  }
 0x2d7   :  { %5622 = vmatpush1.bf16.msra.mxu0 %v7740_v31  ;;  %v7769_v31 = vld [vmem:[#allocation11 + $0x3ac] ss:$16 sps:$4 sm:$0xff]  }
 0x2d8   :  { %5623 = vmatprep.subr.bf16.mxu0 %v7748_v35  ;;  %5710 = vmatpush1.bf16.msra.mxu1 %v7701_v37  ;;  %v7824_v35 = vld [vmem:[#allocation11 + $0x680] ss:$16 sps:$4 sm:$0xff]   ;;  %v7832_v37 = vld [vmem:[#allocation11 + $0x6a4] ss:$16 sps:$4 sm:$0xff]  }
 0x2d9   :  { %5722 = vmatprep.subr.bf16.mxu1 %v7709_v34  ;;  %v7767_v34 = vld [vmem:[#allocation11 + $0x3a8] ss:$16 sps:$4 sm:$0xff]  }
 0x2db   :  { %5624 = vmatpush1.bf16.msra.mxu0 %v7746_v39  ;;  %5712 = vmatmul.mubr.bf16.vlgmr.msra.gmra.mrb[12].mxu1 %v8564_v42  ;;  %v939_v42 = vsub.s32 4, %v8414_v40  ;;  %v7772_v39 = vld [vmem:[#allocation11 + $0x3cc] ss:$16 sps:$4 sm:$0xff]  }
 0x2dc   :  { %5636 = vmatprep.subr.bf16.mxu0 %v7802_v43  ;;  %5723 = vmatpush1.bf16.msra.mxu1 %v7707_v44  ;;  %v7830_v43 = vld [vmem:[#allocation11 + $0x6a0] ss:$16 sps:$4 sm:$0xff]   ;;  %v7838_v44 = vld [vmem:[#allocation11 + $0x6c4] ss:$16 sps:$4 sm:$0xff]  }
 0x2dd   :  { %5754 = vmatprep.mubr.bf16.mxu1 %v8577_v29  ;;  %5724 = vmatprep.subr.bf16.mxu1 %v7715_v47  ;;  %v7737_v29 = vld [vmem:[#allocation11 + $0x2a8] ss:$16 sps:$4 sm:$0xff]   ;;  %v940_v55 = vrot.slane %v8588_v36, %v939_v42  ;;  %v7781_v42 = vld [vmem:[#allocation11 + $0x42c] ss:$16 sps:$4 sm:$0xff]  }
 0x2de   :  { %v7770_v47 = vld [vmem:[#allocation11 + $0x3c8] ss:$16 sps:$4 sm:$0xff]  }
 0x2e0   :  { %5725 = vmatpush1.bf16.msra.mxu1 %v7713_v46  ;;  %v7775_v46 = vld [vmem:[#allocation11 + $0x3ec] ss:$16 sps:$4 sm:$0xff]  }
 0x2e1   :  { %5726 = vmatprep.subr.bf16.mxu1 %v7721_v19  ;;  %v7836_v19 = vld [vmem:[#allocation11 + $0x6c0] ss:$16 sps:$4 sm:$0xff]  }
 0x2e4   :  { %5727 = vmatpush1.bf16.msra.mxu1 %v7719_v38  ;;  %v7844_v38 = vld [vmem:[#allocation11 + $0x6e4] ss:$16 sps:$4 sm:$0xff]  }
 0x2e5   :  { %5728 = vmatprep.subr.bf16.mxu1 %v7727_v50  ;;  %v7773_v50 = vld [vmem:[#allocation11 + $0x3e8] ss:$16 sps:$4 sm:$0xff]  }
 0x2e8   :  { %5729 = vmatpush1.bf16.msra.mxu1 %v7725_v60  ;;  %v7778_v60 = vld [vmem:[#allocation11 + $0x40c] ss:$16 sps:$4 sm:$0xff]  }
 0x2e9   :  { %5730 = vmatprep.subr.bf16.mxu1 %v7733_v33  ;;  %v7842_v33 = vld [vmem:[#allocation11 + $0x6e0] ss:$16 sps:$4 sm:$0xff]  }
 0x2ec   :  { %5731 = vmatpush1.bf16.msra.mxu1 %v7731_v51  ;;  %v7850_v51 = vld [vmem:[#allocation11 + $0x704] ss:$16 sps:$4 sm:$0xff]  }
 0x2ed   :  { %5732 = vmatprep.subr.bf16.mxu1 %v7739_v52  ;;  %v7776_v52 = vld [vmem:[#allocation11 + $0x408] ss:$16 sps:$4 sm:$0xff]  }
 0x2f0   :  { %5733 = vmatpush1.bf16.msra.mxu1 %v7737_v29  ;;  %v7856_v29 = vld [vmem:[#allocation11 + $0x724] ss:$16 sps:$4 sm:$0xff]  }
 0x2f1   :  { %v3744_v56 = vpop.f32.mrb[4].mxu0  ;;  %5734 = vmatprep.subr.bf16.mxu1 %v7745_v54  ;;  %v7779_v54 = vld [vmem:[#allocation11 + $0x428] ss:$16 sps:$4 sm:$0xff]  }
 0x2f2   :  { %v3746_v61 = vpop.f32.mrb[5].mxu0  ;;  %v7420_v7 = vadd.f32 %v3744_v56, %v940_v55  ;;  %v7854_v56 = vld [vmem:[#allocation11 + $0x720] ss:$16 sps:$4 sm:$0xff]  }
 0x2f3   :  { %v3748_v6 = vpop.f32.mrb[6].mxu0  ;;  %v7421_v10 = vadd.f32 %v3746_v61, %v944_v58  ;;  %v7782_v61 = vld [vmem:[#allocation11 + $0x448] ss:$16 sps:$4 sm:$0xff]  }
 0x2f4   :  { %v7422_v8 = vadd.f32 %v3748_v6, %v940_v55  ;;  %v3750_v1 = vpop.f32.mrb[7].mxu0  ;;  %5735 = vmatpush1.bf16.msra.mxu1 %v7743_v4  ;;  %v7784_v55 = vld [vmem:[#allocation11 + $0x44c] ss:$16 sps:$4 sm:$0xff]   ;;  %v7860_v6 = vld [vmem:[#allocation11 + $0x740] ss:$16 sps:$4 sm:$0xff]  }
 0x2f5   :  { %v7423_v11 = vadd.f32 %v3750_v1, %v944_v58  ;;  %5736 = vmatprep.subr.bf16.mxu1 %v7751_v5  ;;  %v7862_v58 = vld [vmem:[#allocation11 + $0x744] ss:$16 sps:$4 sm:$0xff]   ;;  %v7787_v4 = vld [vmem:[#allocation11 + $0x46c] ss:$16 sps:$4 sm:$0xff]  }
 0x2f6   :  { %v3929_v2 = vpack.c.bf16 %v7422_v8, %v7420_v7  ;;  %v7868_v5 = vld [vmem:[#allocation11 + $0x764] ss:$16 sps:$4 sm:$0xff]   ;;  %v7790_v7 = vld [vmem:[#allocation11 + $0x48c] ss:$16 sps:$4 sm:$0xff]   ;;  %v7866_v8 = vld [vmem:[#allocation11 + $0x760] ss:$16 sps:$4 sm:$0xff]  }
 0x2f7   :  { %v3930_v49 = vpack.c.bf16 %v7423_v11, %v7421_v10  ;;  %v7874_v1 = vld [vmem:[#allocation11 + $0x784] ss:$16 sps:$4 sm:$0xff]   ;;  %v7788_v10 = vld [vmem:[#allocation11 + $0x488] ss:$16 sps:$4 sm:$0xff]   ;;  %v7793_v11 = vld [vmem:[#allocation11 + $0x4ac] ss:$16 sps:$4 sm:$0xff]  }
 0x2f8   :  { %v3937_v12 = vmul.bf16 1045249613, %v3929_v2  ;;  %5737 = vmatpush1.bf16.msra.mxu1 %v7749_v45  ;;  %v7880_v45 = vld [vmem:[#allocation11 + $0x7a4] ss:$16 sps:$4 sm:$0xff]  }
 0x2f9   :  { %v3938_v14 = vmul.bf16 1045249613, %v3930_v49  ;;  %5738 = vmatprep.subr.bf16.mxu1 %v7754_v13  ;;  %v7796_v13 = vld [vmem:[#allocation11 + $0x4cc] ss:$16 sps:$4 sm:$0xff]  }
 0x2fa   :  { %v8594_v20 = vmax.bf16 %v3937_v12, %v3929_v2  ;;  %v7872_v2 = vld [vmem:[#allocation11 + $0x780] ss:$16 sps:$4 sm:$0xff]  }
 0x2fb   :  { %v8592_v16 = vmax.bf16 %v3938_v14, %v3930_v49  ;;  %v7791_v49 = vld [vmem:[#allocation11 + $0x4a8] ss:$16 sps:$4 sm:$0xff]   ;;  %v7878_v12 = vld [vmem:[#allocation11 + $0x7a0] ss:$16 sps:$4 sm:$0xff]   ;;  %v7886_v14 = vld [vmem:[#allocation11 + $0x7c4] ss:$16 sps:$4 sm:$0xff]  }
 0x2fc   :  { %5739 = vmatpush1.bf16.msra.mxu1 %v7752_v15  ;;  %v7794_v15 = vld [vmem:[#allocation11 + $0x4c8] ss:$16 sps:$4 sm:$0xff]  }
 0x2fd   :  { %5625 = vmatprep.mubr.bf16.mxu0 %v8592_v16  ;;  %5740 = vmatprep.subr.bf16.mxu1 %v7757_v17  ;;  %v7884_v17 = vld [vmem:[#allocation11 + $0x7c0] ss:$16 sps:$4 sm:$0xff]  }
 0x2fe   :  { %5626 = vmatmul.mubr.bf16.vlgmr.msra.gmra.mrb[8].mxu0 %v8594_v20 }
 0x2ff   :  { %5637 = vmatpush1.bf16.msra.mxu0 %v7800_v18  ;;  %v7892_v18 = vld [vmem:[#allocation11 + $0x7e4] ss:$16 sps:$4 sm:$0xff]  }
 0x300   :  { %5638 = vmatprep.subr.bf16.mxu0 %v7808_v21  ;;  %5741 = vmatpush1.bf16.msra.mxu1 %v7755_v22  ;;  %v7797_v21 = vld [vmem:[#allocation11 + $0x4e8] ss:$16 sps:$4 sm:$0xff]   ;;  %v7805_v22 = vld [vmem:[#allocation11 + $0x50c] ss:$16 sps:$4 sm:$0xff]  }
 0x301   :  { %5742 = vmatprep.subr.bf16.mxu1 %v7760_v23  ;;  %v7890_v23 = vld [vmem:[#allocation11 + $0x7e0] ss:$16 sps:$4 sm:$0xff]  }
 0x303   :  { %5639 = vmatpush1.bf16.msra.mxu0 %v7806_v63  ;;  %v7922_v63 = vld [vmem:[#allocation14 + $0x4] ss:$8 sps:$4 sm:$0xff]  }
 0x304   :  { %5640 = vmatprep.subr.bf16.mxu0 %v7814_v24  ;;  %5743 = vmatpush1.bf16.msra.mxu1 %v7758_v25  ;;  %v7803_v24 = vld [vmem:[#allocation11 + $0x508] ss:$16 sps:$4 sm:$0xff]   ;;  %v7811_v25 = vld [vmem:[#allocation11 + $0x52c] ss:$16 sps:$4 sm:$0xff]  }
 0x305   :  { %5744 = vmatprep.subr.bf16.mxu1 %v7763_v26  ;;  %v7809_v26 = vld [vmem:[#allocation11 + $0x528] ss:$16 sps:$4 sm:$0xff]  }
 0x307   :  { %5641 = vmatpush1.bf16.msra.mxu0 %v7812_v27  ;;  %v7817_v27 = vld [vmem:[#allocation11 + $0x54c] ss:$16 sps:$4 sm:$0xff]  }
 0x308   :  { %5642 = vmatprep.subr.bf16.mxu0 %v7820_v28  ;;  %5745 = vmatpush1.bf16.msra.mxu1 %v7761_v9  ;;  %v7815_v28 = vld [vmem:[#allocation11 + $0x548] ss:$16 sps:$4 sm:$0xff]   ;;  %v7823_v9 = vld [vmem:[#allocation11 + $0x56c] ss:$16 sps:$4 sm:$0xff]  }
 0x309   :  { %5746 = vmatprep.subr.bf16.mxu1 %v7766_v0  ;;  %v7821_v0 = vld [vmem:[#allocation11 + $0x568] ss:$16 sps:$4 sm:$0xff]  }
 0x30b   :  { %5643 = vmatpush1.bf16.msra.mxu0 %v7818_v32  ;;  %v7829_v32 = vld [vmem:[#allocation11 + $0x58c] ss:$16 sps:$4 sm:$0xff]  }
 0x30c   :  { %5644 = vmatprep.subr.bf16.mxu0 %v7826_v41  ;;  %5747 = vmatpush1.bf16.msra.mxu1 %v7764_v30  ;;  %v7827_v41 = vld [vmem:[#allocation11 + $0x588] ss:$16 sps:$4 sm:$0xff]   ;;  %v7835_v30 = vld [vmem:[#allocation11 + $0x5ac] ss:$16 sps:$4 sm:$0xff]  }
 0x30d   :  { %5748 = vmatprep.subr.bf16.mxu1 %v7769_v31  ;;  %v7833_v31 = vld [vmem:[#allocation11 + $0x5a8] ss:$16 sps:$4 sm:$0xff]  }
 0x30f   :  { %5645 = vmatpush1.bf16.msra.mxu0 %v7824_v35  ;;  %v7841_v35 = vld [vmem:[#allocation11 + $0x5cc] ss:$16 sps:$4 sm:$0xff]  }
 0x310   :  { %5646 = vmatprep.subr.bf16.mxu0 %v7832_v37  ;;  %5749 = vmatpush1.bf16.msra.mxu1 %v7767_v34  ;;  %v7839_v37 = vld [vmem:[#allocation11 + $0x5c8] ss:$16 sps:$4 sm:$0xff]   ;;  %v7847_v34 = vld [vmem:[#allocation11 + $0x5ec] ss:$16 sps:$4 sm:$0xff]  }
 0x311   :  { %5750 = vmatprep.subr.bf16.mxu1 %v7772_v39  ;;  %v7845_v39 = vld [vmem:[#allocation11 + $0x5e8] ss:$16 sps:$4 sm:$0xff]  }
 0x313   :  { %5647 = vmatpush1.bf16.msra.mxu0 %v7830_v43  ;;  %v7853_v43 = vld [vmem:[#allocation11 + $0x60c] ss:$16 sps:$4 sm:$0xff]  }
 0x314   :  { %5648 = vmatprep.subr.bf16.mxu0 %v7838_v44  ;;  %5751 = vmatpush1.bf16.msra.mxu1 %v7770_v47  ;;  %v7851_v44 = vld [vmem:[#allocation11 + $0x608] ss:$16 sps:$4 sm:$0xff]   ;;  %v7859_v47 = vld [vmem:[#allocation11 + $0x62c] ss:$16 sps:$4 sm:$0xff]  }
 0x315   :  { %5752 = vmatprep.subr.bf16.mxu1 %v7775_v46  ;;  %v7857_v46 = vld [vmem:[#allocation11 + $0x628] ss:$16 sps:$4 sm:$0xff]  }
 0x317   :  { %5649 = vmatpush1.bf16.msra.mxu0 %v7836_v19  ;;  %v7865_v19 = vld [vmem:[#allocation11 + $0x64c] ss:$16 sps:$4 sm:$0xff]  }
 0x318   :  { %5650 = vmatprep.subr.bf16.mxu0 %v7844_v38  ;;  %5753 = vmatpush1.bf16.msra.mxu1 %v7773_v50  ;;  %v7863_v38 = vld [vmem:[#allocation11 + $0x648] ss:$16 sps:$4 sm:$0xff]   ;;  %v7871_v50 = vld [vmem:[#allocation11 + $0x66c] ss:$16 sps:$4 sm:$0xff]  }
 0x319   :  { %5765 = vmatprep.subr.bf16.mxu1 %v7778_v60  ;;  %v7869_v60 = vld [vmem:[#allocation11 + $0x668] ss:$16 sps:$4 sm:$0xff]  }
 0x31b   :  { %5651 = vmatpush1.bf16.msra.mxu0 %v7842_v33  ;;  %5755 = vmatmul.mubr.bf16.vlgmr.msra.gmra.mrb[12].mxu1 %v8579_v62  ;;  %v7785_v62 = vld [vmem:[#allocation11 + $0x468] ss:$16 sps:$4 sm:$0xff]   ;;  %v7877_v33 = vld [vmem:[#allocation11 + $0x68c] ss:$16 sps:$4 sm:$0xff]  }
 0x31c   :  { %5652 = vmatprep.subr.bf16.mxu0 %v7850_v51  ;;  %5766 = vmatpush1.bf16.msra.mxu1 %v7776_v52  ;;  %v7875_v51 = vld [vmem:[#allocation11 + $0x688] ss:$16 sps:$4 sm:$0xff]   ;;  %v947_v52 = vsub.s32 6, %v8414_v40 }
 0x31d   :  { %5797 = vmatprep.mubr.bf16.mxu1 %v8592_v16  ;;  %5767 = vmatprep.subr.bf16.mxu1 %v7781_v42  ;;  %v7799_v16 = vld [vmem:[#allocation11 + $0x4ec] ss:$16 sps:$4 sm:$0xff]  }
 0x31e   :  { %v7883_v42 = vld [vmem:[#allocation11 + $0x6ac] ss:$16 sps:$4 sm:$0xff]  }
 0x31f   :  { %5653 = vmatpush1.bf16.msra.mxu0 %v7848_v53  ;;  %v7881_v53 = vld [vmem:[#allocation11 + $0x6a8] ss:$16 sps:$4 sm:$0xff]  }
 0x320   :  { %5654 = vmatprep.subr.bf16.mxu0 %v7856_v29  ;;  %5768 = vmatpush1.bf16.msra.mxu1 %v7779_v54  ;;  %v948_v29 = vrot.slane %v8588_v36, %v947_v52  ;;  %v7889_v54 = vld [vmem:[#allocation11 + $0x6cc] ss:$16 sps:$4 sm:$0xff]   ;;  %v7952_v52 = vld [vmem:[#allocation14 + $0xa4] ss:$8 sps:$4 sm:$0xff]  }
 0x321   :  { %5769 = vmatprep.subr.bf16.mxu1 %v7784_v55 }
 0x323   :  { %5655 = vmatpush1.bf16.msra.mxu0 %v7854_v56 }
 0x324   :  { %5656 = vmatprep.subr.bf16.mxu0 %v7862_v58  ;;  %5770 = vmatpush1.bf16.msra.mxu1 %v7782_v61 }
 0x325   :  { %5771 = vmatprep.subr.bf16.mxu1 %v7787_v4  ;;  %v7887_v4 = vld [vmem:[#allocation11 + $0x6c8] ss:$16 sps:$4 sm:$0xff]  }
 0x327   :  { %5657 = vmatpush1.bf16.msra.mxu0 %v7860_v6 }
 0x328   :  { %5658 = vmatprep.subr.bf16.mxu0 %v7868_v5  ;;  %5772 = vmatpush1.bf16.msra.mxu1 %v7785_v62 }
 0x329   :  { %5773 = vmatprep.subr.bf16.mxu1 %v7790_v7  ;;  %v7895_v7 = vld [vmem:[#allocation11 + $0x6ec] ss:$16 sps:$4 sm:$0xff]  }
 0x32b   :  { %5659 = vmatpush1.bf16.msra.mxu0 %v7866_v8 }
 0x32c   :  { %5660 = vmatprep.subr.bf16.mxu0 %v7874_v1  ;;  %5774 = vmatpush1.bf16.msra.mxu1 %v7788_v10 }
 0x32d   :  { %5775 = vmatprep.subr.bf16.mxu1 %v7793_v11 }
 0x32f   :  { %5661 = vmatpush1.bf16.msra.mxu0 %v7872_v2  ;;  %v7893_v2 = vld [vmem:[#allocation11 + $0x6e8] ss:$16 sps:$4 sm:$0xff]  }
 0x330   :  { %5662 = vmatprep.subr.bf16.mxu0 %v7880_v45  ;;  %5776 = vmatpush1.bf16.msra.mxu1 %v7791_v49  ;;  %v7898_v49 = vld [vmem:[#allocation11 + $0x70c] ss:$16 sps:$4 sm:$0xff]  }
 0x331   :  { %5777 = vmatprep.subr.bf16.mxu1 %v7796_v13 }
 0x333   :  { %5663 = vmatpush1.bf16.msra.mxu0 %v7878_v12  ;;  %v7896_v12 = vld [vmem:[#allocation11 + $0x708] ss:$16 sps:$4 sm:$0xff]  }
 0x334   :  { %5664 = vmatprep.subr.bf16.mxu0 %v7886_v14  ;;  %5778 = vmatpush1.bf16.msra.mxu1 %v7794_v15  ;;  %v7920_v14 = vld [vmem:[#allocation14] ss:$8 sps:$4 sm:$0xff]  }
 0x335   :  { %5779 = vmatprep.subr.bf16.mxu1 %v7799_v16  ;;  %v7901_v16 = vld [vmem:[#allocation11 + $0x72c] ss:$16 sps:$4 sm:$0xff]  }
 0x337   :  { %5665 = vmatpush1.bf16.msra.mxu0 %v7884_v17  ;;  %v7925_v17 = vld [vmem:[#allocation14 + $0x14] ss:$8 sps:$4 sm:$0xff]  }
 0x338   :  { %5666 = vmatprep.subr.bf16.mxu0 %v7892_v18  ;;  %5780 = vmatpush1.bf16.msra.mxu1 %v7797_v21  ;;  %v7899_v18 = vld [vmem:[#allocation11 + $0x728] ss:$16 sps:$4 sm:$0xff]   ;;  %v7923_v21 = vld [vmem:[#allocation14 + $0x10] ss:$8 sps:$4 sm:$0xff]  }
 0x339   :  { %5781 = vmatprep.subr.bf16.mxu1 %v7805_v22  ;;  %v7904_v22 = vld [vmem:[#allocation11 + $0x74c] ss:$16 sps:$4 sm:$0xff]  }
 0x33b   :  { %5667 = vmatpush1.bf16.msra.mxu0 %v7890_v23  ;;  %v7928_v23 = vld [vmem:[#allocation14 + $0x24] ss:$8 sps:$4 sm:$0xff]  }
 0x33c   :  { %6259 = vmatprep.subr.bf16.mxu0 %v7922_v63  ;;  %5782 = vmatpush1.bf16.msra.mxu1 %v7803_v24  ;;  %v7902_v63 = vld [vmem:[#allocation11 + $0x748] ss:$16 sps:$4 sm:$0xff]   ;;  %v7926_v24 = vld [vmem:[#allocation14 + $0x20] ss:$8 sps:$4 sm:$0xff]  }
 0x33d   :  { %5783 = vmatprep.subr.bf16.mxu1 %v7811_v25  ;;  %v7907_v25 = vld [vmem:[#allocation11 + $0x76c] ss:$16 sps:$4 sm:$0xff]  }
 0x340   :  { %5784 = vmatpush1.bf16.msra.mxu1 %v7809_v26  ;;  %v7931_v26 = vld [vmem:[#allocation14 + $0x34] ss:$8 sps:$4 sm:$0xff]  }
 0x341   :  { %5785 = vmatprep.subr.bf16.mxu1 %v7817_v27  ;;  %v7905_v27 = vld [vmem:[#allocation11 + $0x768] ss:$16 sps:$4 sm:$0xff]  }
 0x344   :  { %5786 = vmatpush1.bf16.msra.mxu1 %v7815_v28  ;;  %v7929_v28 = vld [vmem:[#allocation14 + $0x30] ss:$8 sps:$4 sm:$0xff]  }
 0x345   :  { %5787 = vmatprep.subr.bf16.mxu1 %v7823_v9  ;;  %v7910_v9 = vld [vmem:[#allocation11 + $0x78c] ss:$16 sps:$4 sm:$0xff]  }
 0x348   :  { %5788 = vmatpush1.bf16.msra.mxu1 %v7821_v0  ;;  %v7934_v0 = vld [vmem:[#allocation14 + $0x44] ss:$8 sps:$4 sm:$0xff]  }
 0x349   :  { %5789 = vmatprep.subr.bf16.mxu1 %v7829_v32  ;;  %v7908_v32 = vld [vmem:[#allocation11 + $0x788] ss:$16 sps:$4 sm:$0xff]  }
 0x34c   :  { %5790 = vmatpush1.bf16.msra.mxu1 %v7827_v41  ;;  %v7932_v41 = vld [vmem:[#allocation14 + $0x40] ss:$8 sps:$4 sm:$0xff]  }
 0x34d   :  { %5791 = vmatprep.subr.bf16.mxu1 %v7835_v30  ;;  %v7913_v30 = vld [vmem:[#allocation11 + $0x7ac] ss:$16 sps:$4 sm:$0xff]  }
 0x350   :  { %5792 = vmatpush1.bf16.msra.mxu1 %v7833_v31  ;;  %v7937_v31 = vld [vmem:[#allocation14 + $0x54] ss:$8 sps:$4 sm:$0xff]  }
 0x351   :  { %5793 = vmatprep.subr.bf16.mxu1 %v7841_v35  ;;  %v7911_v35 = vld [vmem:[#allocation11 + $0x7a8] ss:$16 sps:$4 sm:$0xff]  }
 0x354   :  { %5794 = vmatpush1.bf16.msra.mxu1 %v7839_v37  ;;  %v7935_v37 = vld [vmem:[#allocation14 + $0x50] ss:$8 sps:$4 sm:$0xff]  }
 0x355   :  { %5795 = vmatprep.subr.bf16.mxu1 %v7847_v34  ;;  %v7916_v34 = vld [vmem:[#allocation11 + $0x7cc] ss:$16 sps:$4 sm:$0xff]  }
 0x358   :  { %5796 = vmatpush1.bf16.msra.mxu1 %v7845_v39  ;;  %v7940_v39 = vld [vmem:[#allocation14 + $0x64] ss:$8 sps:$4 sm:$0xff]  }
 0x359   :  { %5808 = vmatprep.subr.bf16.mxu1 %v7853_v43  ;;  %v7914_v43 = vld [vmem:[#allocation11 + $0x7c8] ss:$16 sps:$4 sm:$0xff]  }
 0x35b   :  { %5798 = vmatmul.mubr.bf16.vlgmr.msra.gmra.mrb[12].mxu1 %v8594_v20  ;;  %v951_v20 = vsub.s32 7, %v8414_v40  ;;  %v7992_v40 = vld [vmem:[#allocation14 + $0x180] ss:$8 sps:$4 sm:$0xff]  }
 0x35c   :  { %5809 = vmatpush1.bf16.msra.mxu1 %v7851_v44  ;;  %v7938_v44 = vld [vmem:[#allocation14 + $0x60] ss:$8 sps:$4 sm:$0xff]  }
 0x35d   :  { %5810 = vmatprep.subr.bf16.mxu1 %v7859_v47  ;;  %v952_v56 = vrot.slane %v8588_v36, %v951_v20  ;;  %v7919_v47 = vld [vmem:[#allocation11 + $0x7ec] ss:$16 sps:$4 sm:$0xff]   ;;  %v7955_v20 = vld [vmem:[#allocation14 + $0xb4] ss:$8 sps:$4 sm:$0xff]  }
 0x360   :  { %5811 = vmatpush1.bf16.msra.mxu1 %v7857_v46  ;;  %v7943_v46 = vld [vmem:[#allocation14 + $0x74] ss:$8 sps:$4 sm:$0xff]  }
 0x361   :  { %5812 = vmatprep.subr.bf16.mxu1 %v7865_v19  ;;  %v7917_v19 = vld [vmem:[#allocation11 + $0x7e8] ss:$16 sps:$4 sm:$0xff]  }
 0x364   :  { %5813 = vmatpush1.bf16.msra.mxu1 %v7863_v38  ;;  %v7941_v38 = vld [vmem:[#allocation14 + $0x70] ss:$8 sps:$4 sm:$0xff]  }
 0x365   :  { %5814 = vmatprep.subr.bf16.mxu1 %v7871_v50  ;;  %v7946_v50 = vld [vmem:[#allocation14 + $0x84] ss:$8 sps:$4 sm:$0xff]  }
 0x368   :  { %5815 = vmatpush1.bf16.msra.mxu1 %v7869_v60  ;;  %v7944_v60 = vld [vmem:[#allocation14 + $0x80] ss:$8 sps:$4 sm:$0xff]  }
 0x369   :  { %5816 = vmatprep.subr.bf16.mxu1 %v7877_v33  ;;  %v7949_v33 = vld [vmem:[#allocation14 + $0x94] ss:$8 sps:$4 sm:$0xff]  }
 0x36c   :  { %5817 = vmatpush1.bf16.msra.mxu1 %v7875_v51  ;;  %v7947_v51 = vld [vmem:[#allocation14 + $0x90] ss:$8 sps:$4 sm:$0xff]  }
 0x36d   :  { %5818 = vmatprep.subr.bf16.mxu1 %v7883_v42  ;;  %v7950_v42 = vld [vmem:[#allocation14 + $0xa0] ss:$8 sps:$4 sm:$0xff]  }
 0x36e   :  { %v3916_v55 = vpop.f32.mrb[8].mxu1 }
 0x36f   :  { %v3918_v58 = vpop.f32.mrb[9].mxu1  ;;  %v7424_v6 = vadd.f32 %v3916_v55, %v948_v29  ;;  %v7961_v55 = vld [vmem:[#allocation14 + $0xd4] ss:$8 sps:$4 sm:$0xff]  }
 0x370   :  { %v3920_v61 = vpop.f32.mrb[10].mxu1  ;;  %5819 = vmatpush1.bf16.msra.mxu1 %v7881_v53  ;;  %v7425_v8 = vadd.f32 %v3918_v58, %v952_v56  ;;  %v7953_v53 = vld [vmem:[#allocation14 + $0xb0] ss:$8 sps:$4 sm:$0xff]   ;;  %v7964_v58 = vld [vmem:[#allocation14 + $0xe4] ss:$8 sps:$4 sm:$0xff]  }
 0x371   :  { %v7426_v5 = vadd.f32 %v3920_v61, %v948_v29  ;;  %v3922_v62 = vpop.f32.mrb[11].mxu1  ;;  %5820 = vmatprep.subr.bf16.mxu1 %v7889_v54  ;;  %v7958_v29 = vld [vmem:[#allocation14 + $0xc4] ss:$8 sps:$4 sm:$0xff]   ;;  %v7956_v54 = vld [vmem:[#allocation14 + $0xc0] ss:$8 sps:$4 sm:$0xff]  }
 0x372   :  { %v7427_v1 = vadd.f32 %v3922_v62, %v952_v56  ;;  %v7959_v56 = vld [vmem:[#allocation14 + $0xd0] ss:$8 sps:$4 sm:$0xff]   ;;  %v7962_v61 = vld [vmem:[#allocation14 + $0xe0] ss:$8 sps:$4 sm:$0xff]  }
 0x373   :  { %v3931_v10 = vpack.c.bf16 %v7426_v5, %v7424_v6  ;;  %v7965_v6 = vld [vmem:[#allocation14 + $0xf0] ss:$8 sps:$4 sm:$0xff]   ;;  %v7970_v5 = vld [vmem:[#allocation14 + $0x104] ss:$8 sps:$4 sm:$0xff]  }
 0x374   :  { %v3932_v11 = vpack.c.bf16 %v7427_v1, %v7425_v8  ;;  %5821 = vmatpush1.bf16.msra.mxu1 %v7887_v4  ;;  %v7967_v4 = vld [vmem:[#allocation14 + $0xf4] ss:$8 sps:$4 sm:$0xff]   ;;  %v8016_v62 = vld [vmem:[#allocation17 + $0x40] sm:$0xff]   ;;  %v8018_v8 = vld [vmem:[#allocation17 + $0x48] sm:$0xff]  }
 0x375   :  { %v3939_v45 = vmul.bf16 1045249613, %v3931_v10  ;;  %5822 = vmatprep.subr.bf16.mxu1 %v7895_v7  ;;  %v8017_v7 = vld [vmem:[#allocation17] sm:$0xff]   ;;  %v8019_v1 = vld [vmem:[#allocation17 + $0x8] sm:$0xff]  }
 0x376   :  { %v3940_v13 = vmul.bf16 1045249613, %v3932_v11 }
 0x377   :  { %v8605_v15 = vmax.bf16 %v3939_v45, %v3931_v10  ;;  %v8020_v10 = vld [vmem:[#allocation17 + $0x50] sm:$0xff]   ;;  %v8023_v45 = vld [vmem:[#allocation17 + $0x18] sm:$0xff]  }
 0x378   :  { %5823 = vmatpush1.bf16.msra.mxu1 %v7893_v2  ;;  %v3948_v36 = vmax.bf16 %v3940_v13, %v3932_v11  ;;  %v8021_v11 = vld [vmem:[#allocation17 + $0x10] sm:$0xff]   ;;  %v8022_v2 = vld [vmem:[#allocation17 + $0x58] sm:$0xff]   ;;  %v8025_v13 = vld [vmem:[#allocation17 + $0x20] sm:$0xff]  }
 0x379   :  { %5824 = vmatprep.subr.bf16.mxu1 %v7898_v49  ;;  %v8024_v49 = vld [vmem:[#allocation17 + $0x60] sm:$0xff]  }
 0x37a   :  { %5668 = vmatprep.mubr.bf16.mxu0 %v3948_v36  ;;  %5840 = vmatprep.mubr.bf16.mxu1 %v3948_v36  ;;  %v4205_v36 = vld [vmem:[#allocation12] sm:$0xf] }
 0x37b   :  { %5669 = vmatmul.mubr.bf16.vlgmr.msra.gmra.mrb[8].mxu0 %v8605_v15 }
 0x37c   :  { %5825 = vmatpush1.bf16.msra.mxu1 %v7896_v12  ;;  %6260 = vmatpush1.bf16.msra.mxu0 %v7920_v14  ;;  %v4210_v12 = vrot.slane %v4205_v36, %v8539_v48 }
 0x37d   :  { %5826 = vmatprep.subr.bf16.mxu1 %v7901_v16  ;;  %6261 = vmatprep.subr.bf16.mxu0 %v7925_v17 }
 0x380   :  { %5827 = vmatpush1.bf16.msra.mxu1 %v7899_v18  ;;  %6262 = vmatpush1.bf16.msra.mxu0 %v7923_v21 }
 0x381   :  { %5828 = vmatprep.subr.bf16.mxu1 %v7904_v22  ;;  %6263 = vmatprep.subr.bf16.mxu0 %v7928_v23 }
 0x384   :  { %5829 = vmatpush1.bf16.msra.mxu1 %v7902_v63  ;;  %6264 = vmatpush1.bf16.msra.mxu0 %v7926_v24 }
 0x385   :  { %5830 = vmatprep.subr.bf16.mxu1 %v7907_v25  ;;  %6265 = vmatprep.subr.bf16.mxu0 %v7931_v26 }
 0x388   :  { %5831 = vmatpush1.bf16.msra.mxu1 %v7905_v27  ;;  %6266 = vmatpush1.bf16.msra.mxu0 %v7929_v28 }
 0x389   :  { %5832 = vmatprep.subr.bf16.mxu1 %v7910_v9  ;;  %6267 = vmatprep.subr.bf16.mxu0 %v7934_v0  ;;  %v7968_v9 = vld [vmem:[#allocation14 + $0x100] ss:$8 sps:$4 sm:$0xff]  }
 0x38c   :  { %5833 = vmatpush1.bf16.msra.mxu1 %v7908_v32  ;;  %6268 = vmatpush1.bf16.msra.mxu0 %v7932_v41  ;;  %v7973_v32 = vld [vmem:[#allocation14 + $0x114] ss:$8 sps:$4 sm:$0xff]   ;;  %v7971_v41 = vld [vmem:[#allocation14 + $0x110] ss:$8 sps:$4 sm:$0xff]  }
 0x38d   :  { %5834 = vmatprep.subr.bf16.mxu1 %v7913_v30  ;;  %6269 = vmatprep.subr.bf16.mxu0 %v7937_v31  ;;  %v7976_v30 = vld [vmem:[#allocation14 + $0x124] ss:$8 sps:$4 sm:$0xff]   ;;  %v7974_v31 = vld [vmem:[#allocation14 + $0x120] ss:$8 sps:$4 sm:$0xff]  }
 0x390   :  { %5835 = vmatpush1.bf16.msra.mxu1 %v7911_v35  ;;  %6270 = vmatpush1.bf16.msra.mxu0 %v7935_v37  ;;  %v7979_v35 = vld [vmem:[#allocation14 + $0x134] ss:$8 sps:$4 sm:$0xff]   ;;  %v7977_v37 = vld [vmem:[#allocation14 + $0x130] ss:$8 sps:$4 sm:$0xff]  }
 0x391   :  { %5836 = vmatprep.subr.bf16.mxu1 %v7916_v34  ;;  %6271 = vmatprep.subr.bf16.mxu0 %v7940_v39  ;;  %v7982_v34 = vld [vmem:[#allocation14 + $0x144] ss:$8 sps:$4 sm:$0xff]   ;;  %v7980_v39 = vld [vmem:[#allocation14 + $0x140] ss:$8 sps:$4 sm:$0xff]  }
 0x394   :  { %5837 = vmatpush1.bf16.msra.mxu1 %v7914_v43  ;;  %6272 = vmatpush1.bf16.msra.mxu0 %v7938_v44  ;;  %v7985_v43 = vld [vmem:[#allocation14 + $0x154] ss:$8 sps:$4 sm:$0xff]   ;;  %v7983_v44 = vld [vmem:[#allocation14 + $0x150] ss:$8 sps:$4 sm:$0xff]  }
 0x395   :  { %5838 = vmatprep.subr.bf16.mxu1 %v7919_v47  ;;  %6273 = vmatprep.subr.bf16.mxu0 %v7943_v46  ;;  %v4218_v47 = vrot.slane %v4205_v36, %v931_v57  ;;  %v7988_v46 = vld [vmem:[#allocation14 + $0x164] ss:$8 sps:$4 sm:$0xff]   ;;  %v7989_v57 = vld [vmem:[#allocation14 + $0x170] ss:$8 sps:$4 sm:$0xff]  }
 0x398   :  { %5839 = vmatpush1.bf16.msra.mxu1 %v7917_v19  ;;  %6274 = vmatpush1.bf16.msra.mxu0 %v7941_v38  ;;  %v4222_v38 = vrot.slane %v4205_v36, %v935_v59 }
 0x399   :  { %6275 = vmatprep.subr.bf16.mxu0 %v7946_v50  ;;  %7386 = vmatprep.subr.bf16.mxu1 %v8016_v62  ;;  %v8003_v62 = vld [vmem:[#allocation14 + $0x1b4] ss:$8 sps:$4 sm:$0xff]  }
 0x39b   :  { %5841 = vmatmul.mubr.bf16.vlgmr.msra.gmra.mrb[12].mxu1 %v8605_v15  ;;  %v4214_v15 = vrot.slane %v4205_v36, %v8544_v3 }
 0x39c   :  { %6276 = vmatpush1.bf16.msra.mxu0 %v7944_v60  ;;  %7387 = vmatpush3.bf16.msra.mxu1 %v8017_v7  ;;  %v8001_v7 = vld [vmem:[#allocation14 + $0x1b0] ss:$8 sps:$4 sm:$0xff]  }
 0x39d   :  { %6277 = vmatprep.subr.bf16.mxu0 %v7949_v33  ;;  %7388 = vmatprep.subr.bf16.mxu1 %v8018_v8  ;;  %v7986_v33 = vld [vmem:[#allocation14 + $0x160] ss:$8 sps:$4 sm:$0xff]   ;;  %v8006_v8 = vld [vmem:[#allocation14 + $0x1c4] ss:$8 sps:$4 sm:$0xff]  }
 0x3a0   :  { %6278 = vmatpush1.bf16.msra.mxu0 %v7947_v51  ;;  %7389 = vmatpush3.bf16.msra.mxu1 %v8019_v1  ;;  %v8004_v1 = vld [vmem:[#allocation14 + $0x1c0] ss:$8 sps:$4 sm:$0xff]  }
 0x3a1   :  { %6279 = vmatprep.subr.bf16.mxu0 %v7952_v52  ;;  %7390 = vmatprep.subr.bf16.mxu1 %v8020_v10  ;;  %v8009_v10 = vld [vmem:[#allocation14 + $0x1d4] ss:$8 sps:$4 sm:$0xff]  }
 0x3a4   :  { %6280 = vmatpush1.bf16.msra.mxu0 %v7950_v42  ;;  %7391 = vmatpush3.bf16.msra.mxu1 %v8021_v11  ;;  %v8007_v11 = vld [vmem:[#allocation14 + $0x1d0] ss:$8 sps:$4 sm:$0xff]  }
 0x3a5   :  { %6281 = vmatprep.subr.bf16.mxu0 %v7955_v20  ;;  %7392 = vmatprep.subr.bf16.mxu1 %v8022_v2  ;;  %v7991_v20 = vld [vmem:[#allocation14 + $0x174] ss:$8 sps:$4 sm:$0xff]   ;;  %v8012_v2 = vld [vmem:[#allocation14 + $0x1e4] ss:$8 sps:$4 sm:$0xff]  }
 0x3a8   :  { %6282 = vmatpush1.bf16.msra.mxu0 %v7953_v53  ;;  %7393 = vmatpush3.bf16.msra.mxu1 %v8023_v45  ;;  %v8010_v45 = vld [vmem:[#allocation14 + $0x1e0] ss:$8 sps:$4 sm:$0xff]  }
 0x3a9   :  { %6283 = vmatprep.subr.bf16.mxu0 %v7958_v29  ;;  %7394 = vmatprep.subr.bf16.mxu1 %v8024_v49  ;;  %v8015_v49 = vld [vmem:[#allocation14 + $0x1f4] ss:$8 sps:$4 sm:$0xff]  }
 0x3ac   :  { %6284 = vmatpush1.bf16.msra.mxu0 %v7956_v54  ;;  %7395 = vmatpush3.bf16.msra.mxu1 %v8025_v13  ;;  %v8013_v13 = vld [vmem:[#allocation14 + $0x1f0] ss:$8 sps:$4 sm:$0xff]  }
 0x3ad   :  { %6285 = vmatprep.subr.bf16.mxu0 %v7961_v55 }
 0x3b0   :  { %6286 = vmatpush1.bf16.msra.mxu0 %v7959_v56  ;;  %v7994_v56 = vld [vmem:[#allocation14 + $0x184] ss:$8 sps:$4 sm:$0xff]  }
 0x3b1   :  { %6287 = vmatprep.subr.bf16.mxu0 %v7964_v58 }
 0x3b4   :  { %6288 = vmatpush1.bf16.msra.mxu0 %v7962_v61  ;;  %v7997_v61 = vld [vmem:[#allocation14 + $0x194] ss:$8 sps:$4 sm:$0xff]  }
 0x3b5   :  { %6289 = vmatprep.subr.bf16.mxu0 %v7967_v4  ;;  %v7995_v4 = vld [vmem:[#allocation14 + $0x190] ss:$8 sps:$4 sm:$0xff]  }
 0x3b8   :  { %6290 = vmatpush1.bf16.msra.mxu0 %v7965_v6  ;;  %v8000_v6 = vld [vmem:[#allocation14 + $0x1a4] ss:$8 sps:$4 sm:$0xff]  }
 0x3b9   :  { %6302 = vmatprep.subr.bf16.mxu0 %v7970_v5  ;;  %v7998_v5 = vld [vmem:[#allocation14 + $0x1a0] ss:$8 sps:$4 sm:$0xff]  }
 0x44e   :  { %v5670_v14 = vpop.f32.mrb[8].mxu0 }
 0x44f   :  { %v5672_v16 = vpop.f32.mrb[9].mxu0  ;;  %v7428_v18 = vadd.f32 %v5670_v14, %v4210_v12  ;;  %v8026_v14 = vld [vmem:[#allocation17 + $0x68] sm:$0xff]  }
 0x450   :  { %v5674_v17 = vpop.f32.mrb[10].mxu0  ;;  %v7429_v23 = vadd.f32 %v5672_v16, %v4214_v15  ;;  %7396 = vmatprep.subr.bf16.mxu1 %v8026_v14  ;;  %v8028_v16 = vld [vmem:[#allocation17 + $0x70] sm:$0xff]  }
 0x451   :  { %v7430_v21 = vadd.f32 %v5674_v17, %v4210_v12  ;;  %v5676_v22 = vpop.f32.mrb[11].mxu0  ;;  %v8029_v17 = vld [vmem:[#allocation17 + $0x30] sm:$0xff]  }
 0x452   :  { %v7431_v63 = vadd.f32 %v5676_v22, %v4214_v15  ;;  %v8027_v15 = vld [vmem:[#allocation17 + $0x28] sm:$0xff]   ;;  %v5927_v22 = vld [vmem:[#allocation15] sm:$0x3] }
 0x453   :  { %v5851_v24 = vpack.c.bf16 %v7430_v21, %v7428_v18  ;;  %7397 = vmatpush3.bf16.msra.mxu1 %v8027_v15  ;;  %v8030_v18 = vld [vmem:[#allocation17 + $0x78] sm:$0xff]  }
 0x454   :  { %v5852_v25 = vpack.c.bf16 %v7431_v63, %v7429_v23  ;;  %7398 = vmatprep.subr.bf16.mxu1 %v8028_v16  ;;  %v8031_v21 = vld [vmem:[#allocation17 + $0x38] sm:$0xff]   ;;  %v5932_v23 = vrot.slane %v5927_v22, %v8539_v48  ;;  %v7346_v48 = vld [vmem:[#allocation18] ss:$0 sm:$0xff] }
 0x455   :  { %v5855_v26 = vmul.bf16 1045249613, %v5851_v24 }
 0x456   :  { %v5856_v27 = vmul.bf16 1045249613, %v5852_v25 }
 0x457   :  { %v5859_v0 = vmax.bf16 %v5855_v26, %v5851_v24  ;;  %7399 = vmatpush3.bf16.msra.mxu1 %v8029_v17  ;;  %v5936_v24 = vrot.slane %v5927_v22, %v8544_v3 }
 0x458   :  { %v5860_v28 = vmax.bf16 %v5856_v27, %v5852_v25  ;;  %7400 = vmatprep.subr.bf16.mxu1 %v8030_v18 }
 0x45a   :  { %6291 = vmatprep.mubr.bf16.mxu0 %v5860_v28 }
 0x45b   :  { %6292 = vmatmul.mubr.bf16.vlgmr.msra.gmra.mrb[12].mxu0 %v5859_v0  ;;  %7401 = vmatpush3.bf16.msra.mxu1 %v8031_v21 }
 0x45c   :  { %6303 = vmatpush1.bf16.msra.mxu0 %v7968_v9 }
 0x45d   :  { %6304 = vmatprep.subr.bf16.mxu0 %v7973_v32 }
 0x460   :  { %6305 = vmatpush1.bf16.msra.mxu0 %v7971_v41 }
 0x461   :  { %6306 = vmatprep.subr.bf16.mxu0 %v7976_v30 }
 0x464   :  { %6307 = vmatpush1.bf16.msra.mxu0 %v7974_v31 }
 0x465   :  { %6308 = vmatprep.subr.bf16.mxu0 %v7979_v35 }
 0x468   :  { %6309 = vmatpush1.bf16.msra.mxu0 %v7977_v37 }
 0x469   :  { %6310 = vmatprep.subr.bf16.mxu0 %v7982_v34 }
 0x46c   :  { %6311 = vmatpush1.bf16.msra.mxu0 %v7980_v39 }
 0x46d   :  { %6312 = vmatprep.subr.bf16.mxu0 %v7985_v43 }
 0x46e   :  { %v5842_v19 = vpop.f32.mrb[12].mxu1 }
 0x46f   :  { %v5844_v50 = vpop.f32.mrb[13].mxu1  ;;  %v7432_v51 = vadd.f32 %v5842_v19, %v4218_v47 }
 0x470   :  { %6313 = vmatpush1.bf16.msra.mxu0 %v7983_v44  ;;  %v5846_v60 = vpop.f32.mrb[14].mxu1  ;;  %v7433_v53 = vadd.f32 %v5844_v50, %v4222_v38 }
 0x471   :  { %v7434_v52 = vadd.f32 %v5846_v60, %v4218_v47  ;;  %v5848_v42 = vpop.f32.mrb[15].mxu1  ;;  %6314 = vmatprep.subr.bf16.mxu0 %v7988_v46 }
 0x472   :  { %v7435_v29 = vadd.f32 %v5848_v42, %v4222_v38 }
 0x473   :  { %v5853_v54 = vpack.c.bf16 %v7434_v52, %v7432_v51 }
 0x474   :  { %v5854_v55 = vpack.c.bf16 %v7435_v29, %v7433_v53  ;;  %6315 = vmatpush1.bf16.msra.mxu0 %v7986_v33 }
 0x475   :  { %6316 = vmatprep.subr.bf16.mxu0 %v7991_v20  ;;  %v5857_v36 = vmul.bf16 1045249613, %v5853_v54 }
 0x476   :  { %v5858_v58 = vmul.bf16 1045249613, %v5854_v55 }
 0x477   :  { %v5861_v12 = vmax.bf16 %v5857_v36, %v5853_v54 }
 0x478   :  { %6317 = vmatpush1.bf16.msra.mxu0 %v7989_v57  ;;  %v5862_v59 = vmax.bf16 %v5858_v58, %v5854_v55 }
 0x479   :  { %6318 = vmatprep.subr.bf16.mxu0 %v7994_v56 }
 0x47a   :  { %6334 = vmatprep.mubr.bf16.mxu0 %v5862_v59 }
 0x47c   :  { %6319 = vmatpush1.bf16.msra.mxu0 %v7992_v40 }
 0x47d   :  { %6320 = vmatprep.subr.bf16.mxu0 %v7997_v61 }
 0x480   :  { %6321 = vmatpush1.bf16.msra.mxu0 %v7995_v4 }
 0x481   :  { %6322 = vmatprep.subr.bf16.mxu0 %v8000_v6 }
 0x484   :  { %6323 = vmatpush1.bf16.msra.mxu0 %v7998_v5 }
 0x485   :  { %6324 = vmatprep.subr.bf16.mxu0 %v8003_v62 }
 0x488   :  { %6325 = vmatpush1.bf16.msra.mxu0 %v8001_v7 }
 0x489   :  { %6326 = vmatprep.subr.bf16.mxu0 %v8006_v8 }
 0x48c   :  { %6327 = vmatpush1.bf16.msra.mxu0 %v8004_v1 }
 0x48d   :  { %6328 = vmatprep.subr.bf16.mxu0 %v8009_v10 }
 0x490   :  { %6329 = vmatpush1.bf16.msra.mxu0 %v8007_v11 }
 0x491   :  { %6330 = vmatprep.subr.bf16.mxu0 %v8012_v2 }
 0x494   :  { %6331 = vmatpush1.bf16.msra.mxu0 %v8010_v45 }
 0x495   :  { %6332 = vmatprep.subr.bf16.mxu0 %v8015_v49 }
 0x498   :  { %6333 = vmatpush1.bf16.msra.mxu0 %v8013_v13 }
 0x49b   :  { %6335 = vmatmul.mubr.bf16.vlgmr.msra.gmra.mrb[12].mxu0 %v5861_v12 }
 0x56e   :  { %v6336_v63 = vpop.f32.mrb[12].mxu0 }
 0x56f   :  { %v6338_v25 = vpop.f32.mrb[13].mxu0  ;;  %v7436_v27 = vadd.f32 %v6336_v63, %v5932_v23 }
 0x570   :  { %v6340_v26 = vpop.f32.mrb[14].mxu0  ;;  %v7437_v0 = vadd.f32 %v6338_v25, %v5936_v24 }
 0x571   :  { %v7438_v28 = vadd.f32 %v6340_v26, %v5932_v23  ;;  %v6342_v9 = vpop.f32.mrb[15].mxu0 }
 0x572   :  { %v7439_v32 = vadd.f32 %v6342_v9, %v5936_v24 }
 0x573   :  { %v6345_v41 = vpack.c.bf16 %v7438_v28, %v7436_v27 }
 0x574   :  { %v6346_v30 = vpack.c.bf16 %v7439_v32, %v7437_v0 }
 0x575   :  { %v6347_v31 = vmul.bf16 1045249613, %v6345_v41 }
 0x576   :  { %v6348_v35 = vmul.bf16 1045249613, %v6346_v30 }
 0x577   :  { %v6349_v34 = vmax.bf16 %v6347_v31, %v6345_v41 }
 0x578   :  { %v6350_v37 = vmax.bf16 %v6348_v35, %v6346_v30 }
 0x57a   :  { %6518 = vmatprep.mubr.bf16.mxu1 %v6350_v37 }
 0x57b   :  { %6519 = vmatmul.mubr.bf16.vlgmr.msra.gmra.mrb[16].mxu1 %v6349_v34 }
 0x64e   :  { %v7402_v39 = vpop.f32.mrb[16].mxu1 }
 0x64f   :  { %v7403_v43 = vpop.f32.mrb[17].mxu1 }
 0x650   :  { %v7404_v44 = vadd.f32 %v7403_v43, %v7402_v39  ;;  %v7405_v3 = vpop.f32.mrb[18].mxu1 }
 0x651   :  { %v7406_v47 = vpop.f32.mrb[19].mxu1 }
 0x652   :  { %v6521_v46 = vadd.f32 %v7404_v44, %v7346_v48  ;;  %v7407_v19 = vadd.f32 %v7406_v47, %v7405_v3 }
 0x654   :  { %v7363_v38 = vmul.f32 -1.442695, %v6521_v46  ;;  %v6524_v50 = vadd.f32 %v7407_v19, %v7346_v48 }
 0x656   :  { %8032 = vpow2.f32 %v7363_v38  ;;  %v7364_v60 = vmul.f32 -1.442695, %v6524_v50 }
 0x658   :  { %8034 = vpow2.f32 %v7364_v60 }
 0x660   :  { %v8033_v33 = vpop.eup %8032 }
 0x661   :  { %v6533_v51 = vadd.f32 1.0, %v8033_v33 }
 0x662   :  { %v8035_v52 = vpop.eup %8034 }
 0x663   :  { %v6534_v42 = vadd.f32 1.0, %v8035_v52  ;;  %8036 = vrcp.f32 %v6533_v51 }
 0x665   :  { %8038 = vrcp.f32 %v6534_v42 }
 0x66d   :  { %v8037_v20 = vpop.eup %8036 }
 0x66f   :  { %v8039_v53 = vpop.eup %8038 }
 0x670   :  { %v7382_v29 = vpack.c.bf16 %v8039_v53, %v8037_v20 }
 0x672   :  { %7383 = vst [vmem:[%s8630_s10] sm:$0xff] %v7382_v29  }
 0x673   :  { %6553 = vsyncpa [#allocation8], 1 }
 0x674   :  { %6554 = vsyncpa [#allocation10], 1 }
 0x675   :  { %6555 = vsyncpa [#allocation13], 1 }
 0x676   :  { %6556 = vsyncpa [#allocation16], 1 }
 0x677   :  { %6557 = vsyncpa [#allocation19], 1 }

</bundles_post_ra>
